<compile_context>
chip_gen: v6e
topology: v6e:2x2x1
jax: 0.10.0
libtpu: 0.0.40
codegen_flags: <defaults>
</compile_context>

<pallas_src>
import jax
import jax.numpy as jnp
from jax.experimental import pallas as pl
from jax.experimental.pallas import tpu as pltpu


TB = 8  # images per grid step (matches one sublane group for the fc matmuls)


# ----------------------------- fused kernel ----------------------------------

def fused_forward_kernel(p_ref, wc_ref, bc_ref, wf_ref, bf_ref, o_ref, xs_ref):
    # p_ref : (4, 25, TB*144)  im2col patches for TB images;
    #                          axis0 = position in the 2x2 pool window,
    #                          axis2 index = b*144 + q (q = pooled pixel)
    # wc_ref: (16, 25)         conv weight  (out_ch, 5*5)
    # bc_ref: (16, 1)          conv bias
    # wf_ref: (16, 144, 10)    fc weight regrouped per conv channel (CHW order)
    # bf_ref: (1, 10)          fc bias
    # o_ref : (TB, 10)         logits for this image tile
    # xs_ref: (TB, 16, 144)    VMEM scratch: pooled activation, batch-major
    wc = wc_ref[...]                                                   # (16, 25)

    # Conv for each of the 4 positions of the 2x2 pool window; fold the
    # max-pool directly into the accumulation (bias add + ReLU commute with
    # the max: bias is a per-channel constant, ReLU is monotone).
    m = jnp.dot(wc, p_ref[0], preferred_element_type=jnp.float32)      # (16, TB*144)
    for pos in range(1, 4):
        m = jnp.maximum(
            m, jnp.dot(wc, p_ref[pos], preferred_element_type=jnp.float32))

    pooled = jnp.maximum(m + bc_ref[...], 0.0)                         # (16, TB*144)

    # Regroup channel-major lanes -> batch-major scratch: xs[b, c, q].
    for b in range(TB):
        xs_ref[b] = pooled[:, b * 144:(b + 1) * 144]                   # (16, 144)

    # fc: logits[b, o] = sum_c xs[b, c, :] @ wf[c]  (+ bias)
    acc = jnp.zeros((TB, 10), jnp.float32) + bf_ref[...]               # (TB, 10)
    for c in range(16):
        acc = acc + jnp.dot(xs_ref[:, c, :], wf_ref[c],
                            preferred_element_type=jnp.float32)
    o_ref[...] = acc.astype(o_ref.dtype)


# ----------------------------- wrapper ----------------------------------------

def prepare_params(params):
    """One-time weight re-layout (keeps PyTorch's CHW flatten order)."""
    wconv, bconv, wfc, bfc = (params["wconv"], params["bconv"],
                              params["wfc"], params["bfc"])
    return {
        "wc": wconv.reshape(16, 25),                          # (16, 25)
        "bc": bconv.reshape(16, 1),                           # (16, 1)
        # wfc[o, c*144 + q]  ->  wf[c, q, o]
        "wf": wfc.reshape(10, 16, 144).transpose(1, 2, 0),    # (16, 144, 10)
        "bf": bfc.reshape(1, 10),                             # (1, 10)
    }


def build_patches(x):
    """x: (B, 1, 28, 28) -> (B, 4, 25, 144) im2col patches.

    result[b, ph*2+pw, di*5+dj, i2*12+j2] = x[b, 0, 2*i2+ph+di, 2*j2+pw+dj]
    """
    B = x.shape[0]
    x2 = x[:, 0]                                              # (B, 28, 28)
    cols = jnp.stack(
        [x2[:, di:di + 24, dj:dj + 24] for di in range(5) for dj in range(5)],
        axis=1,
    )                                                         # (B, 25, 24, 24)
    cols = cols.reshape(B, 25, 12, 2, 12, 2)                  # [b,k,i2,ph,j2,pw]
    cols = cols.transpose(0, 3, 5, 1, 2, 4)                   # [b,ph,pw,k,i2,j2]
    return cols.reshape(B, 4, 25, 144)


def model_forward(x, prepped):
    """x: (B, 1, 28, 28) float32 (NCHW, like PyTorch). Returns (B, 10) logits."""
    B = x.shape[0]
    nb = pl.cdiv(B, TB)
    b_pad = nb * TB

    patches = build_patches(x)                                # (B, 4, 25, 144)
    if b_pad != B:
        patches = jnp.pad(patches,
                          ((0, b_pad - B), (0, 0), (0, 0), (0, 0)))
    # Tile layout: (nb, 4, 25, TB*144) with lane index = b*144 + q.
    p = (patches.reshape(nb, TB, 4, 25, 144)
                 .transpose(0, 2, 3, 1, 4)
                 .reshape(nb, 4, 25, TB * 144))

    out = pl.pallas_call(
        fused_forward_kernel,
        out_shape=jax.ShapeDtypeStruct((b_pad, 10), jnp.float32),
        grid=(nb,),
        in_specs=[
            pl.BlockSpec((None, 4, 25, TB * 144), lambda i: (i, 0, 0, 0)),
            pl.BlockSpec((16, 25), lambda i: (0, 0)),
            pl.BlockSpec((16, 1), lambda i: (0, 0)),
            pl.BlockSpec((16, 144, 10), lambda i: (0, 0, 0)),
            pl.BlockSpec((1, 10), lambda i: (0, 0)),
        ],
        out_specs=pl.BlockSpec((TB, 10), lambda i: (i, 0)),
        scratch_shapes=[pltpu.VMEM((TB, 16, 144), jnp.float32)],
        compiler_params=pltpu.CompilerParams(
            dimension_semantics=("parallel",)),
    )(p, prepped["wc"], prepped["bc"], prepped["wf"], prepped["bf"])
    return out[:B]


# ----------------------------- plain-JAX reference ----------------------------

def reference_forward(x, params):
    wconv, bconv, wfc, bfc = (params["wconv"], params["bconv"],
                              params["wfc"], params["bfc"])
    y = jax.lax.conv_general_dilated(
        x, wconv, window_strides=(1, 1), padding="VALID",
        dimension_numbers=("NCHW", "OIHW", "NCHW"),
    )
    y = jnp.maximum(y + bconv.reshape(1, 16, 1, 1), 0.0)
    y = jax.lax.reduce_window(
        y, -jnp.inf, jax.lax.max, (1, 1, 2, 2), (1, 1, 2, 2), "VALID")
    y = y.reshape(x.shape[0], 2304)
    return y @ wfc.T + bfc


# ----------------------------- main -------------------------------------------

if __name__ == "__main__":
    key = jax.random.PRNGKey(0)
    k_x, k_wc, k_bc, k_wf, k_bf = jax.random.split(key, 5)

    B = 2
    x = jax.random.normal(k_x, (B, 1, 28, 28), dtype=jnp.float32)

    # deterministic synthetic parameters (shapes from nn.Conv2d(1,16,5) / nn.Linear(2304,10))
    params = {
        "wconv": 0.1 * jax.random.normal(k_wc, (16, 1, 5, 5), dtype=jnp.float32),
        "bconv": 0.1 * jax.random.normal(k_bc, (16,), dtype=jnp.float32),
        "wfc":   0.02 * jax.random.normal(k_wf, (10, 2304), dtype=jnp.float32),
        "bfc":   0.1 * jax.random.normal(k_bf, (10,), dtype=jnp.float32),
    }

    prepped = jax.tree.map(jnp.asarray, prepare_params(params))  # one-time prep
    fwd = jax.jit(model_forward)

    logits = jax.block_until_ready(fwd(x, prepped))
    ref = reference_forward(x, params)

    assert logits.shape == (B, 10)
    assert jnp.allclose(logits, ref, rtol=1e-4, atol=1e-4), (
        f"max abs err = {jnp.max(jnp.abs(logits - ref))}"
    )

    print("KERNEL_OK")
</pallas_src>

<mosaic_0001>
module attributes {stable_mosaic.version = 11 : i64} {
  func.func @fused_forward_kernel(%arg0: i32, %arg1: memref<1x4x25x1152xf32, #tpu.memory_space<vmem>>, %arg2: memref<16x25xf32, #tpu.memory_space<vmem>>, %arg3: memref<16x1xf32, #tpu.memory_space<vmem>>, %arg4: memref<16x144x10xf32, #tpu.memory_space<vmem>>, %arg5: memref<1x10xf32, #tpu.memory_space<vmem>>, %arg6: memref<8x10xf32, #tpu.memory_space<vmem>>, %arg7: memref<8x16x144xf32, #tpu.memory_space<vmem>>) attributes {dimension_semantics = [#tpu.dimension_semantics<parallel>], iteration_bounds = array<i64: 1>, scalar_prefetch = 0 : i64, scratch_operands = 1 : i64, tpu.core_type = #tpu.core_type<tc>, window_params = [{transform_indices = @transform_0, window_bounds = array<i64: 1, 4, 25, 1152>}, {pipeline_mode = #tpu.pipeline_mode<synchronous>, transform_indices = @transform_1, window_bounds = array<i64: 16, 25>}, {pipeline_mode = #tpu.pipeline_mode<synchronous>, transform_indices = @transform_2, window_bounds = array<i64: 16, 1>}, {pipeline_mode = #tpu.pipeline_mode<synchronous>, transform_indices = @transform_3, window_bounds = array<i64: 16, 144, 10>}, {pipeline_mode = #tpu.pipeline_mode<synchronous>, transform_indices = @transform_4, window_bounds = array<i64: 1, 10>}, {transform_indices = @transform_5, window_bounds = array<i64: 8, 10>}]} {
    %c0 = arith.constant 0 : index
    %c0_0 = arith.constant 0 : index
    %0 = vector.load %arg2[%c0, %c0_0] : memref<16x25xf32, #tpu.memory_space<vmem>>, vector<16x25xf32>
    %c0_1 = arith.constant 0 : index
    %c0_2 = arith.constant 0 : index
    %c0_3 = arith.constant 0 : index
    %c0_4 = arith.constant 0 : index
    %1 = vector.load %arg1[%c0_1, %c0_2, %c0_3, %c0_4] : memref<1x4x25x1152xf32, #tpu.memory_space<vmem>>, vector<1x1x25x1152xf32>
    %2 = vector.shape_cast %1 : vector<1x1x25x1152xf32> to vector<25x1152xf32>
    %cst = arith.constant dense<0.000000e+00> : vector<16x1152xf32>
    %3 = tpu.matmul %0, %2, %cst {dimension_numbers = #tpu.dot_dimension_numbers<[1], [0], [0], [1], [0, 0, 1, 1], [], []>} : vector<16x25xf32>, vector<25x1152xf32>, vector<16x1152xf32> -> vector<16x1152xf32>
    %c0_5 = arith.constant 0 : index
    %c1 = arith.constant 1 : index
    %c0_6 = arith.constant 0 : index
    %c0_7 = arith.constant 0 : index
    %4 = vector.load %arg1[%c0_5, %c1, %c0_6, %c0_7] : memref<1x4x25x1152xf32, #tpu.memory_space<vmem>>, vector<1x1x25x1152xf32>
    %5 = vector.shape_cast %4 : vector<1x1x25x1152xf32> to vector<25x1152xf32>
    %cst_8 = arith.constant dense<0.000000e+00> : vector<16x1152xf32>
    %6 = tpu.matmul %0, %5, %cst_8 {dimension_numbers = #tpu.dot_dimension_numbers<[1], [0], [0], [1], [0, 0, 1, 1], [], []>} : vector<16x25xf32>, vector<25x1152xf32>, vector<16x1152xf32> -> vector<16x1152xf32>
    %7 = arith.maximumf %3, %6 : vector<16x1152xf32>
    %c0_9 = arith.constant 0 : index
    %c2 = arith.constant 2 : index
    %c0_10 = arith.constant 0 : index
    %c0_11 = arith.constant 0 : index
    %8 = vector.load %arg1[%c0_9, %c2, %c0_10, %c0_11] : memref<1x4x25x1152xf32, #tpu.memory_space<vmem>>, vector<1x1x25x1152xf32>
    %9 = vector.shape_cast %8 : vector<1x1x25x1152xf32> to vector<25x1152xf32>
    %cst_12 = arith.constant dense<0.000000e+00> : vector<16x1152xf32>
    %10 = tpu.matmul %0, %9, %cst_12 {dimension_numbers = #tpu.dot_dimension_numbers<[1], [0], [0], [1], [0, 0, 1, 1], [], []>} : vector<16x25xf32>, vector<25x1152xf32>, vector<16x1152xf32> -> vector<16x1152xf32>
    %11 = arith.maximumf %7, %10 : vector<16x1152xf32>
    %c0_13 = arith.constant 0 : index
    %c3 = arith.constant 3 : index
    %c0_14 = arith.constant 0 : index
    %c0_15 = arith.constant 0 : index
    %12 = vector.load %arg1[%c0_13, %c3, %c0_14, %c0_15] : memref<1x4x25x1152xf32, #tpu.memory_space<vmem>>, vector<1x1x25x1152xf32>
    %13 = vector.shape_cast %12 : vector<1x1x25x1152xf32> to vector<25x1152xf32>
    %cst_16 = arith.constant dense<0.000000e+00> : vector<16x1152xf32>
    %14 = tpu.matmul %0, %13, %cst_16 {dimension_numbers = #tpu.dot_dimension_numbers<[1], [0], [0], [1], [0, 0, 1, 1], [], []>} : vector<16x25xf32>, vector<25x1152xf32>, vector<16x1152xf32> -> vector<16x1152xf32>
    %15 = arith.maximumf %11, %14 : vector<16x1152xf32>
    %c0_17 = arith.constant 0 : index
    %c0_18 = arith.constant 0 : index
    %16 = vector.load %arg3[%c0_17, %c0_18] : memref<16x1xf32, #tpu.memory_space<vmem>>, vector<16x1xf32>
    %17 = vector.broadcast %16 : vector<16x1xf32> to vector<16x1152xf32>
    %18 = arith.addf %15, %17 : vector<16x1152xf32>
    %cst_19 = arith.constant 0.000000e+00 : f32
    %19 = vector.broadcast %cst_19 : f32 to vector<16x1152xf32>
    %20 = arith.maximumf %18, %19 : vector<16x1152xf32>
    %21 = vector.extract_strided_slice %20 {offsets = [0, 0], sizes = [16, 144], strides = [1, 1]} : vector<16x1152xf32> to vector<16x144xf32>
    %c0_20 = arith.constant 0 : index
    %c0_21 = arith.constant 0 : index
    %c0_22 = arith.constant 0 : index
    %22 = vector.load %arg7[%c0_20, %c0_21, %c0_22] : memref<8x16x144xf32, #tpu.memory_space<vmem>>, vector<1x16x144xf32>
    %23 = vector.shape_cast %22 : vector<1x16x144xf32> to vector<16x144xf32>
    %24 = vector.shape_cast %21 : vector<16x144xf32> to vector<1x16x144xf32>
    tpu.vector_store %arg7[%c0_20, %c0_21, %c0_22], %24 {strides = array<i32>} : memref<8x16x144xf32, #tpu.memory_space<vmem>>, vector<1x16x144xf32>,
    %25 = vector.extract_strided_slice %20 {offsets = [0, 144], sizes = [16, 144], strides = [1, 1]} : vector<16x1152xf32> to vector<16x144xf32>
    %c1_23 = arith.constant 1 : index
    %c0_24 = arith.constant 0 : index
    %c0_25 = arith.constant 0 : index
    %26 = vector.load %arg7[%c1_23, %c0_24, %c0_25] : memref<8x16x144xf32, #tpu.memory_space<vmem>>, vector<1x16x144xf32>
    %27 = vector.shape_cast %26 : vector<1x16x144xf32> to vector<16x144xf32>
    %28 = vector.shape_cast %25 : vector<16x144xf32> to vector<1x16x144xf32>
    tpu.vector_store %arg7[%c1_23, %c0_24, %c0_25], %28 {strides = array<i32>} : memref<8x16x144xf32, #tpu.memory_space<vmem>>, vector<1x16x144xf32>,
    %29 = vector.extract_strided_slice %20 {offsets = [0, 288], sizes = [16, 144], strides = [1, 1]} : vector<16x1152xf32> to vector<16x144xf32>
    %c2_26 = arith.constant 2 : index
    %c0_27 = arith.constant 0 : index
    %c0_28 = arith.constant 0 : index
    %30 = vector.load %arg7[%c2_26, %c0_27, %c0_28] : memref<8x16x144xf32, #tpu.memory_space<vmem>>, vector<1x16x144xf32>
    %31 = vector.shape_cast %30 : vector<1x16x144xf32> to vector<16x144xf32>
    %32 = vector.shape_cast %29 : vector<16x144xf32> to vector<1x16x144xf32>
    tpu.vector_store %arg7[%c2_26, %c0_27, %c0_28], %32 {strides = array<i32>} : memref<8x16x144xf32, #tpu.memory_space<vmem>>, vector<1x16x144xf32>,
    %33 = vector.extract_strided_slice %20 {offsets = [0, 432], sizes = [16, 144], strides = [1, 1]} : vector<16x1152xf32> to vector<16x144xf32>
    %c3_29 = arith.constant 3 : index
    %c0_30 = arith.constant 0 : index
    %c0_31 = arith.constant 0 : index
    %34 = vector.load %arg7[%c3_29, %c0_30, %c0_31] : memref<8x16x144xf32, #tpu.memory_space<vmem>>, vector<1x16x144xf32>
    %35 = vector.shape_cast %34 : vector<1x16x144xf32> to vector<16x144xf32>
    %36 = vector.shape_cast %33 : vector<16x144xf32> to vector<1x16x144xf32>
    tpu.vector_store %arg7[%c3_29, %c0_30, %c0_31], %36 {strides = array<i32>} : memref<8x16x144xf32, #tpu.memory_space<vmem>>, vector<1x16x144xf32>,
    %37 = vector.extract_strided_slice %20 {offsets = [0, 576], sizes = [16, 144], strides = [1, 1]} : vector<16x1152xf32> to vector<16x144xf32>
    %c4 = arith.constant 4 : index
    %c0_32 = arith.constant 0 : index
    %c0_33 = arith.constant 0 : index
    %38 = vector.load %arg7[%c4, %c0_32, %c0_33] : memref<8x16x144xf32, #tpu.memory_space<vmem>>, vector<1x16x144xf32>
    %39 = vector.shape_cast %38 : vector<1x16x144xf32> to vector<16x144xf32>
    %40 = vector.shape_cast %37 : vector<16x144xf32> to vector<1x16x144xf32>
    tpu.vector_store %arg7[%c4, %c0_32, %c0_33], %40 {strides = array<i32>} : memref<8x16x144xf32, #tpu.memory_space<vmem>>, vector<1x16x144xf32>,
    %41 = vector.extract_strided_slice %20 {offsets = [0, 720], sizes = [16, 144], strides = [1, 1]} : vector<16x1152xf32> to vector<16x144xf32>
    %c5 = arith.constant 5 : index
    %c0_34 = arith.constant 0 : index
    %c0_35 = arith.constant 0 : index
    %42 = vector.load %arg7[%c5, %c0_34, %c0_35] : memref<8x16x144xf32, #tpu.memory_space<vmem>>, vector<1x16x144xf32>
    %43 = vector.shape_cast %42 : vector<1x16x144xf32> to vector<16x144xf32>
    %44 = vector.shape_cast %41 : vector<16x144xf32> to vector<1x16x144xf32>
    tpu.vector_store %arg7[%c5, %c0_34, %c0_35], %44 {strides = array<i32>} : memref<8x16x144xf32, #tpu.memory_space<vmem>>, vector<1x16x144xf32>,
    %45 = vector.extract_strided_slice %20 {offsets = [0, 864], sizes = [16, 144], strides = [1, 1]} : vector<16x1152xf32> to vector<16x144xf32>
    %c6 = arith.constant 6 : index
    %c0_36 = arith.constant 0 : index
    %c0_37 = arith.constant 0 : index
    %46 = vector.load %arg7[%c6, %c0_36, %c0_37] : memref<8x16x144xf32, #tpu.memory_space<vmem>>, vector<1x16x144xf32>
    %47 = vector.shape_cast %46 : vector<1x16x144xf32> to vector<16x144xf32>
    %48 = vector.shape_cast %45 : vector<16x144xf32> to vector<1x16x144xf32>
    tpu.vector_store %arg7[%c6, %c0_36, %c0_37], %48 {strides = array<i32>} : memref<8x16x144xf32, #tpu.memory_space<vmem>>, vector<1x16x144xf32>,
    %49 = vector.extract_strided_slice %20 {offsets = [0, 1008], sizes = [16, 144], strides = [1, 1]} : vector<16x1152xf32> to vector<16x144xf32>
    %c7 = arith.constant 7 : index
    %c0_38 = arith.constant 0 : index
    %c0_39 = arith.constant 0 : index
    %50 = vector.load %arg7[%c7, %c0_38, %c0_39] : memref<8x16x144xf32, #tpu.memory_space<vmem>>, vector<1x16x144xf32>
    %51 = vector.shape_cast %50 : vector<1x16x144xf32> to vector<16x144xf32>
    %52 = vector.shape_cast %49 : vector<16x144xf32> to vector<1x16x144xf32>
    tpu.vector_store %arg7[%c7, %c0_38, %c0_39], %52 {strides = array<i32>} : memref<8x16x144xf32, #tpu.memory_space<vmem>>, vector<1x16x144xf32>,
    %cst_40 = arith.constant 0.000000e+00 : f32
    %53 = vector.broadcast %cst_40 : f32 to vector<8x10xf32>
    %c0_41 = arith.constant 0 : index
    %c0_42 = arith.constant 0 : index
    %54 = vector.load %arg5[%c0_41, %c0_42] : memref<1x10xf32, #tpu.memory_space<vmem>>, vector<1x10xf32>
    %55 = vector.broadcast %54 : vector<1x10xf32> to vector<8x10xf32>
    %56 = arith.addf %53, %55 : vector<8x10xf32>
    %c0_43 = arith.constant 0 : index
    %c0_44 = arith.constant 0 : index
    %c0_45 = arith.constant 0 : index
    %57 = vector.load %arg7[%c0_43, %c0_44, %c0_45] : memref<8x16x144xf32, #tpu.memory_space<vmem>>, vector<8x1x144xf32>
    %58 = vector.shape_cast %57 : vector<8x1x144xf32> to vector<8x144xf32>
    %c0_46 = arith.constant 0 : index
    %c0_47 = arith.constant 0 : index
    %c0_48 = arith.constant 0 : index
    %59 = vector.load %arg4[%c0_46, %c0_47, %c0_48] : memref<16x144x10xf32, #tpu.memory_space<vmem>>, vector<1x144x10xf32>
    %60 = vector.shape_cast %59 : vector<1x144x10xf32> to vector<144x10xf32>
    %cst_49 = arith.constant dense<0.000000e+00> : vector<8x10xf32>
    %61 = tpu.matmul %58, %60, %cst_49 {dimension_numbers = #tpu.dot_dimension_numbers<[1], [0], [0], [1], [0, 0, 1, 1], [], []>} : vector<8x144xf32>, vector<144x10xf32>, vector<8x10xf32> -> vector<8x10xf32>
    %62 = arith.addf %56, %61 : vector<8x10xf32>
    %c0_50 = arith.constant 0 : index
    %c1_51 = arith.constant 1 : index
    %c0_52 = arith.constant 0 : index
    %63 = vector.load %arg7[%c0_50, %c1_51, %c0_52] : memref<8x16x144xf32, #tpu.memory_space<vmem>>, vector<8x1x144xf32>
    %64 = vector.shape_cast %63 : vector<8x1x144xf32> to vector<8x144xf32>
    %c1_53 = arith.constant 1 : index
    %c0_54 = arith.constant 0 : index
    %c0_55 = arith.constant 0 : index
    %65 = vector.load %arg4[%c1_53, %c0_54, %c0_55] : memref<16x144x10xf32, #tpu.memory_space<vmem>>, vector<1x144x10xf32>
    %66 = vector.shape_cast %65 : vector<1x144x10xf32> to vector<144x10xf32>
    %cst_56 = arith.constant dense<0.000000e+00> : vector<8x10xf32>
    %67 = tpu.matmul %64, %66, %cst_56 {dimension_numbers = #tpu.dot_dimension_numbers<[1], [0], [0], [1], [0, 0, 1, 1], [], []>} : vector<8x144xf32>, vector<144x10xf32>, vector<8x10xf32> -> vector<8x10xf32>
    %68 = arith.addf %62, %67 : vector<8x10xf32>
    %c0_57 = arith.constant 0 : index
    %c2_58 = arith.constant 2 : index
    %c0_59 = arith.constant 0 : index
    %69 = vector.load %arg7[%c0_57, %c2_58, %c0_59] : memref<8x16x144xf32, #tpu.memory_space<vmem>>, vector<8x1x144xf32>
    %70 = vector.shape_cast %69 : vector<8x1x144xf32> to vector<8x144xf32>
    %c2_60 = arith.constant 2 : index
    %c0_61 = arith.constant 0 : index
    %c0_62 = arith.constant 0 : index
    %71 = vector.load %arg4[%c2_60, %c0_61, %c0_62] : memref<16x144x10xf32, #tpu.memory_space<vmem>>, vector<1x144x10xf32>
    %72 = vector.shape_cast %71 : vector<1x144x10xf32> to vector<144x10xf32>
    %cst_63 = arith.constant dense<0.000000e+00> : vector<8x10xf32>
    %73 = tpu.matmul %70, %72, %cst_63 {dimension_numbers = #tpu.dot_dimension_numbers<[1], [0], [0], [1], [0, 0, 1, 1], [], []>} : vector<8x144xf32>, vector<144x10xf32>, vector<8x10xf32> -> vector<8x10xf32>
    %74 = arith.addf %68, %73 : vector<8x10xf32>
    %c0_64 = arith.constant 0 : index
    %c3_65 = arith.constant 3 : index
    %c0_66 = arith.constant 0 : index
    %75 = vector.load %arg7[%c0_64, %c3_65, %c0_66] : memref<8x16x144xf32, #tpu.memory_space<vmem>>, vector<8x1x144xf32>
    %76 = vector.shape_cast %75 : vector<8x1x144xf32> to vector<8x144xf32>
    %c3_67 = arith.constant 3 : index
    %c0_68 = arith.constant 0 : index
    %c0_69 = arith.constant 0 : index
    %77 = vector.load %arg4[%c3_67, %c0_68, %c0_69] : memref<16x144x10xf32, #tpu.memory_space<vmem>>, vector<1x144x10xf32>
    %78 = vector.shape_cast %77 : vector<1x144x10xf32> to vector<144x10xf32>
    %cst_70 = arith.constant dense<0.000000e+00> : vector<8x10xf32>
    %79 = tpu.matmul %76, %78, %cst_70 {dimension_numbers = #tpu.dot_dimension_numbers<[1], [0], [0], [1], [0, 0, 1, 1], [], []>} : vector<8x144xf32>, vector<144x10xf32>, vector<8x10xf32> -> vector<8x10xf32>
    %80 = arith.addf %74, %79 : vector<8x10xf32>
    %c0_71 = arith.constant 0 : index
    %c4_72 = arith.constant 4 : index
    %c0_73 = arith.constant 0 : index
    %81 = vector.load %arg7[%c0_71, %c4_72, %c0_73] : memref<8x16x144xf32, #tpu.memory_space<vmem>>, vector<8x1x144xf32>
    %82 = vector.shape_cast %81 : vector<8x1x144xf32> to vector<8x144xf32>
    %c4_74 = arith.constant 4 : index
    %c0_75 = arith.constant 0 : index
    %c0_76 = arith.constant 0 : index
    %83 = vector.load %arg4[%c4_74, %c0_75, %c0_76] : memref<16x144x10xf32, #tpu.memory_space<vmem>>, vector<1x144x10xf32>
    %84 = vector.shape_cast %83 : vector<1x144x10xf32> to vector<144x10xf32>
    %cst_77 = arith.constant dense<0.000000e+00> : vector<8x10xf32>
    %85 = tpu.matmul %82, %84, %cst_77 {dimension_numbers = #tpu.dot_dimension_numbers<[1], [0], [0], [1], [0, 0, 1, 1], [], []>} : vector<8x144xf32>, vector<144x10xf32>, vector<8x10xf32> -> vector<8x10xf32>
    %86 = arith.addf %80, %85 : vector<8x10xf32>
    %c0_78 = arith.constant 0 : index
    %c5_79 = arith.constant 5 : index
    %c0_80 = arith.constant 0 : index
    %87 = vector.load %arg7[%c0_78, %c5_79, %c0_80] : memref<8x16x144xf32, #tpu.memory_space<vmem>>, vector<8x1x144xf32>
    %88 = vector.shape_cast %87 : vector<8x1x144xf32> to vector<8x144xf32>
    %c5_81 = arith.constant 5 : index
    %c0_82 = arith.constant 0 : index
    %c0_83 = arith.constant 0 : index
    %89 = vector.load %arg4[%c5_81, %c0_82, %c0_83] : memref<16x144x10xf32, #tpu.memory_space<vmem>>, vector<1x144x10xf32>
    %90 = vector.shape_cast %89 : vector<1x144x10xf32> to vector<144x10xf32>
    %cst_84 = arith.constant dense<0.000000e+00> : vector<8x10xf32>
    %91 = tpu.matmul %88, %90, %cst_84 {dimension_numbers = #tpu.dot_dimension_numbers<[1], [0], [0], [1], [0, 0, 1, 1], [], []>} : vector<8x144xf32>, vector<144x10xf32>, vector<8x10xf32> -> vector<8x10xf32>
    %92 = arith.addf %86, %91 : vector<8x10xf32>
    %c0_85 = arith.constant 0 : index
    %c6_86 = arith.constant 6 : index
    %c0_87 = arith.constant 0 : index
    %93 = vector.load %arg7[%c0_85, %c6_86, %c0_87] : memref<8x16x144xf32, #tpu.memory_space<vmem>>, vector<8x1x144xf32>
    %94 = vector.shape_cast %93 : vector<8x1x144xf32> to vector<8x144xf32>
    %c6_88 = arith.constant 6 : index
    %c0_89 = arith.constant 0 : index
    %c0_90 = arith.constant 0 : index
    %95 = vector.load %arg4[%c6_88, %c0_89, %c0_90] : memref<16x144x10xf32, #tpu.memory_space<vmem>>, vector<1x144x10xf32>
    %96 = vector.shape_cast %95 : vector<1x144x10xf32> to vector<144x10xf32>
    %cst_91 = arith.constant dense<0.000000e+00> : vector<8x10xf32>
    %97 = tpu.matmul %94, %96, %cst_91 {dimension_numbers = #tpu.dot_dimension_numbers<[1], [0], [0], [1], [0, 0, 1, 1], [], []>} : vector<8x144xf32>, vector<144x10xf32>, vector<8x10xf32> -> vector<8x10xf32>
    %98 = arith.addf %92, %97 : vector<8x10xf32>
    %c0_92 = arith.constant 0 : index
    %c7_93 = arith.constant 7 : index
    %c0_94 = arith.constant 0 : index
    %99 = vector.load %arg7[%c0_92, %c7_93, %c0_94] : memref<8x16x144xf32, #tpu.memory_space<vmem>>, vector<8x1x144xf32>
    %100 = vector.shape_cast %99 : vector<8x1x144xf32> to vector<8x144xf32>
    %c7_95 = arith.constant 7 : index
    %c0_96 = arith.constant 0 : index
    %c0_97 = arith.constant 0 : index
    %101 = vector.load %arg4[%c7_95, %c0_96, %c0_97] : memref<16x144x10xf32, #tpu.memory_space<vmem>>, vector<1x144x10xf32>
    %102 = vector.shape_cast %101 : vector<1x144x10xf32> to vector<144x10xf32>
    %cst_98 = arith.constant dense<0.000000e+00> : vector<8x10xf32>
    %103 = tpu.matmul %100, %102, %cst_98 {dimension_numbers = #tpu.dot_dimension_numbers<[1], [0], [0], [1], [0, 0, 1, 1], [], []>} : vector<8x144xf32>, vector<144x10xf32>, vector<8x10xf32> -> vector<8x10xf32>
    %104 = arith.addf %98, %103 : vector<8x10xf32>
    %c0_99 = arith.constant 0 : index
    %c8 = arith.constant 8 : index
    %c0_100 = arith.constant 0 : index
    %105 = vector.load %arg7[%c0_99, %c8, %c0_100] : memref<8x16x144xf32, #tpu.memory_space<vmem>>, vector<8x1x144xf32>
    %106 = vector.shape_cast %105 : vector<8x1x144xf32> to vector<8x144xf32>
    %c8_101 = arith.constant 8 : index
    %c0_102 = arith.constant 0 : index
    %c0_103 = arith.constant 0 : index
    %107 = vector.load %arg4[%c8_101, %c0_102, %c0_103] : memref<16x144x10xf32, #tpu.memory_space<vmem>>, vector<1x144x10xf32>
    %108 = vector.shape_cast %107 : vector<1x144x10xf32> to vector<144x10xf32>
    %cst_104 = arith.constant dense<0.000000e+00> : vector<8x10xf32>
    %109 = tpu.matmul %106, %108, %cst_104 {dimension_numbers = #tpu.dot_dimension_numbers<[1], [0], [0], [1], [0, 0, 1, 1], [], []>} : vector<8x144xf32>, vector<144x10xf32>, vector<8x10xf32> -> vector<8x10xf32>
    %110 = arith.addf %104, %109 : vector<8x10xf32>
    %c0_105 = arith.constant 0 : index
    %c9 = arith.constant 9 : index
    %c0_106 = arith.constant 0 : index
    %111 = vector.load %arg7[%c0_105, %c9, %c0_106] : memref<8x16x144xf32, #tpu.memory_space<vmem>>, vector<8x1x144xf32>
    %112 = vector.shape_cast %111 : vector<8x1x144xf32> to vector<8x144xf32>
    %c9_107 = arith.constant 9 : index
    %c0_108 = arith.constant 0 : index
    %c0_109 = arith.constant 0 : index
    %113 = vector.load %arg4[%c9_107, %c0_108, %c0_109] : memref<16x144x10xf32, #tpu.memory_space<vmem>>, vector<1x144x10xf32>
    %114 = vector.shape_cast %113 : vector<1x144x10xf32> to vector<144x10xf32>
    %cst_110 = arith.constant dense<0.000000e+00> : vector<8x10xf32>
    %115 = tpu.matmul %112, %114, %cst_110 {dimension_numbers = #tpu.dot_dimension_numbers<[1], [0], [0], [1], [0, 0, 1, 1], [], []>} : vector<8x144xf32>, vector<144x10xf32>, vector<8x10xf32> -> vector<8x10xf32>
    %116 = arith.addf %110, %115 : vector<8x10xf32>
    %c0_111 = arith.constant 0 : index
    %c10 = arith.constant 10 : index
    %c0_112 = arith.constant 0 : index
    %117 = vector.load %arg7[%c0_111, %c10, %c0_112] : memref<8x16x144xf32, #tpu.memory_space<vmem>>, vector<8x1x144xf32>
    %118 = vector.shape_cast %117 : vector<8x1x144xf32> to vector<8x144xf32>
    %c10_113 = arith.constant 10 : index
    %c0_114 = arith.constant 0 : index
    %c0_115 = arith.constant 0 : index
    %119 = vector.load %arg4[%c10_113, %c0_114, %c0_115] : memref<16x144x10xf32, #tpu.memory_space<vmem>>, vector<1x144x10xf32>
    %120 = vector.shape_cast %119 : vector<1x144x10xf32> to vector<144x10xf32>
    %cst_116 = arith.constant dense<0.000000e+00> : vector<8x10xf32>
    %121 = tpu.matmul %118, %120, %cst_116 {dimension_numbers = #tpu.dot_dimension_numbers<[1], [0], [0], [1], [0, 0, 1, 1], [], []>} : vector<8x144xf32>, vector<144x10xf32>, vector<8x10xf32> -> vector<8x10xf32>
    %122 = arith.addf %116, %121 : vector<8x10xf32>
    %c0_117 = arith.constant 0 : index
    %c11 = arith.constant 11 : index
    %c0_118 = arith.constant 0 : index
    %123 = vector.load %arg7[%c0_117, %c11, %c0_118] : memref<8x16x144xf32, #tpu.memory_space<vmem>>, vector<8x1x144xf32>
    %124 = vector.shape_cast %123 : vector<8x1x144xf32> to vector<8x144xf32>
    %c11_119 = arith.constant 11 : index
    %c0_120 = arith.constant 0 : index
    %c0_121 = arith.constant 0 : index
    %125 = vector.load %arg4[%c11_119, %c0_120, %c0_121] : memref<16x144x10xf32, #tpu.memory_space<vmem>>, vector<1x144x10xf32>
    %126 = vector.shape_cast %125 : vector<1x144x10xf32> to vector<144x10xf32>
    %cst_122 = arith.constant dense<0.000000e+00> : vector<8x10xf32>
    %127 = tpu.matmul %124, %126, %cst_122 {dimension_numbers = #tpu.dot_dimension_numbers<[1], [0], [0], [1], [0, 0, 1, 1], [], []>} : vector<8x144xf32>, vector<144x10xf32>, vector<8x10xf32> -> vector<8x10xf32>
    %128 = arith.addf %122, %127 : vector<8x10xf32>
    %c0_123 = arith.constant 0 : index
    %c12 = arith.constant 12 : index
    %c0_124 = arith.constant 0 : index
    %129 = vector.load %arg7[%c0_123, %c12, %c0_124] : memref<8x16x144xf32, #tpu.memory_space<vmem>>, vector<8x1x144xf32>
    %130 = vector.shape_cast %129 : vector<8x1x144xf32> to vector<8x144xf32>
    %c12_125 = arith.constant 12 : index
    %c0_126 = arith.constant 0 : index
    %c0_127 = arith.constant 0 : index
    %131 = vector.load %arg4[%c12_125, %c0_126, %c0_127] : memref<16x144x10xf32, #tpu.memory_space<vmem>>, vector<1x144x10xf32>
    %132 = vector.shape_cast %131 : vector<1x144x10xf32> to vector<144x10xf32>
    %cst_128 = arith.constant dense<0.000000e+00> : vector<8x10xf32>
    %133 = tpu.matmul %130, %132, %cst_128 {dimension_numbers = #tpu.dot_dimension_numbers<[1], [0], [0], [1], [0, 0, 1, 1], [], []>} : vector<8x144xf32>, vector<144x10xf32>, vector<8x10xf32> -> vector<8x10xf32>
    %134 = arith.addf %128, %133 : vector<8x10xf32>
    %c0_129 = arith.constant 0 : index
    %c13 = arith.constant 13 : index
    %c0_130 = arith.constant 0 : index
    %135 = vector.load %arg7[%c0_129, %c13, %c0_130] : memref<8x16x144xf32, #tpu.memory_space<vmem>>, vector<8x1x144xf32>
    %136 = vector.shape_cast %135 : vector<8x1x144xf32> to vector<8x144xf32>
    %c13_131 = arith.constant 13 : index
    %c0_132 = arith.constant 0 : index
    %c0_133 = arith.constant 0 : index
    %137 = vector.load %arg4[%c13_131, %c0_132, %c0_133] : memref<16x144x10xf32, #tpu.memory_space<vmem>>, vector<1x144x10xf32>
    %138 = vector.shape_cast %137 : vector<1x144x10xf32> to vector<144x10xf32>
    %cst_134 = arith.constant dense<0.000000e+00> : vector<8x10xf32>
    %139 = tpu.matmul %136, %138, %cst_134 {dimension_numbers = #tpu.dot_dimension_numbers<[1], [0], [0], [1], [0, 0, 1, 1], [], []>} : vector<8x144xf32>, vector<144x10xf32>, vector<8x10xf32> -> vector<8x10xf32>
    %140 = arith.addf %134, %139 : vector<8x10xf32>
    %c0_135 = arith.constant 0 : index
    %c14 = arith.constant 14 : index
    %c0_136 = arith.constant 0 : index
    %141 = vector.load %arg7[%c0_135, %c14, %c0_136] : memref<8x16x144xf32, #tpu.memory_space<vmem>>, vector<8x1x144xf32>
    %142 = vector.shape_cast %141 : vector<8x1x144xf32> to vector<8x144xf32>
    %c14_137 = arith.constant 14 : index
    %c0_138 = arith.constant 0 : index
    %c0_139 = arith.constant 0 : index
    %143 = vector.load %arg4[%c14_137, %c0_138, %c0_139] : memref<16x144x10xf32, #tpu.memory_space<vmem>>, vector<1x144x10xf32>
    %144 = vector.shape_cast %143 : vector<1x144x10xf32> to vector<144x10xf32>
    %cst_140 = arith.constant dense<0.000000e+00> : vector<8x10xf32>
    %145 = tpu.matmul %142, %144, %cst_140 {dimension_numbers = #tpu.dot_dimension_numbers<[1], [0], [0], [1], [0, 0, 1, 1], [], []>} : vector<8x144xf32>, vector<144x10xf32>, vector<8x10xf32> -> vector<8x10xf32>
    %146 = arith.addf %140, %145 : vector<8x10xf32>
    %c0_141 = arith.constant 0 : index
    %c15 = arith.constant 15 : index
    %c0_142 = arith.constant 0 : index
    %147 = vector.load %arg7[%c0_141, %c15, %c0_142] : memref<8x16x144xf32, #tpu.memory_space<vmem>>, vector<8x1x144xf32>
    %148 = vector.shape_cast %147 : vector<8x1x144xf32> to vector<8x144xf32>
    %c15_143 = arith.constant 15 : index
    %c0_144 = arith.constant 0 : index
    %c0_145 = arith.constant 0 : index
    %149 = vector.load %arg4[%c15_143, %c0_144, %c0_145] : memref<16x144x10xf32, #tpu.memory_space<vmem>>, vector<1x144x10xf32>
    %150 = vector.shape_cast %149 : vector<1x144x10xf32> to vector<144x10xf32>
    %cst_146 = arith.constant dense<0.000000e+00> : vector<8x10xf32>
    %151 = tpu.matmul %148, %150, %cst_146 {dimension_numbers = #tpu.dot_dimension_numbers<[1], [0], [0], [1], [0, 0, 1, 1], [], []>} : vector<8x144xf32>, vector<144x10xf32>, vector<8x10xf32> -> vector<8x10xf32>
    %152 = arith.addf %146, %151 : vector<8x10xf32>
    %c0_147 = arith.constant 0 : index
    %c0_148 = arith.constant 0 : index
    %153 = vector.load %arg6[%c0_147, %c0_148] : memref<8x10xf32, #tpu.memory_space<vmem>>, vector<8x10xf32>
    tpu.vector_store %arg6[%c0_147, %c0_148], %152 {strides = array<i32>} : memref<8x10xf32, #tpu.memory_space<vmem>>, vector<8x10xf32>,
    return
  }
  func.func @transform_0(%arg0: i32) -> (i32, i32, i32, i32) {
    %c0_i32 = arith.constant 0 : i32
    %c0_i32_0 = arith.constant 0 : i32
    %c0_i32_1 = arith.constant 0 : i32
    %c0_i32_2 = arith.constant 0 : i32
    return %arg0, %c0_i32, %c0_i32_0, %c0_i32_1 : i32, i32, i32, i32
  }
  func.func @transform_1(%arg0: i32) -> (i32, i32) {
    %c0_i32 = arith.constant 0 : i32
    %c0_i32_0 = arith.constant 0 : i32
    %c0_i32_1 = arith.constant 0 : i32
    return %c0_i32, %c0_i32_0 : i32, i32
  }
  func.func @transform_2(%arg0: i32) -> (i32, i32) {
    %c0_i32 = arith.constant 0 : i32
    %c0_i32_0 = arith.constant 0 : i32
    %c0_i32_1 = arith.constant 0 : i32
    return %c0_i32, %c0_i32_0 : i32, i32
  }
  func.func @transform_3(%arg0: i32) -> (i32, i32, i32) {
    %c0_i32 = arith.constant 0 : i32
    %c0_i32_0 = arith.constant 0 : i32
    %c0_i32_1 = arith.constant 0 : i32
    %c0_i32_2 = arith.constant 0 : i32
    return %c0_i32, %c0_i32_0, %c0_i32_1 : i32, i32, i32
  }
  func.func @transform_4(%arg0: i32) -> (i32, i32) {
    %c0_i32 = arith.constant 0 : i32
    %c0_i32_0 = arith.constant 0 : i32
    %c0_i32_1 = arith.constant 0 : i32
    return %c0_i32, %c0_i32_0 : i32, i32
  }
  func.func @transform_5(%arg0: i32) -> (i32, i32) {
    %c0_i32 = arith.constant 0 : i32
    %c0_i32_0 = arith.constant 0 : i32
    return %arg0, %c0_i32 : i32, i32
  }
}

</mosaic_0001>

<bundles_post_ra>
// kernel: model_forward.1
= control target key start
LH: loop header
LB: loop body
LE: loop exit
PB: predicated region body
PF: predicated region fallthrough
CT: control target
= control target key end

     0   :  { %vm65_vm0 = vcmask 1040384   ;;  %v5570_v3 = vmov 0.0   ;;  %vm58_vm1 = vcmask 203776   ;;  %vm1920_vm2 = vcmask 130048   ;;  %s5573_s10 = smov 80   ;;  %s5574_s19 = smov 96   ;;  %s7943_s0 = inlined_call_operand.vmem [shape: f32[1,4,25,1152], index: 0, kind: input, shape index: {}]   ;;  %s7944_s1 = inlined_call_operand.vmem [shape: f32[16,25], index: 1, kind: input, shape index: {}]   ;;  %s7945_s2 = inlined_call_operand.vmem [shape: f32[16,1], index: 2, kind: input, shape index: {}]   ;;  %s7946_s3 = inlined_call_operand.vmem [shape: f32[16,144,10], index: 3, kind: input, shape index: {}]   ;;  %s7947_s4 = inlined_call_operand.vmem [shape: f32[1,10], index: 4, kind: input, shape index: {}]   ;;  %s7948_s5 = inlined_call_operand.vmem [shape: f32[8,10], index: 5, kind: output, shape index: {}]  }
   0x1   :  { %v50_v0 = vld [vmem:[%s7943_s0 + $0xe0] sm:$0x1]  ;;  %v52_v1 = vld [vmem:[%s7943_s0 + $0xf0] sm:$0x1]  ;;  %v49_v2 = vld [vmem:[%s7943_s0 + $0xd8] sm:$0x1]  ;;  %157 = vmatprep.mubr.f32.mxu0 %v5570_v3  ;;  %234 = vmatprep.mubr.f32.mxu1 %v5570_v3 }
   0x2   :  { %5019 = vmatprep.subr.msk.mxu0 %vm65_vm0, %v50_v0  ;;  %5023 = vmatprep.subr.msk.mxu1 %vm65_vm0, %v52_v1  ;;  %v51_v4 = vld [vmem:[%s7943_s0 + $0xe8] sm:$0x1]  ;;  %v41_v5 = vld [vmem:[%s7943_s0 + $0x98] sm:$0xff]  ;;  %v40_v7 = vld [vmem:[%s7943_s0 + $0x90] sm:$0xff]  ;;  %s5575_s24 = smov 64   ;;  %s5576_s7 = smov 48  }
   0x3   :  { %v43_v6 = vld [vmem:[%s7943_s0 + $0xa8] sm:$0xff]  ;;  %5020 = vmatpush1.msk.msra.mxu0 %vm65_vm0, %v49_v2  ;;  %5024 = vmatpush1.msk.msra.mxu1 %vm65_vm0, %v51_v4  ;;  %v42_v8 = vld [vmem:[%s7943_s0 + $0xa0] sm:$0xff]  ;;  %v32_v9 = vld [vmem:[%s7943_s0 + $0x50] sm:$0xff]  ;;  %s5577_s13 = smov 32   ;;  %s5578_s23 = smov 16   ;;  %vm1936_vm3 = vcmask 916480  }
   0x4   :  { %119 = vmatprep.subr.mxu0 %v41_v5  ;;  %196 = vmatprep.subr.mxu1 %v43_v6  ;;  %v34_v10 = vld [vmem:[%s7943_s0 + $0x60] sm:$0xff]  ;;  %v31_v11 = vld [vmem:[%s7943_s0 + $0x48] sm:$0xff]  ;;  %v33_v12 = vld [vmem:[%s7943_s0 + $0x58] sm:$0xff]  ;;  %vm1958_vm4 = vcmask 785408   ;;  %vm2002_vm5 = vcmask 523264   ;;  %vm1980_vm6 = vcmask 654336  }
   0x5   :  { %120 = vmatpush1.msra.mxu0 %v40_v7  ;;  %197 = vmatpush1.msra.mxu1 %v42_v8  ;;  %v23_v13 = vld [vmem:[%s7943_s0 + $0x8] sm:$0xff]  ;;  %v25_v14 = vld [vmem:[%s7943_s0 + $0x18] sm:$0xff]  ;;  %v22_v15 = vld [vmem:[%s7943_s0] sm:$0xff]  ;;  %vm2024_vm7 = vcmask 392192   ;;  %vm2046_vm8 = vcmask 261120   ;;  %vm5013_vm9 = vcmask 80896  }
   0x6   :  { %121 = vmatprep.subr.mxu0 %v32_v9  ;;  %198 = vmatprep.subr.mxu1 %v34_v10  ;;  %v24_v16 = vld [vmem:[%s7943_s0 + $0x10] sm:$0xff]  ;;  %v5667_v17 = vld [vmem:[%s7944_s1] sm:$0xff]  ;;  %v53_v20 = vld [vmem:[%s7943_s0 + $0xf8] sm:$0x1] }
   0x7   :  { %122 = vmatpush1.msra.mxu0 %v31_v11  ;;  %199 = vmatpush1.msra.mxu1 %v33_v12  ;;  %v54_v18 = vld [vmem:[%s7943_s0 + $0x100] sm:$0x1]  ;;  %v56_v19 = vld [vmem:[%s7943_s0 + $0x110] sm:$0x1]  ;;  %v55_v21 = vld [vmem:[%s7943_s0 + $0x108] sm:$0x1] }
   0x8   :  { %123 = vmatprep.subr.mxu0 %v23_v13  ;;  %200 = vmatprep.subr.mxu1 %v25_v14  ;;  %v45_v22 = vld [vmem:[%s7943_s0 + $0xb8] sm:$0xff]  ;;  %v47_v23 = vld [vmem:[%s7943_s0 + $0xc8] sm:$0xff]  ;;  %v44_v24 = vld [vmem:[%s7943_s0 + $0xb0] sm:$0xff] }
   0x9   :  { %124 = vmatpush1.msra.mxu0 %v22_v15  ;;  %201 = vmatpush1.msra.mxu1 %v24_v16  ;;  %v46_v25 = vld [vmem:[%s7943_s0 + $0xc0] sm:$0xff]  ;;  %v5704_v26 = vld [vmem:[%s7944_s1 + $0x8] sm:$0xff]  ;;  %v36_v27 = vld [vmem:[%s7943_s0 + $0x70] sm:$0xff] }
   0xa   :  { %5021 = vmatmul.mubr.msk.f32.vlgmr.msra.gmra.mxu0 %vm58_vm1, %v5667_v17  ;;  %5025 = vmatmul.mubr.msk.f32.vlgmr.msra.gmra.mxu1 %vm58_vm1, %v5667_v17  ;;  %v38_v28 = vld [vmem:[%s7943_s0 + $0x80] sm:$0xff]  ;;  %v35_v29 = vld [vmem:[%s7943_s0 + $0x68] sm:$0xff]  ;;  %v37_v30 = vld [vmem:[%s7943_s0 + $0x78] sm:$0xff] }
   0xb   :  { %5027 = vmatprep.subr.msk.mxu0 %vm65_vm0, %v54_v18  ;;  %5031 = vmatprep.subr.msk.mxu1 %vm65_vm0, %v56_v19  ;;  %v27_v31 = vld [vmem:[%s7943_s0 + $0x28] sm:$0xff]  ;;  %v29_v32 = vld [vmem:[%s7943_s0 + $0x38] sm:$0xff]  ;;  %v26_v33 = vld [vmem:[%s7943_s0 + $0x20] sm:$0xff] }
   0xc   :  { %5028 = vmatpush1.msk.msra.mxu0 %vm65_vm0, %v53_v20  ;;  %5032 = vmatpush1.msk.msra.mxu1 %vm65_vm0, %v55_v21  ;;  %v28_v34 = vld [vmem:[%s7943_s0 + $0x30] sm:$0xff]  ;;  %v57_v35 = vld [vmem:[%s7943_s0 + $0x118] sm:$0x1]  ;;  %v5066_v36 = vld [vmem:[%s7943_s0 + $0x200] sm:$0x1] }
   0xd   :  { %273 = vmatprep.subr.mxu0 %v45_v22  ;;  %350 = vmatprep.subr.mxu1 %v47_v23  ;;  %v5065_v37 = vld [vmem:[%s7943_s0 + $0x1f8] sm:$0x1]  ;;  %v48_v38 = vld [vmem:[%s7943_s0 + $0xd0] sm:$0xff]  ;;  %v39_v41 = vld [vmem:[%s7943_s0 + $0x88] sm:$0xff] }
   0xe   :  { %163 = vmatprep.mubr.f32.mxu0 %v5570_v3  ;;  %240 = vmatprep.mubr.f32.mxu1 %v5570_v3  ;;  %v5057_v39 = vld [vmem:[%s7943_s0 + $0x1b8] sm:$0xff]  ;;  %v5056_v40 = vld [vmem:[%s7943_s0 + $0x1b0] sm:$0xff]  ;;  %v5047_v43 = vld [vmem:[%s7943_s0 + $0x168] sm:$0xff] }
   0xf   :  { %274 = vmatpush1.msra.mxu0 %v44_v24  ;;  %351 = vmatpush1.msra.mxu1 %v46_v25  ;;  %v5048_v42 = vld [vmem:[%s7943_s0 + $0x170] sm:$0xff]  ;;  %v30_v44 = vld [vmem:[%s7943_s0 + $0x40] sm:$0xff]  ;;  %v5039_v45 = vld [vmem:[%s7943_s0 + $0x128] sm:$0xff] }
  0x10   :  { %5022 = vmatmul.mubr.msk.f32.gmra.mxu0 %vm58_vm1, %v5704_v26  ;;  %5026 = vmatmul.mubr.msk.f32.gmra.mxu1 %vm58_vm1, %v5704_v26  ;;  %v5038_v46 = vld [vmem:[%s7943_s0 + $0x120] sm:$0xff]  ;;  %v5068_v47 = vld [vmem:[%s7943_s0 + $0x210] sm:$0x1]  ;;  %v5067_v49 = vld [vmem:[%s7943_s0 + $0x208] sm:$0x1] }
  0x11   :  { %275 = vmatprep.subr.mxu0 %v36_v27  ;;  %352 = vmatprep.subr.mxu1 %v38_v28  ;;  %v5070_v48 = vld [vmem:[%s7943_s0 + $0x220] sm:$0x1]  ;;  %v5069_v50 = vld [vmem:[%s7943_s0 + $0x218] sm:$0x1]  ;;  %v5059_v51 = vld [vmem:[%s7943_s0 + $0x1c8] sm:$0xff] }
  0x12   :  { %276 = vmatpush1.msra.mxu0 %v35_v29  ;;  %353 = vmatpush1.msra.mxu1 %v37_v30  ;;  %v5061_v52 = vld [vmem:[%s7943_s0 + $0x1d8] sm:$0xff]  ;;  %v5058_v53 = vld [vmem:[%s7943_s0 + $0x1c0] sm:$0xff]  ;;  %v5060_v54 = vld [vmem:[%s7943_s0 + $0x1d0] sm:$0xff] }
  0x13   :  { %277 = vmatprep.subr.mxu0 %v27_v31  ;;  %354 = vmatprep.subr.mxu1 %v29_v32  ;;  %v5050_v55 = vld [vmem:[%s7943_s0 + $0x180] sm:$0xff]  ;;  %v5052_v56 = vld [vmem:[%s7943_s0 + $0x190] sm:$0xff]  ;;  %v5049_v57 = vld [vmem:[%s7943_s0 + $0x178] sm:$0xff] }
  0x14   :  { %278 = vmatpush1.msra.mxu0 %v26_v33  ;;  %311 = vmatprep.mubr.f32.mxu0 %v5570_v3  ;;  %v5051_v58 = vld [vmem:[%s7943_s0 + $0x188] sm:$0xff]  ;;  %v5041_v59 = vld [vmem:[%s7943_s0 + $0x138] sm:$0xff]  ;;  %v5040_v61 = vld [vmem:[%s7943_s0 + $0x130] sm:$0xff] }
  0x15   :  { %355 = vmatpush1.msra.mxu1 %v28_v34  ;;  %388 = vmatprep.mubr.f32.mxu1 %v5570_v3  ;;  %v5043_v60 = vld [vmem:[%s7943_s0 + $0x148] sm:$0xff]  ;;  %v5042_v62 = vld [vmem:[%s7943_s0 + $0x140] sm:$0xff]  ;;  %v5072_v63 = vld [vmem:[%s7943_s0 + $0x230] sm:$0x1] }
  0x16   :  { %5029 = vmatmul.mubr.msk.f32.vlgmr.msra.gmra.mxu0 %vm58_vm1, %v5667_v17  ;;  %5033 = vmatmul.mubr.msk.f32.vlgmr.msra.gmra.mxu1 %vm58_vm1, %v5667_v17  ;;  %v5073_v0 = vld [vmem:[%s7943_s0 + $0x238] sm:$0x1]  ;;  %v5071_v1 = vld [vmem:[%s7943_s0 + $0x228] sm:$0x1]  ;;  %v5064_v4 = vld [vmem:[%s7943_s0 + $0x1f0] sm:$0xff] }
  0x17   :  { %5514 = vmatprep.subr.msk.mxu0 %vm65_vm0, %v57_v35  ;;  %5074 = vmatprep.subr.msk.mxu1 %vm65_vm0, %v5066_v36  ;;  %v5063_v2 = vld [vmem:[%s7943_s0 + $0x1e8] sm:$0xff]  ;;  %v5062_v5 = vld [vmem:[%s7943_s0 + $0x1e0] sm:$0xff]  ;;  %v5053_v8 = vld [vmem:[%s7943_s0 + $0x198] sm:$0xff] }
  0x18   :  { %5515 = vmatpush3.msk.msra.mxu0 %vm65_vm0, %v57_v35  ;;  %5075 = vmatpush1.msk.msra.mxu1 %vm65_vm0, %v5065_v37  ;;  %v5054_v6 = vld [vmem:[%s7943_s0 + $0x1a0] sm:$0xff]  ;;  %v5055_v7 = vld [vmem:[%s7943_s0 + $0x1a8] sm:$0xff]  ;;  %v5045_v9 = vld [vmem:[%s7943_s0 + $0x158] sm:$0xff] }
  0x19   :  { %5516 = vmatprep.subr.mxu0 %v48_v38  ;;  %566 = vmatprep.subr.mxu1 %v5057_v39  ;;  %v5046_v10 = vld [vmem:[%s7943_s0 + $0x160] sm:$0xff]  ;;  %v5044_v11 = vld [vmem:[%s7943_s0 + $0x150] sm:$0xff]  ;;  %v5120_v14 = vld [vmem:[%s7943_s0 + $0x318] sm:$0x1] }
  0x1a   :  { %317 = vmatprep.mubr.f32.mxu0 %v5570_v3  ;;  %394 = vmatprep.mubr.f32.mxu1 %v5570_v3  ;;  %v5121_v12 = vld [vmem:[%s7943_s0 + $0x320] sm:$0x1]  ;;  %v5123_v13 = vld [vmem:[%s7943_s0 + $0x330] sm:$0x1]  ;;  %v5122_v15 = vld [vmem:[%s7943_s0 + $0x328] sm:$0x1] }
  0x1b   :  { %5517 = vmatpush3.msra.mxu0 %v48_v38  ;;  %567 = vmatpush1.msra.mxu1 %v5056_v40  ;;  %v5112_v16 = vld [vmem:[%s7943_s0 + $0x2d8] sm:$0xff]  ;;  %v5114_v18 = vld [vmem:[%s7943_s0 + $0x2e8] sm:$0xff]  ;;  %v5111_v19 = vld [vmem:[%s7943_s0 + $0x2d0] sm:$0xff] }
  0x1c   :  { %5030 = vmatmul.mubr.msk.f32.gmra.mxu0 %vm58_vm1, %v5704_v26  ;;  %5034 = vmatmul.mubr.msk.f32.gmra.mxu1 %vm58_vm1, %v5704_v26  ;;  %v5113_v20 = vld [vmem:[%s7943_s0 + $0x2e0] sm:$0xff]  ;;  %v5103_v21 = vld [vmem:[%s7943_s0 + $0x290] sm:$0xff]  ;;  %v5102_v23 = vld [vmem:[%s7943_s0 + $0x288] sm:$0xff] }
  0x1d   :  { %5518 = vmatprep.subr.mxu0 %v39_v41  ;;  %568 = vmatprep.subr.mxu1 %v5048_v42  ;;  %v5105_v22 = vld [vmem:[%s7943_s0 + $0x2a0] sm:$0xff]  ;;  %v5104_v24 = vld [vmem:[%s7943_s0 + $0x298] sm:$0xff]  ;;  %v5094_v25 = vld [vmem:[%s7943_s0 + $0x248] sm:$0xff] }
  0x1e   :  { %5519 = vmatpush3.msra.mxu0 %v39_v41  ;;  %569 = vmatpush1.msra.mxu1 %v5047_v43  ;;  %v5096_v27 = vld [vmem:[%s7943_s0 + $0x258] sm:$0xff]  ;;  %v5093_v28 = vld [vmem:[%s7943_s0 + $0x240] sm:$0xff]  ;;  %v5095_v29 = vld [vmem:[%s7943_s0 + $0x250] sm:$0xff] }
  0x1f   :  { %5520 = vmatprep.subr.mxu0 %v30_v44  ;;  %570 = vmatprep.subr.mxu1 %v5039_v45  ;;  %v5125_v30 = vld [vmem:[%s7943_s0 + $0x340] sm:$0x1]  ;;  %v5127_v31 = vld [vmem:[%s7943_s0 + $0x350] sm:$0x1]  ;;  %v5124_v32 = vld [vmem:[%s7943_s0 + $0x338] sm:$0x1] }
  0x20   :  { %5521 = vmatpush3.msra.mxu0 %v30_v44  ;;  %5522 = vmatprep.mubr.msk.f32.mxu0 %vm58_vm1, %v5667_v17  ;;  %v5126_v33 = vld [vmem:[%s7943_s0 + $0x348] sm:$0x1]  ;;  %v5116_v34 = vld [vmem:[%s7943_s0 + $0x2f8] sm:$0xff]  ;;  %v5115_v36 = vld [vmem:[%s7943_s0 + $0x2f0] sm:$0xff] }
  0x21   :  { %571 = vmatpush1.msra.mxu1 %v5038_v46  ;;  %604 = vmatprep.mubr.f32.mxu1 %v5570_v3  ;;  %v5118_v35 = vld [vmem:[%s7943_s0 + $0x308] sm:$0xff]  ;;  %v5117_v37 = vld [vmem:[%s7943_s0 + $0x300] sm:$0xff]  ;;  %v5107_v38 = vld [vmem:[%s7943_s0 + $0x2b0] sm:$0xff] }
  0x22   :  { %5523 = vmatmul.mubr.msk.f32.vlgmr.msra.gmra.mxu0 %vm58_vm1, %v5704_v26  ;;  %5076 = vmatmul.mubr.msk.f32.vlgmr.msra.gmra.mxu1 %vm58_vm1, %v5667_v17  ;;  %v5109_v39 = vld [vmem:[%s7943_s0 + $0x2c0] sm:$0xff]  ;;  %v5106_v40 = vld [vmem:[%s7943_s0 + $0x2a8] sm:$0xff]  ;;  %v5108_v41 = vld [vmem:[%s7943_s0 + $0x2b8] sm:$0xff] }
  0x23   :  { %5078 = vmatprep.subr.msk.mxu0 %vm65_vm0, %v5068_v47  ;;  %5082 = vmatprep.subr.msk.mxu1 %vm65_vm0, %v5070_v48  ;;  %v5098_v42 = vld [vmem:[%s7943_s0 + $0x268] sm:$0xff]  ;;  %v5100_v43 = vld [vmem:[%s7943_s0 + $0x278] sm:$0xff]  ;;  %v5097_v44 = vld [vmem:[%s7943_s0 + $0x260] sm:$0xff] }
  0x24   :  { %5079 = vmatpush1.msk.msra.mxu0 %vm65_vm0, %v5067_v49  ;;  %5083 = vmatpush1.msk.msra.mxu1 %vm65_vm0, %v5069_v50  ;;  %v5099_v45 = vld [vmem:[%s7943_s0 + $0x270] sm:$0xff]  ;;  %v5128_v46 = vld [vmem:[%s7943_s0 + $0x358] sm:$0x1]  ;;  %v5176_v47 = vld [vmem:[%s7943_s0 + $0x440] sm:$0x1] }
  0x25   :  { %643 = vmatprep.subr.mxu0 %v5059_v51  ;;  %720 = vmatprep.subr.mxu1 %v5061_v52  ;;  %v5175_v48 = vld [vmem:[%s7943_s0 + $0x438] sm:$0x1]  ;;  %v5119_v49 = vld [vmem:[%s7943_s0 + $0x310] sm:$0xff]  ;;  %v5110_v52 = vld [vmem:[%s7943_s0 + $0x2c8] sm:$0xff] }
  0x26   :  { %610 = vmatprep.mubr.f32.mxu1 %v5570_v3  ;;  %644 = vmatpush1.msra.mxu0 %v5058_v53  ;;  %v5167_v50 = vld [vmem:[%s7943_s0 + $0x3f8] sm:$0xff]  ;;  %v5166_v51 = vld [vmem:[%s7943_s0 + $0x3f0] sm:$0xff] }
  0x27   :  { %721 = vmatpush1.msra.mxu1 %v5060_v54  ;;  %645 = vmatprep.subr.mxu0 %v5050_v55  ;;  %v5158_v53 = vld [vmem:[%s7943_s0 + $0x3b0] sm:$0xff]  ;;  %v5157_v54 = vld [vmem:[%s7943_s0 + $0x3a8] sm:$0xff]  ;;  %v5101_v55 = vld [vmem:[%s7943_s0 + $0x280] sm:$0xff] }
  0x28   :  { %5077 = vmatmul.mubr.msk.f32.gmra.mxu1 %vm58_vm1, %v5704_v26  ;;  %722 = vmatprep.subr.mxu1 %v5052_v56  ;;  %v5149_v56 = vld [vmem:[%s7943_s0 + $0x368] sm:$0xff] }
  0x29   :  { %646 = vmatpush1.msra.mxu0 %v5049_v57  ;;  %723 = vmatpush1.msra.mxu1 %v5051_v58  ;;  %v5148_v57 = vld [vmem:[%s7943_s0 + $0x360] sm:$0xff]  ;;  %v5178_v58 = vld [vmem:[%s7943_s0 + $0x450] sm:$0x1] }
  0x2a   :  { %647 = vmatprep.subr.mxu0 %v5041_v59  ;;  %724 = vmatprep.subr.mxu1 %v5043_v60  ;;  %v5180_v59 = vld [vmem:[%s7943_s0 + $0x460] sm:$0x1]  ;;  %v5177_v60 = vld [vmem:[%s7943_s0 + $0x448] sm:$0x1] }
  0x2b   :  { %648 = vmatpush1.msra.mxu0 %v5040_v61  ;;  %681 = vmatprep.mubr.f32.mxu0 %v5570_v3  ;;  %v5179_v61 = vld [vmem:[%s7943_s0 + $0x458] sm:$0x1] }
  0x2c   :  { %725 = vmatpush1.msra.mxu1 %v5042_v62  ;;  %758 = vmatprep.mubr.f32.mxu1 %v5570_v3  ;;  %v5169_v62 = vld [vmem:[%s7943_s0 + $0x408] sm:$0xff] }
  0x2d   :  { %5080 = vmatmul.mubr.msk.f32.vlgmr.msra.gmra.mxu0 %vm58_vm1, %v5667_v17  ;;  %5084 = vmatmul.mubr.msk.f32.vlgmr.msra.gmra.mxu1 %vm58_vm1, %v5667_v17 }
  0x2e   :  { %5086 = vmatprep.subr.msk.mxu0 %vm65_vm0, %v5072_v63  ;;  %5525 = vmatprep.subr.msk.mxu1 %vm65_vm0, %v5073_v0  ;;  %v5171_v63 = vld [vmem:[%s7943_s0 + $0x418] sm:$0xff] }
  0x2f   :  { %5087 = vmatpush1.msk.msra.mxu0 %vm65_vm0, %v5071_v1  ;;  %5526 = vmatpush3.msk.msra.mxu1 %vm65_vm0, %v5073_v0  ;;  %v5168_v0 = vld [vmem:[%s7943_s0 + $0x400] sm:$0xff]  ;;  %v5170_v1 = vld [vmem:[%s7943_s0 + $0x410] sm:$0xff] }
  0x30   :  { %797 = vmatprep.subr.mxu0 %v5063_v2  ;;  %5527 = vmatprep.subr.mxu1 %v5064_v4  ;;  %v5160_v2 = vld [vmem:[%s7943_s0 + $0x3c0] sm:$0xff] }
  0x31   :  { %687 = vmatprep.mubr.f32.mxu0 %v5570_v3  ;;  %764 = vmatprep.mubr.f32.mxu1 %v5570_v3 }
  0x32   :  { %798 = vmatpush1.msra.mxu0 %v5062_v5  ;;  %5528 = vmatpush3.msra.mxu1 %v5064_v4  ;;  %v5162_v4 = vld [vmem:[%s7943_s0 + $0x3d0] sm:$0xff]  ;;  %v5159_v5 = vld [vmem:[%s7943_s0 + $0x3b8] sm:$0xff] }
  0x33   :  { %5081 = vmatmul.mubr.msk.f32.gmra.mxu0 %vm58_vm1, %v5704_v26  ;;  %5085 = vmatmul.mubr.msk.f32.gmra.mxu1 %vm58_vm1, %v5704_v26 }
  0x34   :  { %799 = vmatprep.subr.mxu0 %v5054_v6  ;;  %5529 = vmatprep.subr.mxu1 %v5055_v7  ;;  %v5161_v6 = vld [vmem:[%s7943_s0 + $0x3c8] sm:$0xff] }
  0x35   :  { %800 = vmatpush1.msra.mxu0 %v5053_v8  ;;  %5530 = vmatpush3.msra.mxu1 %v5055_v7  ;;  %v5151_v7 = vld [vmem:[%s7943_s0 + $0x378] sm:$0xff]  ;;  %v5153_v8 = vld [vmem:[%s7943_s0 + $0x388] sm:$0xff] }
  0x36   :  { %801 = vmatprep.subr.mxu0 %v5045_v9  ;;  %5531 = vmatprep.subr.mxu1 %v5046_v10  ;;  %v5150_v9 = vld [vmem:[%s7943_s0 + $0x370] sm:$0xff] }
  0x37   :  { %802 = vmatpush1.msra.mxu0 %v5044_v11  ;;  %835 = vmatprep.mubr.f32.mxu0 %v5570_v3  ;;  %v5182_v11 = vld [vmem:[%s7943_s0 + $0x470] sm:$0x1] }
  0x38   :  { %5532 = vmatpush3.msra.mxu1 %v5046_v10  ;;  %5533 = vmatprep.mubr.msk.f32.mxu1 %vm58_vm1, %v5667_v17  ;;  %v5152_v10 = vld [vmem:[%s7943_s0 + $0x380] sm:$0xff] }
  0x39   :  { %5088 = vmatmul.mubr.msk.f32.vlgmr.msra.gmra.mxu0 %vm58_vm1, %v5667_v17  ;;  %5534 = vmatmul.mubr.msk.f32.vlgmr.msra.gmra.mxu1 %vm58_vm1, %v5704_v26 }
  0x3a   :  { %5129 = vmatprep.subr.msk.mxu0 %vm65_vm0, %v5121_v12  ;;  %5133 = vmatprep.subr.msk.mxu1 %vm65_vm0, %v5123_v13  ;;  %v5183_v12 = vld [vmem:[%s7943_s0 + $0x478] sm:$0x1]  ;;  %v5181_v13 = vld [vmem:[%s7943_s0 + $0x468] sm:$0x1] }
  0x3b   :  { %5130 = vmatpush1.msk.msra.mxu0 %vm65_vm0, %v5120_v14  ;;  %5134 = vmatpush1.msk.msra.mxu1 %vm65_vm0, %v5122_v15  ;;  %v5173_v14 = vld [vmem:[%s7943_s0 + $0x428] sm:$0xff]  ;;  %v5174_v15 = vld [vmem:[%s7943_s0 + $0x430] sm:$0xff] }
  0x3c   :  { %1031 = vmatprep.subr.mxu0 %v5112_v16  ;;  %1108 = vmatprep.subr.mxu1 %v5114_v18  ;;  %v5172_v16 = vld [vmem:[%s7943_s0 + $0x420] sm:$0xff] }
  0x3d   :  { %841 = vmatprep.mubr.f32.mxu0 %v5570_v3  ;;  %1032 = vmatpush1.msra.mxu0 %v5111_v19  ;;  %v5164_v18 = vld [vmem:[%s7943_s0 + $0x3e0] sm:$0xff]  ;;  %v5165_v19 = vld [vmem:[%s7943_s0 + $0x3e8] sm:$0xff] }
  0x3e   :  { %1109 = vmatpush1.msra.mxu1 %v5113_v20  ;;  %5089 = vmatmul.mubr.msk.f32.gmra.mxu0 %vm58_vm1, %v5704_v26  ;;  %v5163_v20 = vld [vmem:[%s7943_s0 + $0x3d8] sm:$0xff] }
  0x3f   :  { %1033 = vmatprep.subr.mxu0 %v5103_v21  ;;  %1110 = vmatprep.subr.mxu1 %v5105_v22  ;;  %v5155_v21 = vld [vmem:[%s7943_s0 + $0x398] sm:$0xff]  ;;  %v5156_v22 = vld [vmem:[%s7943_s0 + $0x3a0] sm:$0xff] }
  0x40   :  { %1034 = vmatpush1.msra.mxu0 %v5102_v23  ;;  %1111 = vmatpush1.msra.mxu1 %v5104_v24  ;;  %v5154_v23 = vld [vmem:[%s7943_s0 + $0x390] sm:$0xff]  ;;  %v1871_v24 = vld [vmem:[%s7945_s2] sm:$0xff]  ;;  %s5572_s0 = smov 112  }
  0x41   :  { %1035 = vmatprep.subr.mxu0 %v5094_v25  ;;  %1112 = vmatprep.subr.mxu1 %v5096_v27  ;;  %v5571_v25 = vmov 0  }
  0x42   :  { %1036 = vmatpush1.msra.mxu0 %v5093_v28  ;;  %1069 = vmatprep.mubr.f32.mxu0 %v5570_v3 }
  0x43   :  { %1113 = vmatpush1.msra.mxu1 %v5095_v29  ;;  %1146 = vmatprep.mubr.f32.mxu1 %v5570_v3 }
  0x44   :  { %5131 = vmatmul.mubr.msk.f32.vlgmr.msra.gmra.mxu0 %vm58_vm1, %v5667_v17  ;;  %5135 = vmatmul.mubr.msk.f32.vlgmr.msra.gmra.mxu1 %vm58_vm1, %v5667_v17 }
  0x45   :  { %5137 = vmatprep.subr.msk.mxu0 %vm65_vm0, %v5125_v30  ;;  %5141 = vmatprep.subr.msk.mxu1 %vm65_vm0, %v5127_v31 }
  0x46   :  { %5138 = vmatpush1.msk.msra.mxu0 %vm65_vm0, %v5124_v32  ;;  %5142 = vmatpush1.msk.msra.mxu1 %vm65_vm0, %v5126_v33 }
  0x47   :  { %1185 = vmatprep.subr.mxu0 %v5116_v34  ;;  %1262 = vmatprep.subr.mxu1 %v5118_v35 }
  0x48   :  { %1075 = vmatprep.mubr.f32.mxu0 %v5570_v3  ;;  %1152 = vmatprep.mubr.f32.mxu1 %v5570_v3 }
  0x49   :  { %1186 = vmatpush1.msra.mxu0 %v5115_v36  ;;  %1263 = vmatpush1.msra.mxu1 %v5117_v37 }
  0x4a   :  { %5132 = vmatmul.mubr.msk.f32.gmra.mxu0 %vm58_vm1, %v5704_v26  ;;  %5136 = vmatmul.mubr.msk.f32.gmra.mxu1 %vm58_vm1, %v5704_v26 }
  0x4b   :  { %1187 = vmatprep.subr.mxu0 %v5107_v38  ;;  %1264 = vmatprep.subr.mxu1 %v5109_v39 }
  0x4c   :  { %1188 = vmatpush1.msra.mxu0 %v5106_v40  ;;  %1265 = vmatpush1.msra.mxu1 %v5108_v41 }
  0x4d   :  { %1189 = vmatprep.subr.mxu0 %v5098_v42  ;;  %1266 = vmatprep.subr.mxu1 %v5100_v43 }
  0x4e   :  { %1190 = vmatpush1.msra.mxu0 %v5097_v44  ;;  %1223 = vmatprep.mubr.f32.mxu0 %v5570_v3 }
  0x4f   :  { %1267 = vmatpush1.msra.mxu1 %v5099_v45  ;;  %1300 = vmatprep.mubr.f32.mxu1 %v5570_v3 }
  0x50   :  { %5139 = vmatmul.mubr.msk.f32.vlgmr.msra.gmra.mxu0 %vm58_vm1, %v5667_v17  ;;  %5143 = vmatmul.mubr.msk.f32.vlgmr.msra.gmra.mxu1 %vm58_vm1, %v5667_v17 }
  0x51   :  { %5536 = vmatprep.subr.msk.mxu0 %vm65_vm0, %v5128_v46  ;;  %5184 = vmatprep.subr.msk.mxu1 %vm65_vm0, %v5176_v47 }
  0x52   :  { %5537 = vmatpush3.msk.msra.mxu0 %vm65_vm0, %v5128_v46  ;;  %5185 = vmatpush1.msk.msra.mxu1 %vm65_vm0, %v5175_v48 }
  0x53   :  { %5538 = vmatprep.subr.mxu0 %v5119_v49  ;;  %1496 = vmatprep.subr.mxu1 %v5167_v50 }
  0x54   :  { %1229 = vmatprep.mubr.f32.mxu0 %v5570_v3  ;;  %1306 = vmatprep.mubr.f32.mxu1 %v5570_v3 }
  0x55   :  { %5539 = vmatpush3.msra.mxu0 %v5119_v49  ;;  %1497 = vmatpush1.msra.mxu1 %v5166_v51 }
  0x56   :  { %5140 = vmatmul.mubr.msk.f32.gmra.mxu0 %vm58_vm1, %v5704_v26  ;;  %5144 = vmatmul.mubr.msk.f32.gmra.mxu1 %vm58_vm1, %v5704_v26 }
  0x57   :  { %5540 = vmatprep.subr.mxu0 %v5110_v52  ;;  %1498 = vmatprep.subr.mxu1 %v5158_v53 }
  0x58   :  { %5541 = vmatpush3.msra.mxu0 %v5110_v52  ;;  %1499 = vmatpush1.msra.mxu1 %v5157_v54 }
  0x59   :  { %5542 = vmatprep.subr.mxu0 %v5101_v55  ;;  %1500 = vmatprep.subr.mxu1 %v5149_v56 }
  0x5a   :  { %5543 = vmatpush3.msra.mxu0 %v5101_v55  ;;  %5544 = vmatprep.mubr.msk.f32.mxu0 %vm58_vm1, %v5667_v17 }
  0x5b   :  { %1501 = vmatpush1.msra.mxu1 %v5148_v57  ;;  %1534 = vmatprep.mubr.f32.mxu1 %v5570_v3 }
  0x5c   :  { %5545 = vmatmul.mubr.msk.f32.vlgmr.msra.gmra.mxu0 %vm58_vm1, %v5704_v26  ;;  %5186 = vmatmul.mubr.msk.f32.vlgmr.msra.gmra.mxu1 %vm58_vm1, %v5667_v17 }
  0x5d   :  { %5188 = vmatprep.subr.msk.mxu0 %vm65_vm0, %v5178_v58  ;;  %5192 = vmatprep.subr.msk.mxu1 %vm65_vm0, %v5180_v59 }
  0x5e   :  { %5189 = vmatpush1.msk.msra.mxu0 %vm65_vm0, %v5177_v60  ;;  %5193 = vmatpush1.msk.msra.mxu1 %vm65_vm0, %v5179_v61 }
  0x5f   :  { %1573 = vmatprep.subr.mxu0 %v5169_v62  ;;  %1650 = vmatprep.subr.mxu1 %v5171_v63 }
  0x60   :  { %1540 = vmatprep.mubr.f32.mxu1 %v5570_v3  ;;  %1574 = vmatpush1.msra.mxu0 %v5168_v0 }
  0x61   :  { %1651 = vmatpush1.msra.mxu1 %v5170_v1  ;;  %1575 = vmatprep.subr.mxu0 %v5160_v2 }
  0x62   :  { %5187 = vmatmul.mubr.msk.f32.gmra.mxu1 %vm58_vm1, %v5704_v26  ;;  %1652 = vmatprep.subr.mxu1 %v5162_v4 }
  0x63   :  { %1576 = vmatpush1.msra.mxu0 %v5159_v5  ;;  %1653 = vmatpush1.msra.mxu1 %v5161_v6 }
  0x64   :  { %1577 = vmatprep.subr.mxu0 %v5151_v7  ;;  %1654 = vmatprep.subr.mxu1 %v5153_v8 }
  0x65   :  { %1578 = vmatpush1.msra.mxu0 %v5150_v9  ;;  %1611 = vmatprep.mubr.f32.mxu0 %v5570_v3 }
  0x66   :  { %1655 = vmatpush1.msra.mxu1 %v5152_v10  ;;  %1688 = vmatprep.mubr.f32.mxu1 %v5570_v3 }
  0x67   :  { %5190 = vmatmul.mubr.msk.f32.vlgmr.msra.gmra.mxu0 %vm58_vm1, %v5667_v17  ;;  %5194 = vmatmul.mubr.msk.f32.vlgmr.msra.gmra.mxu1 %vm58_vm1, %v5667_v17 }
  0x68   :  { %5196 = vmatprep.subr.msk.mxu0 %vm65_vm0, %v5182_v11  ;;  %5547 = vmatprep.subr.msk.mxu1 %vm65_vm0, %v5183_v12 }
  0x69   :  { %5197 = vmatpush1.msk.msra.mxu0 %vm65_vm0, %v5181_v13  ;;  %5548 = vmatpush3.msk.msra.mxu1 %vm65_vm0, %v5183_v12 }
  0x6a   :  { %1727 = vmatprep.subr.mxu0 %v5173_v14  ;;  %5549 = vmatprep.subr.mxu1 %v5174_v15 }
  0x6b   :  { %1617 = vmatprep.mubr.f32.mxu0 %v5570_v3  ;;  %1694 = vmatprep.mubr.f32.mxu1 %v5570_v3 }
  0x6c   :  { %1728 = vmatpush1.msra.mxu0 %v5172_v16  ;;  %5550 = vmatpush3.msra.mxu1 %v5174_v15 }
  0x6d   :  { %5191 = vmatmul.mubr.msk.f32.gmra.mxu0 %vm58_vm1, %v5704_v26  ;;  %5195 = vmatmul.mubr.msk.f32.gmra.mxu1 %vm58_vm1, %v5704_v26 }
  0x6e   :  { %1729 = vmatprep.subr.mxu0 %v5164_v18  ;;  %5551 = vmatprep.subr.mxu1 %v5165_v19 }
  0x6f   :  { %1730 = vmatpush1.msra.mxu0 %v5163_v20  ;;  %5552 = vmatpush3.msra.mxu1 %v5165_v19 }
  0x70   :  { %1731 = vmatprep.subr.mxu0 %v5155_v21  ;;  %5553 = vmatprep.subr.mxu1 %v5156_v22 }
  0x71   :  { %1732 = vmatpush1.msra.mxu0 %v5154_v23  ;;  %1765 = vmatprep.mubr.f32.mxu0 %v5570_v3 }
  0x72   :  { %5554 = vmatpush3.msra.mxu1 %v5156_v22  ;;  %5555 = vmatprep.mubr.msk.f32.mxu1 %vm58_vm1, %v5667_v17 }
  0x73   :  { %5198 = vmatmul.mubr.msk.f32.vlgmr.msra.gmra.mxu0 %vm58_vm1, %v5667_v17  ;;  %5556 = vmatmul.mubr.msk.f32.vlgmr.msra.gmra.mxu1 %vm58_vm1, %v5704_v26 }
  0x74   :  { %1771 = vmatprep.mubr.f32.mxu0 %v5570_v3  ;;  %5568 = vset.pattern.permute.xlu0 %v5571_v25 }
  0x75   :  { %1875 = vperm.xlu0 %5568, %v1871_v24   ;;  %5569 = vset.pattern.permute.xlu1 %v5571_v25 }
  0x76   :  { %2197 = vmatprep.subr.mxu0 %v5570_v3  ;;  %2380 = vmatprep.subr.mxu1 %v5570_v3 }
  0x77   :  { %5199 = vmatmul.mubr.msk.f32.gmra.mxu0 %vm58_vm1, %v5704_v26 }
  0xca   :  { %v6209_v27 = vpop.f32.mrf.mxu0  ;;  %v6211_v28 = vpop.f32.mrf.mxu1 }
  0xcc   :  { %v6213_v17 = vpop.f32.mrf.mxu0  ;;  %v6215_v29 = vpop.f32.mrf.mxu1 }
  0xd0   :  { %v165_v30 = vpop.f32.mrf.mxu0  ;;  %v242_v31 = vpop.f32.mrf.mxu1 }
  0xd2   :  { %v244_v32 = vpop.f32.mrf.mxu1  ;;  %v167_v33 = vpop.f32.mrf.mxu0 }
  0xd6   :  { %v6217_v34 = vpop.f32.mrf.mxu1  ;;  %v6219_v35 = vpop.f32.mrf.mxu0 }
  0xd8   :  { %v6221_v36 = vpop.f32.mrf.mxu1  ;;  %v6223_v37 = vpop.f32.mrf.mxu0 }
  0xdc   :  { %v396_v26 = vpop.f32.mrf.mxu1  ;;  %v319_v39 = vpop.f32.mrf.mxu0 }
  0xde   :  { %v398_v38 = vpop.f32.mrf.mxu1  ;;  %v321_v41 = vpop.f32.mrf.mxu0 }
  0xe2   :  { %v606_v40 = vpop.f32.mrf.mxu1  ;;  %v5524_v43 = vpop.f32.mrf.mxu0 }
  0xe4   :  { %v608_v42 = vpop.f32.mrf.mxu1  ;;  %v6225_v47 = vpop.f32.mrf.mxu0 }
  0xe8   :  { %v612_v44 = vpop.f32.mrf.mxu1 }
  0xe9   :  { %v932_v45 = vmax.f32 %v165_v30, %v612_v44 }
  0xea   :  { %v614_v46 = vpop.f32.mrf.mxu1 }
  0xeb   :  { %v933_v48 = vmax.f32 %v167_v33, %v614_v46 }
  0xed   :  { %v6227_v49 = vpop.f32.mrf.mxu0  ;;  %v6229_v50 = vpop.f32.mrf.mxu1 }
  0xef   :  { %v6231_v51 = vpop.f32.mrf.mxu0  ;;  %v6233_v52 = vpop.f32.mrf.mxu1 }
  0xf0   :  { %v6263_v44 = vpop.permute.xlu0 %1875 }
  0xf3   :  { %v689_v53 = vpop.f32.mrf.mxu0  ;;  %v766_v54 = vpop.f32.mrf.mxu1 }
  0xf4   :  { %v934_v55 = vmax.f32 %v242_v31, %v689_v53  ;;  %v936_v56 = vmax.f32 %v319_v39, %v766_v54 }
  0xf5   :  { %v691_v57 = vpop.f32.mrf.mxu0  ;;  %v768_v58 = vpop.f32.mrf.mxu1 }
  0xf6   :  { %v935_v59 = vmax.f32 %v244_v32, %v691_v57  ;;  %v937_v60 = vmax.f32 %v321_v41, %v768_v58  ;;  %v924_v41 = vmax.f32 %v6213_v17, %v608_v42 }
  0xf9   :  { %v6235_v61 = vpop.f32.mrf.mxu0  ;;  %v5535_v62 = vpop.f32.mrf.mxu1 }
  0xfa   :  { %v940_v63 = vmax.f32 %v5524_v43, %v5535_v62 }
  0xfb   :  { %v6237_v0 = vpop.f32.mrf.mxu0  ;;  %v6239_v6 = vpop.f32.mrf.mxu1 }
  0xfe   :  { %v843_v1 = vpop.f32.mrf.mxu0 }
  0xff   :  { %v938_v2 = vmax.f32 %v396_v26, %v843_v1  ;;  %v923_v26 = vmax.f32 %v6209_v27, %v606_v40 }
 0x100   :  { %v845_v4 = vpop.f32.mrf.mxu0 }
 0x101   :  { %v939_v5 = vmax.f32 %v398_v38, %v845_v4 }
 0x104   :  { %v1071_v7 = vpop.f32.mrf.mxu0  ;;  %v1148_v8 = vpop.f32.mrf.mxu1 }
 0x105   :  { %v1388_v43 = vmax.f32 %v923_v26, %v1071_v7 }
 0x106   :  { %v1073_v9 = vpop.f32.mrf.mxu0  ;;  %v1150_v10 = vpop.f32.mrf.mxu1 }
 0x10a   :  { %v1077_v11 = vpop.f32.mrf.mxu0  ;;  %v1154_v12 = vpop.f32.mrf.mxu1 }
 0x10b   :  { %v6241_v13 = vmax.f32 %v932_v45, %v1077_v11  ;;  %v6243_v14 = vmax.f32 %v934_v55, %v1154_v12 }
 0x10c   :  { %v1079_v15 = vpop.f32.mrf.mxu0  ;;  %v1156_v16 = vpop.f32.mrf.mxu1 }
 0x10d   :  { %v6245_v18 = vmax.f32 %v933_v48, %v1079_v15  ;;  %v6247_v19 = vmax.f32 %v935_v59, %v1156_v16  ;;  %v1389_v48 = vmax.f32 %v924_v41, %v1073_v9  ;;  %v925_v59 = vmax.f32 %v6211_v28, %v6227_v49 }
 0x10f   :  { %v1390_v4 = vmax.f32 %v925_v59, %v1148_v8  ;;  %v931_v59 = vmax.f32 %v6225_v47, %v6239_v6  ;;  %v2113_v47 = vld [vmem:[%s7946_s3 + $0x58] sm:$0xff]  ;;  %v5216_v6 = vld [vmem:[%s7946_s3 + $0xe8] sm:$0xff] }
 0x110   :  { %v1225_v20 = vpop.f32.mrf.mxu0  ;;  %v6249_v21 = vpop.f32.mrf.mxu1 }
 0x112   :  { %v1227_v22 = vpop.f32.mrf.mxu0  ;;  %v6251_v23 = vpop.f32.mrf.mxu1 }
 0x116   :  { %v1231_v24 = vpop.f32.mrf.mxu0  ;;  %v1308_v25 = vpop.f32.mrf.mxu1 }
 0x117   :  { %v6253_v30 = vmax.f32 %v936_v56, %v1231_v24  ;;  %v6255_v31 = vmax.f32 %v938_v2, %v1308_v25  ;;  %v926_v2 = vmax.f32 %v6215_v29, %v6231_v51  ;;  %v2117_v29 = vld [vmem:[%s7946_s3 + $0x78] sm:$0xff] }
 0x118   :  { %v1233_v32 = vpop.f32.mrf.mxu0  ;;  %v1310_v33 = vpop.f32.mrf.mxu1  ;;  %2198 = vmatpush1.msra.mxu0 %v2117_v29  ;;  %v5213_v29 = vld [vmem:[%s7946_s3 + $0xd0] sm:$0xff] }
 0x119   :  { %v6258_v38 = vmax.f32 %v937_v60, %v1233_v32  ;;  %v6260_v39 = vmax.f32 %v939_v5, %v1310_v33  ;;  %v927_v60 = vmax.f32 %v6219_v35, %v6229_v50  ;;  %v928_v35 = vmax.f32 %v6223_v37, %v6233_v52  ;;  %v5220_v37 = vld [vmem:[%s7946_s3 + $0x108] sm:$0xff]  ;;  %2199 = vmatprep.subr.mxu0 %v5570_v3 }
 0x11a   :  { %v1391_v50 = vmax.f32 %v926_v2, %v1150_v10  ;;  %2381 = vmatpush1.msra.mxu1 %v5220_v37  ;;  %v5212_v37 = vld [vmem:[%s7946_s3 + $0xc8] sm:$0xff] }
 0x11b   :  { %v1392_v28 = vmax.f32 %v927_v60, %v1225_v20  ;;  %v1393_v15 = vmax.f32 %v928_v35, %v1227_v22  ;;  %v2116_v20 = vld [vmem:[%s7946_s3 + $0x70] sm:$0xff]  ;;  %v5219_v22 = vld [vmem:[%s7946_s3 + $0x100] sm:$0xff]  ;;  %2382 = vmatprep.subr.mxu1 %v5570_v3 }
 0x11c   :  { %v5546_v45 = vpop.f32.mrf.mxu0  ;;  %v1536_v46 = vpop.f32.mrf.mxu1  ;;  %2200 = vmatpush1.msra.mxu0 %v2116_v20  ;;  %2383 = vmatpush1.msra.mxu1 %v5219_v22  ;;  %v5210_v20 = vld [vmem:[%s7946_s3 + $0xb8] sm:$0xff]  ;;  %v2106_v22 = vld [vmem:[%s7946_s3 + $0x20] sm:$0xff] }
 0x11d   :  { %v6265_v53 = vmax.f32 %v940_v63, %v5546_v45  ;;  %v1853_v54 = vmax.f32 %v1388_v43, %v1536_v46  ;;  %v2115_v43 = vld [vmem:[%s7946_s3 + $0x68] sm:$0xff]  ;;  %v5218_v45 = vld [vmem:[%s7946_s3 + $0xf8] sm:$0xff]  ;;  %v929_v46 = vmax.f32 %v6217_v34, %v6235_v61  ;;  %2201 = vmatprep.subr.mxu0 %v5570_v3  ;;  %2384 = vmatprep.subr.mxu1 %v5570_v3  ;;  %v2114_v34 = vld [vmem:[%s7946_s3 + $0x60] sm:$0xff] }
 0x11e   :  { %v1538_v55 = vpop.f32.mrf.mxu1  ;;  %v6279_v63 = vpop.f32.mrf.mxu0  ;;  %2202 = vmatpush1.msra.mxu0 %v2115_v43  ;;  %2385 = vmatpush1.msra.mxu1 %v5218_v45  ;;  %v5217_v61 = vld [vmem:[%s7946_s3 + $0xf0] sm:$0xff]  ;;  %v1872_v45 = vld [vmem:[%s7945_s2 + $0x8] sm:$0xff] }
 0x11f   :  { %v1883_v56 = vadd.f32 %v6263_v44, %v1853_v54  ;;  %v1854_v57 = vmax.f32 %v1389_v48, %v1538_v55  ;;  %2203 = vmatprep.subr.mxu0 %v5570_v3  ;;  %2386 = vmatprep.subr.mxu1 %v5570_v3  ;;  %v5209_v43 = vld [vmem:[%s7946_s3 + $0xb0] sm:$0xff] }
 0x120   :  { %2204 = vmatpush1.msra.mxu0 %v2114_v34  ;;  %2387 = vmatpush1.msra.mxu1 %v5217_v61  ;;  %v5207_v34 = vld [vmem:[%s7946_s3 + $0xa0] sm:$0xff]  ;;  %v2103_v61 = vld [vmem:[%s7946_s3 + $0x8] sm:$0xff] }
 0x121   :  { %v1901_v27 = vmax.f32 %v1883_v56, 0.0  ;;  %v1884_v40 = vadd.f32 %v6263_v44, %v1854_v57  ;;  %2205 = vmatprep.subr.mxu0 %v5570_v3  ;;  %2388 = vmatprep.subr.mxu1 %v5570_v3 }
 0x122   :  { %v6269_v58 = vpop.f32.mrf.mxu1  ;;  %2206 = vmatpush1.msra.mxu0 %v2113_v47  ;;  %2389 = vmatpush1.msra.mxu1 %v5216_v6 }
 0x123   :  { %1919 = vst [vmem:[#allocation2] sm:$0xff] %v1901_v27  ;;  %v1902_v17 = vmax.f32 %v1884_v40, 0.0  ;;  %v1862_v42 = vmax.f32 %v6241_v13, %v6269_v58  ;;  %v930_v40 = vmax.f32 %v6221_v36, %v6237_v0  ;;  %2207 = vmatprep.subr.mxu0 %v5570_v3  ;;  %2390 = vmatprep.subr.mxu1 %v5570_v3 }
 0x124   :  { %v6277_v62 = vpop.f32.mrf.mxu1 }
 0x125   :  { %1921 = vst.msk [vmem:[#allocation2 + $0x8] sm:$0xff] %vm1920_vm2, %v1902_v17  ;;  %v1863_v1 = vmax.f32 %v6245_v18, %v6277_v62  ;;  %1928 = vrot.lane.b32.xlu0 %v1902_v17, %s5572_s0  ;;  %v1394_v17 = vmax.f32 %v929_v46, %v6249_v21  ;;  %v2105_v46 = vld [vmem:[%s7946_s3 + $0x18] sm:$0xff] }
 0x127   :  { %v1613_v49 = vpop.f32.mrf.mxu0  ;;  %v1690_v5 = vpop.f32.mrf.mxu1 }
 0x128   :  { %v1855_v7 = vmax.f32 %v1390_v4, %v1613_v49  ;;  %v1857_v9 = vmax.f32 %v1392_v28, %v1690_v5  ;;  %v1395_v4 = vmax.f32 %v930_v40, %v6251_v23  ;;  %v1396_v23 = vmax.f32 %v931_v59, %v6279_v63  ;;  %v5206_v40 = vld [vmem:[%s7946_s3 + $0x98] sm:$0xff]  ;;  %v5205_v59 = vld [vmem:[%s7946_s3 + $0x90] sm:$0xff] }
 0x129   :  { %v1615_v11 = vpop.f32.mrf.mxu0  ;;  %v1692_v12 = vpop.f32.mrf.mxu1 }
 0x12a   :  { %v6290_v16 = vadd.f32 %v6263_v44, %v1857_v9  ;;  %v1856_v24 = vmax.f32 %v1391_v50, %v1615_v11  ;;  %v1885_v25 = vadd.f32 %v6263_v44, %v1855_v7  ;;  %v1858_v8 = vmax.f32 %v1393_v15, %v1692_v12  ;;  %v2112_v50 = vld [vmem:[%s7946_s3 + $0x50] sm:$0xff]  ;;  %v5215_v7 = vld [vmem:[%s7946_s3 + $0xe0] sm:$0xff]  ;;  %v2111_v12 = vld [vmem:[%s7946_s3 + $0x48] sm:$0xff] }
 0x12b   :  { %2208 = vmatpush1.msra.mxu0 %v2112_v50  ;;  %2391 = vmatpush1.msra.mxu1 %v5215_v7  ;;  %v5214_v15 = vld [vmem:[%s7946_s3 + $0xd8] sm:$0xff] }
 0x12c   :  { %v1905_v51 = vmax.f32 %v6290_v16, 0.0  ;;  %v6301_v52 = vadd.f32 %v6263_v44, %v1856_v24  ;;  %v1903_v10 = vmax.f32 %v1885_v25, 0.0  ;;  %v6335_v56 = vadd.f32 %v6263_v44, %v1858_v8  ;;  %2209 = vmatprep.subr.mxu0 %v5570_v3  ;;  %2392 = vmatprep.subr.mxu1 %v5570_v3  ;;  %v2110_v25 = vld [vmem:[%s7946_s3 + $0x40] sm:$0xff] }
 0x12d   :  { %v6309_v32 = vpop.f32.mrf.mxu0  ;;  %v6311_v33 = vpop.f32.mrf.mxu1  ;;  %2210 = vmatpush1.msra.mxu0 %v2111_v12  ;;  %2393 = vmatpush1.msra.mxu1 %v5214_v15  ;;  %v5211_v8 = vld [vmem:[%s7946_s3 + $0xc0] sm:$0xff]  ;;  %v2135_v15 = vlaneseq }
 0x12e   :  { %v1864_v26 = vmax.f32 %v6243_v14, %v6309_v32  ;;  %v1866_v41 = vmax.f32 %v6253_v30, %v6311_v33  ;;  %1974 = vrot.lane.b32.xlu0 %v1905_v51, %s5573_s10  ;;  %1930 = vrot.lane.b32.xlu1 %v1903_v10, %s5572_s0  ;;  %v1904_v55 = vmax.f32 %v6301_v52, 0.0  ;;  %v1906_v36 = vmax.f32 %v6335_v56, 0.0  ;;  %v2108_v52 = vld [vmem:[%s7946_s3 + $0x30] sm:$0xff] }
 0x12f   :  { %v6329_v48 = vpop.f32.mrf.mxu0  ;;  %v6331_v54 = vpop.f32.mrf.mxu1  ;;  %2211 = vmatprep.subr.mxu0 %v5570_v3  ;;  %2394 = vmatprep.subr.mxu1 %v5570_v3  ;;  %v2104_v56 = vld [vmem:[%s7946_s3 + $0x10] sm:$0xff] }
 0x130   :  { %v1865_v57 = vmax.f32 %v6247_v19, %v6329_v48  ;;  %v1867_v27 = vmax.f32 %v6258_v38, %v6331_v54  ;;  %2212 = vmatpush1.msra.mxu0 %v2110_v25  ;;  %2395 = vmatpush1.msra.mxu1 %v5213_v29  ;;  %v5579_v25 = vmov 1966171168   ;;  %v5239_v19 = vld [vmem:[%s7946_s3 + $0x198] sm:$0xff]  ;;  %v5258_v48 = vld [vmem:[%s7946_s3 + $0x228] sm:$0xff] }
 0x131   :  { %2213 = vmatprep.subr.mxu0 %v5570_v3  ;;  %2396 = vmatprep.subr.mxu1 %v5570_v3  ;;  %v2133_v29 = vunpack.c.l.s4 %v5579_v25 }
 0x132   :  { %1950 = vrot.lane.b32.xlu1 %v1903_v10, %s5574_s19  ;;  %1952 = vrot.lane.b32.xlu0 %v1904_v55, %s5574_s19  ;;  %v2107_v10 = vld [vmem:[%s7946_s3 + $0x28] sm:$0xff] }
 0x133   :  { %v1767_v60 = vpop.f32.mrf.mxu0  ;;  %v6356_v2 = vpop.f32.mrf.mxu1  ;;  %2397 = vmatpush1.msra.mxu1 %v5212_v37  ;;  %v2136_v37 = vshrl.u32 %v2135_v15, 7 }
 0x134   :  { %v1859_v0 = vmax.f32 %v1394_v17, %v1767_v60  ;;  %v1870_v21 = vmax.f32 %v6265_v53, %v6356_v2  ;;  %2398 = vmatprep.subr.mxu1 %v5570_v3  ;;  %v2102_v17 = vld [vmem:[%s7946_s3] sm:$0xff]  ;;  %v2119_v60 = vld [vmem:[%s7946_s3 + $0x88] sm:$0xff] }
 0x135   :  { %v1769_v28 = vpop.f32.mrf.mxu0  ;;  %v1844_v49 = vpop.f32.mrf.mxu1  ;;  %2399 = vmatpush1.msra.mxu1 %v5211_v8 }
 0x136   :  { %v1889_v5 = vadd.f32 %v6263_v44, %v1859_v0  ;;  %v1860_v35 = vmax.f32 %v1395_v4, %v1769_v28  ;;  %1994 = vrot.lane.b32.xlu1 %v1905_v51, %s5575_s24  ;;  %1996 = vrot.lane.b32.xlu0 %v1906_v36, %s5575_s24  ;;  %v1861_v11 = vmax.f32 %v1396_v23, %v1844_v49  ;;  %v5222_v4 = vld [vmem:[%s7946_s3 + $0x118] sm:$0xff]  ;;  %v5221_v0 = vld [vmem:[%s7946_s3 + $0x110] sm:$0xff] }
 0x137   :  { %2400 = vmatprep.subr.mxu1 %v5570_v3  ;;  %v1773_v33 = vpop.f32.mrf.mxu0 }
 0x138   :  { %v1907_v9 = vmax.f32 %v1889_v5, 0.0  ;;  %v1890_v63 = vadd.f32 %v6263_v44, %v1860_v35  ;;  %v1891_v24 = vadd.f32 %v6263_v44, %v1861_v11  ;;  %v2109_v44 = vld [vmem:[%s7946_s3 + $0x38] sm:$0xff]  ;;  %2401 = vmatpush1.msra.mxu1 %v5210_v20  ;;  %v2134_v20 = vunpack.c.0.s8 %v2133_v29 }
 0x139   :  { %2214 = vmatpush1.msra.mxu0 %v2109_v44  ;;  %2402 = vmatprep.subr.mxu1 %v5570_v3  ;;  %v1868_v38 = vmax.f32 %v6255_v31, %v1773_v33  ;;  %v1775_v31 = vpop.f32.mrf.mxu0  ;;  %v5226_v33 = vld [vmem:[%s7946_s3 + $0x130] sm:$0xff] }
 0x13a   :  { %1972 = vrot.lane.b32.xlu1 %v1904_v55, %s5573_s10  ;;  %2018 = vrot.lane.b32.xlu0 %v1907_v9, %s5576_s7  ;;  %v1908_v16 = vmax.f32 %v1890_v63, 0.0  ;;  %v1909_v51 = vmax.f32 %v1891_v24, 0.0  ;;  %v5208_v55 = vld [vmem:[%s7946_s3 + $0xa8] sm:$0xff] }
 0x13b   :  { %2215 = vmatprep.subr.mxu0 %v5570_v3  ;;  %2403 = vmatpush1.msra.mxu1 %v5209_v43 }
 0x13c   :  { %2216 = vmatpush1.msra.mxu0 %v2108_v52  ;;  %2404 = vmatprep.subr.mxu1 %v5570_v3 }
 0x13d   :  { %2217 = vmatprep.subr.mxu0 %v5570_v3  ;;  %2405 = vmatpush1.msra.mxu1 %v5208_v55 }
 0x13e   :  { %2016 = vrot.lane.b32.xlu1 %v1906_v36, %s5576_s7  ;;  %2040 = vrot.lane.b32.xlu0 %v1908_v16, %s5577_s13  ;;  %v2118_v36 = vld [vmem:[%s7946_s3 + $0x80] sm:$0xff] }
 0x13f   :  { %2218 = vmatpush1.msra.mxu0 %v2107_v10  ;;  %2406 = vmatprep.subr.mxu1 %v5570_v3 }
 0x140   :  { %2219 = vmatprep.subr.mxu0 %v5570_v3  ;;  %2407 = vmatpush1.msra.mxu1 %v5207_v34  ;;  %v2269_v34 = vld [vmem:[#allocation2 + $0x1] ss:$8 sm:$0x3] }
 0x141   :  { %2220 = vmatpush1.msra.mxu0 %v2106_v22  ;;  %2408 = vmatprep.subr.mxu1 %v5570_v3 }
 0x142   :  { %2038 = vrot.lane.b32.xlu1 %v1907_v9, %s5577_s13  ;;  %2062 = vrot.lane.b32.xlu0 %v1909_v51, %s5578_s23 }
 0x143   :  { %2221 = vmatprep.subr.mxu0 %v5570_v3  ;;  %2409 = vmatpush1.msra.mxu1 %v5206_v40 }
 0x144   :  { %2222 = vmatpush1.msra.mxu0 %v2105_v46  ;;  %2410 = vmatprep.subr.mxu1 %v5570_v3  ;;  %v2087_v46 = vld [vmem:[#allocation2] ss:$8 sm:$0x3] }
 0x145   :  { %2223 = vmatprep.subr.mxu0 %v5570_v3  ;;  %2411 = vmatpush1.msra.mxu1 %v5205_v59 }
 0x146   :  { %2060 = vrot.lane.b32.xlu1 %v1908_v16, %s5578_s23  ;;  %2224 = vmatpush1.msra.mxu0 %v2104_v56 }
 0x147   :  { %2225 = vmatprep.subr.mxu0 %v5570_v3  ;;  %2440 = vmatprep.subr.mxu1 %v5570_v3 }
 0x148   :  { %2226 = vmatpush1.msra.mxu0 %v2103_v61  ;;  %2441 = vmatpush2.msra.mxu1 %v5222_v4 }
 0x149   :  { %2227 = vmatprep.subr.mxu0 %v5570_v3  ;;  %2442 = vmatprep.subr.mxu1 %v5570_v3 }
 0x14a   :  { %1880 = vperm.xlu1 %5569, %v1872_v45   ;;  %2228 = vmatpush1.msra.mxu0 %v2102_v17 }
 0x14b   :  { %2257 = vmatprep.subr.mxu0 %v5570_v3  ;;  %2443 = vmatpush2.msra.mxu1 %v5221_v0 }
 0x14c   :  { %2258 = vmatpush2.msra.mxu0 %v2119_v60  ;;  %2746 = vmatprep.subr.mxu1 %v5570_v3  ;;  %v6507_v60 = vsub.s32 %v2134_v20, %v2136_v37 }
 0x14d   :  { %2259 = vmatprep.subr.mxu0 %v5570_v3 }
 0x14e   :  { %2260 = vmatpush2.msra.mxu0 %v2118_v36 }
 0x14f   :  { %2563 = vmatprep.subr.mxu0 %v5570_v3 }
 0x197   :  { %v1929_v47 = vpop.permute.xlu0 %1928 }
 0x1a0   :  { %v1975_v6 = vpop.permute.xlu0 %1974  ;;  %v1931_v28 = vpop.permute.xlu1 %1930 }
 0x1a1   :  { %1989 = vst.msk [vmem:[#allocation2 + $0x68] sm:$0xff] %vm1920_vm2, %v1975_v6  ;;  %v1937_v49 = vsel %vm1936_vm3, %v1929_v47, %v1931_v28  ;;  %1945 = vst.msk [vmem:[#allocation2 + $0x28] sm:$0xff] %vm1920_vm2, %v1931_v28 }
 0x1a2   :  { %1944 = vst [vmem:[#allocation2 + $0x20] sm:$0xff] %v1937_v49 }
 0x1a4   :  { %v1951_v23 = vpop.permute.xlu1 %1950  ;;  %v1953_v5 = vpop.permute.xlu0 %1952 }
 0x1a5   :  { %v1959_v35 = vsel %vm1958_vm4, %v1951_v23, %v1953_v5  ;;  %1967 = vst.msk [vmem:[#allocation2 + $0x48] sm:$0xff] %vm1920_vm2, %v1953_v5 }
 0x1a6   :  { %1966 = vst [vmem:[#allocation2 + $0x40] sm:$0xff] %v1959_v35 }
 0x1a8   :  { %v1995_v50 = vpop.permute.xlu1 %1994  ;;  %v1997_v7 = vpop.permute.xlu0 %1996 }
 0x1a9   :  { %v2003_v9 = vsel %vm2002_vm5, %v1995_v50, %v1997_v7  ;;  %2011 = vst.msk [vmem:[#allocation2 + $0x88] sm:$0xff] %vm1920_vm2, %v1997_v7  ;;  %v2089_v8 = vld [vmem:[#allocation2 + $0x20] ss:$8 sm:$0x3] }
 0x1aa   :  { %2010 = vst [vmem:[#allocation2 + $0x80] sm:$0xff] %v2003_v9  ;;  %v2271_v61 = vld [vmem:[#allocation2 + $0x21] ss:$8 sm:$0x3]  ;;  %v2128_v59 = vcombine.low %v2087_v46, %v2089_v8 }
 0x1ab   :  { %v2454_v36 = vld [vmem:[#allocation2 + $0x22] ss:$8 sm:$0x3]  ;;  %v2637_v49 = vld [vmem:[#allocation2 + $0x23] ss:$8 sm:$0x3]  ;;  %v2311_v35 = vcombine.low %v2269_v34, %v2271_v61 }
 0x1ac   :  { %v1973_v63 = vpop.permute.xlu1 %1972  ;;  %v2019_v11 = vpop.permute.xlu0 %2018 }
 0x1ad   :  { %v1981_v12 = vsel %vm1980_vm6, %v1973_v63, %v1975_v6  ;;  %2033 = vst.msk [vmem:[#allocation2 + $0xa8] sm:$0xff] %vm1920_vm2, %v2019_v11  ;;  %v2091_v10 = vld [vmem:[#allocation2 + $0x40] ss:$8 sm:$0x3]  ;;  %v2321_v8 = vrot.slane %v2311_v35, %v6507_v60 }
 0x1ae   :  { %1988 = vst [vmem:[#allocation2 + $0x60] sm:$0xff] %v1981_v12  ;;  %v2273_v40 = vld [vmem:[#allocation2 + $0x41] ss:$8 sm:$0x3]  ;;  %v2138_v12 = vrot.slane %v2128_v59, %v6507_v60 }
 0x1af   :  { %v2456_v0 = vld [vmem:[#allocation2 + $0x42] ss:$8 sm:$0x3]  ;;  %v2635_v63 = vld [vmem:[#allocation2 + $0x3] ss:$8 sm:$0x3] }
 0x1b0   :  { %v2017_v16 = vpop.permute.xlu1 %2016  ;;  %v2041_v24 = vpop.permute.xlu0 %2040  ;;  %v2452_v6 = vld [vmem:[#allocation2 + $0x2] ss:$8 sm:$0x3]  ;;  %v2822_v53 = vld [vmem:[#allocation2 + $0x44] ss:$8 sm:$0x3] }
 0x1b1   :  { %v2025_v44 = vsel %vm2024_vm7, %v2017_v16, %v2019_v11  ;;  %2055 = vst.msk [vmem:[#allocation2 + $0xc8] sm:$0xff] %vm1920_vm2, %v2041_v24  ;;  %v2494_v9 = vcombine.low %v2452_v6, %v2454_v36  ;;  %v2095_v11 = vld [vmem:[#allocation2 + $0x80] ss:$8 sm:$0x3] }
 0x1b2   :  { %2032 = vst [vmem:[#allocation2 + $0xa0] sm:$0xff] %v2025_v44  ;;  %v2639_v16 = vld [vmem:[#allocation2 + $0x43] ss:$8 sm:$0x3] }
 0x1b3   :  { %v2277_v29 = vld [vmem:[#allocation2 + $0x81] ss:$8 sm:$0x3] }
 0x1b4   :  { %v2039_v51 = vpop.permute.xlu1 %2038  ;;  %v2063_v52 = vpop.permute.xlu0 %2062 }
 0x1b5   :  { %v2047_v22 = vsel %vm2046_vm8, %v2039_v51, %v2041_v24  ;;  %2076 = vst.msk [vmem:[#allocation2 + $0xe8] sm:$0xff] %vm1920_vm2, %v2063_v52  ;;  %v2093_v43 = vld [vmem:[#allocation2 + $0x60] ss:$8 sm:$0x3]  ;;  %v2677_v24 = vcombine.low %v2635_v63, %v2637_v49 }
 0x1b6   :  { %v2275_v45 = vld [vmem:[#allocation2 + $0x61] ss:$8 sm:$0x3]  ;;  %2054 = vst [vmem:[#allocation2 + $0xc0] sm:$0xff] %v2047_v22  ;;  %v2129_v55 = vcombine.low %v2091_v10, %v2093_v43 }
 0x1b7   :  { %v2458_v56 = vld [vmem:[#allocation2 + $0x62] ss:$8 sm:$0x3]  ;;  %v2312_v4 = vcombine.low %v2273_v40, %v2275_v45  ;;  %v2641_v50 = vld [vmem:[#allocation2 + $0x63] ss:$8 sm:$0x3]  ;;  %v6521_v59 = vrot.slane %v2677_v24, %v6507_v60 }
 0x1b8   :  { %v2061_v17 = vpop.permute.xlu1 %2060  ;;  %v2495_v28 = vcombine.low %v2456_v0, %v2458_v56  ;;  %v2145_v5 = vrot.slane %v2129_v55, %v6507_v60  ;;  %v2678_v37 = vcombine.low %v2639_v16, %v2641_v50  ;;  %v2460_v10 = vld [vmem:[#allocation2 + $0x82] ss:$8 sm:$0x3]  ;;  %v6518_v55 = vrot.slane %v2494_v9, %v6507_v60  ;;  %v2643_v40 = vld [vmem:[#allocation2 + $0x83] ss:$8 sm:$0x3] }
 0x1b9   :  { %v2068_v47 = vsel %vm1920_vm2, %v2061_v17, %v2063_v52  ;;  %v2097_v23 = vld [vmem:[#allocation2 + $0xa0] ss:$8 sm:$0x3]  ;;  %v2279_v7 = vld [vmem:[#allocation2 + $0xa1] ss:$8 sm:$0x3]  ;;  %v2328_v15 = vrot.slane %v2312_v4, %v6507_v60 }
 0x1ba   :  { %2075 = vst [vmem:[#allocation2 + $0xe0] sm:$0xff] %v2068_v47  ;;  %v2130_v25 = vcombine.low %v2095_v11, %v2097_v23  ;;  %v6514_v44 = vrot.slane %v2495_v28, %v6507_v60  ;;  %v2161_v51 = vcombine.high %v2138_v12, %v2145_v5  ;;  %v2313_v52 = vcombine.low %v2277_v29, %v2279_v7  ;;  %v2462_v20 = vld [vmem:[#allocation2 + $0xa2] ss:$8 sm:$0x3] }
 0x1bb   :  { %v2645_v22 = vld [vmem:[#allocation2 + $0xa3] ss:$8 sm:$0x3]  ;;  %v2160_v45 = vcombine.low %v2138_v12, %v2145_v5  ;;  %v2344_v56 = vcombine.high %v2321_v8, %v2328_v15  ;;  %v2343_v34 = vcombine.low %v2321_v8, %v2328_v15  ;;  %v2496_v47 = vcombine.low %v2460_v10, %v2462_v20  ;;  %v2828_v2 = vld [vmem:[#allocation2 + $0xa4] ss:$8 sm:$0x3] }
 0x1bc   :  { %v2152_v36 = vrot.slane %v2130_v25, %v6507_v60  ;;  %v2527_v6 = vcombine.high %v6518_v55, %v6514_v44  ;;  %v6527_v28 = vrot.slane %v2678_v37, %v6507_v60  ;;  %v2177_v23 = vrot.slane %v2161_v51, %v6507_v60 }
 0x1bd   :  { %v2099_v43 = vld [vmem:[#allocation2 + $0xc0] ss:$8 sm:$0x3]  ;;  %v2281_v46 = vld [vmem:[#allocation2 + $0xc1] ss:$8 sm:$0x3]  ;;  %v2335_v35 = vrot.slane %v2313_v52, %v6507_v60  ;;  %v2170_v9 = vrot.slane %v2160_v45, %v6507_v60  ;;  %v2679_v11 = vcombine.low %v2643_v40, %v2645_v22  ;;  %v2360_v24 = vrot.slane %v2344_v56, %v6507_v60 }
 0x1be   :  { %v2464_v61 = vld [vmem:[#allocation2 + $0xc2] ss:$8 sm:$0x3]  ;;  %v2647_v17 = vld [vmem:[#allocation2 + $0xc3] ss:$8 sm:$0x3]  ;;  %v2353_v25 = vrot.slane %v2343_v34, %v6507_v60  ;;  %v6539_v37 = vrot.slane %v2496_v47, %v6507_v60  ;;  %v2710_v8 = vcombine.high %v6521_v59, %v6527_v28  ;;  %v2543_v47 = vrot.slane %v2527_v6, %v6507_v60 }
 0x1bf   :  { %v6562_v34 = vrot.slane %v2679_v11, %v6507_v60  ;;  %v5257_v6 = vld [vmem:[%s7946_s3 + $0x220] sm:$0xff]  ;;  %v5255_v11 = vld [vmem:[%s7946_s3 + $0x210] sm:$0xff] }
 0x1c1   :  { %v2101_v4 = vld [vmem:[#allocation2 + $0xe0] ss:$8 sm:$0x3]  ;;  %v2283_v0 = vld [vmem:[#allocation2 + $0xe1] ss:$8 sm:$0x3] }
 0x1c2   :  { %v2131_v49 = vcombine.low %v2099_v43, %v2101_v4  ;;  %v2314_v5 = vcombine.low %v2281_v46, %v2283_v0  ;;  %v2466_v50 = vld [vmem:[#allocation2 + $0xe2] ss:$8 sm:$0x3]  ;;  %v2649_v7 = vld [vmem:[#allocation2 + $0xe3] ss:$8 sm:$0x3] }
 0x1c3   :  { %v2497_v63 = vcombine.low %v2464_v61, %v2466_v50  ;;  %v2680_v12 = vcombine.low %v2647_v17, %v2649_v7  ;;  %v5238_v50 = vld [vmem:[%s7946_s3 + $0x190] sm:$0xff] }
 0x1c4   :  { %v2159_v15 = vrot.slane %v2131_v49, %v6507_v60  ;;  %v2342_v16 = vrot.slane %v2314_v5, %v6507_v60 }
 0x1c5   :  { %v6536_v29 = vpop.permute.xlu1 %1880  ;;  %v6542_v51 = vrot.slane %v2497_v63, %v6507_v60  ;;  %v6545_v52 = vrot.slane %v2680_v12, %v6507_v60  ;;  %v5256_v63 = vld [vmem:[%s7946_s3 + $0x218] sm:$0xff] }
 0x1c6   :  { %v1892_v10 = vadd.f32 %v6536_v29, %v1862_v42  ;;  %v1894_v20 = vadd.f32 %v6536_v29, %v1864_v26  ;;  %v1893_v22 = vadd.f32 %v6536_v29, %v1863_v1  ;;  %v2162_v43 = vcombine.low %v2152_v36, %v2159_v15 }
 0x1c7   :  { %v2163_v45 = vcombine.high %v2152_v36, %v2159_v15  ;;  %v2346_v46 = vcombine.high %v2335_v35, %v2342_v16  ;;  %v2345_v56 = vcombine.low %v2335_v35, %v2342_v16  ;;  %v1895_v62 = vadd.f32 %v6536_v29, %v1865_v57  ;;  %v5235_v15 = vld [vmem:[%s7946_s3 + $0x178] sm:$0xff]  ;;  %v5254_v16 = vld [vmem:[%s7946_s3 + $0x208] sm:$0xff] }
 0x1c8   :  { %v1910_v13 = vmax.f32 %v1892_v10, 0.0  ;;  %v1912_v58 = vmax.f32 %v1894_v20, 0.0  ;;  %v1911_v42 = vmax.f32 %v1893_v22, 0.0  ;;  %v2184_v61 = vrot.slane %v2162_v43, %v6507_v60  ;;  %v5252_v10 = vld [vmem:[%s7946_s3 + $0x1f8] sm:$0xff]  ;;  %v5232_v43 = vld [vmem:[%s7946_s3 + $0x160] sm:$0xff] }
 0x1c9   :  { %v2191_v14 = vrot.slane %v2163_v45, %v6507_v60  ;;  %v2374_v32 = vrot.slane %v2346_v46, %v6507_v60  ;;  %v2367_v18 = vrot.slane %v2345_v56, %v6507_v60  ;;  %v2529_v26 = vcombine.high %v6539_v37, %v6542_v51  ;;  %v5251_v45 = vld [vmem:[%s7946_s3 + $0x1f0] sm:$0xff]  ;;  %v5231_v46 = vld [vmem:[%s7946_s3 + $0x158] sm:$0xff]  ;;  %v5250_v56 = vld [vmem:[%s7946_s3 + $0x1e8] sm:$0xff] }
 0x1ca   :  { %1922 = vst [vmem:[#allocation2 + $0x10] sm:$0xff] %v1910_v13  ;;  %1934 = vrot.lane.b32.xlu1 %v1912_v58, %s5572_s0  ;;  %1923 = vst.msk [vmem:[#allocation2 + $0x18] sm:$0xff] %vm1920_vm2, %v1911_v42  ;;  %1932 = vrot.lane.b32.xlu0 %v1911_v42, %s5572_s0  ;;  %v2192_v1 = vcombine.low %v2170_v9, %v2184_v61  ;;  %v2712_v40 = vcombine.high %v6562_v34, %v6545_v52  ;;  %v1913_v49 = vmax.f32 %v1895_v62, 0.0  ;;  %v5237_v9 = vld [vmem:[%s7946_s3 + $0x188] sm:$0xff]  ;;  %v5249_v42 = vld [vmem:[%s7946_s3 + $0x1e0] sm:$0xff] }
 0x1cb   :  { %v2193_v17 = vcombine.low %v2177_v23, %v2191_v14  ;;  %v2376_v4 = vcombine.low %v2360_v24, %v2374_v32  ;;  %v2375_v36 = vcombine.low %v2353_v25, %v2367_v18  ;;  %v2557_v57 = vrot.slane %v2529_v26, %v6507_v60  ;;  %v5253_v24 = vld [vmem:[%s7946_s3 + $0x200] sm:$0xff]  ;;  %v5229_v61 = vld [vmem:[%s7946_s3 + $0x148] sm:$0xff]  ;;  %v5248_v14 = vld [vmem:[%s7946_s3 + $0x1d8] sm:$0xff] }
 0x1cc   :  { %v2740_v0 = vrot.slane %v2712_v40, %v6507_v60  ;;  %v2726_v23 = vrot.slane %v2710_v8, %v6507_v60  ;;  %v1896_v7 = vadd.f32 %v6536_v29, %v1866_v41  ;;  %v5236_v41 = vld [vmem:[%s7946_s3 + $0x180] sm:$0xff]  ;;  %v1897_v12 = vadd.f32 %v6536_v29, %v1867_v27  ;;  %v5234_v27 = vld [vmem:[%s7946_s3 + $0x170] sm:$0xff]  ;;  %v5233_v8 = vld [vmem:[%s7946_s3 + $0x168] sm:$0xff] }
 0x1cd   :  { %5204 = vmatprep.mubr.msk.f32.mxu0 %vm1920_vm2, %v2193_v17  ;;  %5223 = vmatprep.mubr.msk.f32.mxu1 %vm1920_vm2, %v2376_v4  ;;  %v2559_v5 = vcombine.low %v2543_v47, %v2557_v57  ;;  %v1898_v25 = vadd.f32 %v6536_v29, %v1868_v38  ;;  %v1869_v20 = vmax.f32 %v6260_v39, %v1775_v31  ;;  %v2824_v18 = vld [vmem:[#allocation2 + $0x64] ss:$8 sm:$0x3]  ;;  %v5247_v26 = vld [vmem:[%s7946_s3 + $0x1d0] sm:$0xff] }
 0x1ce   :  { %2262 = vmatmul.mubr.f32.vlgmr.msra.gmra.mxu0 %v2192_v1  ;;  %2445 = vmatmul.mubr.f32.vlgmr.msra.gmra.mxu1 %v2375_v36  ;;  %v2742_v35 = vcombine.low %v2726_v23, %v2740_v0  ;;  %v1914_v30 = vmax.f32 %v1896_v7, 0.0  ;;  %v1915_v54 = vmax.f32 %v1897_v12, 0.0  ;;  %v1900_v32 = vadd.f32 %v6536_v29, %v1870_v21  ;;  %v2832_v62 = vld [vmem:[#allocation2 + $0xe4] ss:$8 sm:$0x3] }
 0x1cf   :  { %2564 = vmatpush1.msra.mxu0 %v5239_v19  ;;  %2747 = vmatpush1.msra.mxu1 %v5258_v48  ;;  %v1916_v22 = vmax.f32 %v1898_v25, 0.0  ;;  %v1899_v39 = vadd.f32 %v6536_v29, %v1869_v20  ;;  %v5228_v1 = vld [vmem:[%s7946_s3 + $0x140] sm:$0xff]  ;;  %v5227_v19 = vld [vmem:[%s7946_s3 + $0x138] sm:$0xff]  ;;  %v5246_v48 = vld [vmem:[%s7946_s3 + $0x1c8] sm:$0xff]  ;;  %v2861_v23 = vcombine.low %v2822_v53, %v2824_v18  ;;  %v2711_v25 = vcombine.low %v6562_v34, %v6545_v52 }
 0x1d0   :  { %1956 = vrot.lane.b32.xlu1 %v1913_v49, %s5574_s19  ;;  %1954 = vrot.lane.b32.xlu0 %v1912_v58, %s5574_s19  ;;  %v5230_v58 = vld [vmem:[%s7946_s3 + $0x150] sm:$0xff]  ;;  %v2820_v40 = vld [vmem:[#allocation2 + $0x24] ss:$8 sm:$0x3]  ;;  %v1918_v36 = vmax.f32 %v1900_v32, 0.0  ;;  %v2526_v52 = vcombine.low %v6518_v55, %v6514_v44  ;;  %v2709_v34 = vcombine.low %v6521_v59, %v6527_v28  ;;  %v5260_v55 = vld [vmem:[%s7946_s3 + $0x238] sm:$0xff] }
 0x1d1   :  { %2565 = vmatprep.subr.mxu0 %v5570_v3  ;;  %5242 = vmatprep.mubr.msk.f32.mxu0 %vm1920_vm2, %v2559_v5  ;;  %v1917_v13 = vmax.f32 %v1899_v39, 0.0  ;;  %v3007_v21 = vld [vmem:[#allocation2 + $0x65] ss:$8 sm:$0x3]  ;;  %v2733_v28 = vrot.slane %v2711_v25, %v6507_v60 }
 0x1d2   :  { %2748 = vmatprep.subr.mxu1 %v5570_v3  ;;  %5261 = vmatprep.mubr.msk.f32.mxu1 %vm1920_vm2, %v2742_v35  ;;  %v3015_v29 = vld [vmem:[#allocation2 + $0xe5] ss:$8 sm:$0x3]  ;;  %v2830_v17 = vld [vmem:[#allocation2 + $0xc4] ss:$8 sm:$0x3] }
 0x1d3   :  { %2566 = vmatpush1.msra.mxu0 %v5238_v50  ;;  %2749 = vmatpush1.msra.mxu1 %v5257_v6  ;;  %v3011_v4 = vld [vmem:[#allocation2 + $0xa5] ss:$8 sm:$0x3]  ;;  %v2818_v57 = vld [vmem:[#allocation2 + $0x4] ss:$8 sm:$0x3]  ;;  %v2863_v0 = vcombine.low %v2830_v17, %v2832_v62 }
 0x1d4   :  { %2567 = vmatprep.subr.mxu0 %v5570_v3  ;;  %2750 = vmatprep.subr.mxu1 %v5570_v3  ;;  %v3013_v47 = vld [vmem:[#allocation2 + $0xc5] ss:$8 sm:$0x3]  ;;  %v3194_v25 = vld [vmem:[#allocation2 + $0xa6] ss:$8 sm:$0x3] }
 0x1d5   :  { %2568 = vmatpush1.msra.mxu0 %v5237_v9  ;;  %2751 = vmatpush1.msra.mxu1 %v5256_v63  ;;  %v3003_v5 = vld [vmem:[#allocation2 + $0x25] ss:$8 sm:$0x3]  ;;  %v3046_v35 = vcombine.low %v3013_v47, %v3015_v29  ;;  %v2860_v9 = vcombine.low %v2818_v57, %v2820_v40 }
 0x1d6   :  { %1978 = vrot.lane.b32.xlu1 %v1914_v30, %s5573_s10  ;;  %1976 = vrot.lane.b32.xlu0 %v1913_v49, %s5573_s10  ;;  %v2826_v49 = vld [vmem:[#allocation2 + $0x84] ss:$8 sm:$0x3]  ;;  %v3005_v6 = vld [vmem:[#allocation2 + $0x45] ss:$8 sm:$0x3] }
 0x1d7   :  { %2569 = vmatprep.subr.mxu0 %v5570_v3  ;;  %2752 = vmatprep.subr.mxu1 %v5570_v3  ;;  %v2862_v50 = vcombine.low %v2826_v49, %v2828_v2  ;;  %v3009_v7 = vld [vmem:[#allocation2 + $0x85] ss:$8 sm:$0x3]  ;;  %v3044_v63 = vcombine.low %v3005_v6, %v3007_v21  ;;  %v6730_v38 = vrot.slane %v3046_v35, %v6507_v60  ;;  %v5276_v21 = vld [vmem:[%s7946_s3 + $0x2b0] sm:$0xff] }
 0x1d8   :  { %2570 = vmatpush1.msra.mxu0 %v5236_v41  ;;  %2753 = vmatpush1.msra.mxu1 %v5255_v11  ;;  %v5245_v41 = vld [vmem:[%s7946_s3 + $0x1c0] sm:$0xff]  ;;  %v6724_v11 = vrot.slane %v2863_v0, %v6507_v60  ;;  %v5241_v44 = vld [vmem:[%s7946_s3 + $0x1a8] sm:$0xff]  ;;  %v5272_v0 = vld [vmem:[%s7946_s3 + $0x290] sm:$0xff] }
 0x1d9   :  { %2571 = vmatprep.subr.mxu0 %v5570_v3  ;;  %2754 = vmatprep.subr.mxu1 %v5570_v3  ;;  %v3001_v12 = vld [vmem:[#allocation2 + $0x5] ss:$8 sm:$0x3]  ;;  %v6745_v31 = vrot.slane %v2862_v50, %v6507_v60  ;;  %v5289_v35 = vld [vmem:[%s7946_s3 + $0x310] sm:$0xff]  ;;  %v5269_v50 = vld [vmem:[%s7946_s3 + $0x278] sm:$0xff] }
 0x1da   :  { %2572 = vmatpush1.msra.mxu0 %v5235_v15  ;;  %2755 = vmatpush1.msra.mxu1 %v5254_v16  ;;  %v6727_v15 = vrot.slane %v2861_v23, %v6507_v60  ;;  %v3043_v16 = vcombine.low %v3001_v12, %v3003_v5  ;;  %v5296_v53 = vld [vmem:[%s7946_s3 + $0x348] sm:$0xff]  ;;  %v5295_v29 = vld [vmem:[%s7946_s3 + $0x340] sm:$0xff]  ;;  %v5290_v23 = vld [vmem:[%s7946_s3 + $0x318] sm:$0xff] }
 0x1db   :  { %2000 = vrot.lane.b32.xlu1 %v1915_v54, %s5575_s24  ;;  %1998 = vrot.lane.b32.xlu0 %v1914_v30, %s5575_s24  ;;  %v3045_v30 = vcombine.low %v3009_v7, %v3011_v4  ;;  %v5275_v17 = vld [vmem:[%s7946_s3 + $0x2a8] sm:$0xff]  ;;  %v5294_v4 = vld [vmem:[%s7946_s3 + $0x338] sm:$0xff] }
 0x1dc   :  { %2573 = vmatprep.subr.mxu0 %v5570_v3  ;;  %2756 = vmatprep.subr.mxu1 %v5570_v3  ;;  %v5292_v57 = vld [vmem:[%s7946_s3 + $0x328] sm:$0xff]  ;;  %v5291_v47 = vld [vmem:[%s7946_s3 + $0x320] sm:$0xff]  ;;  %v5268_v7 = vld [vmem:[%s7946_s3 + $0x270] sm:$0xff] }
 0x1dd   :  { %2574 = vmatpush1.msra.mxu0 %v5234_v27  ;;  %2757 = vmatpush1.msra.mxu1 %v5253_v24  ;;  %v5244_v27 = vld [vmem:[%s7946_s3 + $0x1b8] sm:$0xff]  ;;  %v2528_v24 = vcombine.low %v6539_v37, %v6542_v51  ;;  %v6754_v20 = vrot.slane %v3045_v30, %v6507_v60  ;;  %v5224_v37 = vld [vmem:[%s7946_s3 + $0x120] sm:$0xff]  ;;  %v5243_v51 = vld [vmem:[%s7946_s3 + $0x1b0] sm:$0xff] }
 0x1de   :  { %2575 = vmatprep.subr.mxu0 %v5570_v3  ;;  %2758 = vmatprep.subr.mxu1 %v5570_v3  ;;  %v5271_v49 = vld [vmem:[%s7946_s3 + $0x288] sm:$0xff]  ;;  %v5270_v5 = vld [vmem:[%s7946_s3 + $0x280] sm:$0xff]  ;;  %v5286_v30 = vld [vmem:[%s7946_s3 + $0x2f8] sm:$0xff] }
 0x1df   :  { %2576 = vmatpush1.msra.mxu0 %v5233_v8  ;;  %2759 = vmatpush1.msra.mxu1 %v5252_v10  ;;  %v6748_v8 = vrot.slane %v2860_v9, %v6507_v60  ;;  %v6751_v10 = vrot.slane %v3044_v63, %v6507_v60  ;;  %v2550_v59 = vrot.slane %v2528_v24, %v6507_v60  ;;  %v5288_v6 = vld [vmem:[%s7946_s3 + $0x308] sm:$0xff]  ;;  %v5287_v9 = vld [vmem:[%s7946_s3 + $0x300] sm:$0xff] }
 0x1e0   :  { %2022 = vrot.lane.b32.xlu1 %v1916_v22, %s5576_s7  ;;  %2020 = vrot.lane.b32.xlu0 %v1915_v54, %s5576_s7  ;;  %v5225_v54 = vld [vmem:[%s7946_s3 + $0x128] sm:$0xff]  ;;  %v5266_v12 = vld [vmem:[%s7946_s3 + $0x260] sm:$0xff] }
 0x1e1   :  { %2577 = vmatprep.subr.mxu0 %v5570_v3  ;;  %2760 = vmatprep.subr.mxu1 %v5570_v3  ;;  %v2893_v39 = vcombine.high %v6748_v8, %v6727_v15  ;;  %v5267_v63 = vld [vmem:[%s7946_s3 + $0x268] sm:$0xff] }
 0x1e2   :  { %2578 = vmatpush1.msra.mxu0 %v5232_v43  ;;  %2761 = vmatpush1.msra.mxu1 %v5251_v45  ;;  %v6771_v43 = vrot.slane %v3043_v16, %v6507_v60  ;;  %v3078_v45 = vcombine.high %v6754_v20, %v6730_v38  ;;  %v5285_v16 = vld [vmem:[%s7946_s3 + $0x2f0] sm:$0xff]  ;;  %v3381_v24 = vld [vmem:[#allocation2 + $0xe7] ss:$8 sm:$0x3] }
 0x1e3   :  { %2579 = vmatprep.subr.mxu0 %v5570_v3  ;;  %2762 = vmatprep.subr.mxu1 %v5570_v3  ;;  %v2909_v62 = vrot.slane %v2893_v39, %v6507_v60 }
 0x1e4   :  { %2580 = vmatpush1.msra.mxu0 %v5231_v46  ;;  %2763 = vmatpush1.msra.mxu1 %v5250_v56  ;;  %v3076_v46 = vcombine.high %v6771_v43, %v6751_v10  ;;  %v5240_v56 = vld [vmem:[%s7946_s3 + $0x1a0] sm:$0xff] }
 0x1e5   :  { %2042 = vrot.lane.b32.xlu0 %v1916_v22, %s5577_s13  ;;  %2581 = vmatprep.subr.mxu0 %v5570_v3  ;;  %v2895_v22 = vcombine.high %v6745_v31, %v6724_v11 }
 0x1e6   :  { %2764 = vmatprep.subr.mxu1 %v5570_v3  ;;  %2044 = vrot.lane.b32.xlu1 %v1917_v13, %s5577_s13 }
 0x1e7   :  { %2582 = vmatpush1.msra.mxu0 %v5230_v58  ;;  %2765 = vmatpush1.msra.mxu1 %v5249_v42  ;;  %v2536_v58 = vrot.slane %v2526_v52, %v6507_v60  ;;  %v2719_v42 = vrot.slane %v2709_v34, %v6507_v60  ;;  %v5284_v52 = vld [vmem:[%s7946_s3 + $0x2e8] sm:$0xff] }
 0x1e8   :  { %2583 = vmatprep.subr.mxu0 %v5570_v3  ;;  %2766 = vmatprep.subr.mxu1 %v5570_v3  ;;  %v3184_v34 = vld [vmem:[#allocation2 + $0x6] ss:$8 sm:$0x3] }
 0x1e9   :  { %2584 = vmatpush1.msra.mxu0 %v5229_v61  ;;  %2767 = vmatpush1.msra.mxu1 %v5248_v14  ;;  %v2923_v61 = vrot.slane %v2895_v22, %v6507_v60  ;;  %v3106_v14 = vrot.slane %v3078_v45, %v6507_v60  ;;  %v2558_v32 = vcombine.low %v2536_v58, %v2550_v59  ;;  %v3369_v45 = vld [vmem:[#allocation2 + $0x27] ss:$8 sm:$0x3]  ;;  %v3188_v59 = vld [vmem:[#allocation2 + $0x46] ss:$8 sm:$0x3] }
 0x1ea   :  { %2585 = vmatprep.subr.mxu0 %v5570_v3  ;;  %2768 = vmatprep.subr.mxu1 %v5570_v3  ;;  %v2741_v18 = vcombine.low %v2719_v42, %v2733_v28  ;;  %v3192_v28 = vld [vmem:[#allocation2 + $0x86] ss:$8 sm:$0x3]  ;;  %v3375_v58 = vld [vmem:[#allocation2 + $0x87] ss:$8 sm:$0x3] }
 0x1eb   :  { %2064 = vrot.lane.b32.xlu0 %v1917_v13, %s5578_s23  ;;  %2066 = vrot.lane.b32.xlu1 %v1918_v36, %s5578_s23  ;;  %v5259_v13 = vld [vmem:[%s7946_s3 + $0x230] sm:$0xff]  ;;  %v2925_v40 = vcombine.low %v2909_v62, %v2923_v61  ;;  %v5274_v36 = vld [vmem:[%s7946_s3 + $0x2a0] sm:$0xff] }
 0x1ec   :  { %2586 = vmatpush1.msra.mxu0 %v5228_v1  ;;  %2769 = vmatpush1.msra.mxu1 %v5247_v26  ;;  %v5277_v1 = vld [vmem:[%s7946_s3 + $0x2b8] sm:$0xff]  ;;  %v3092_v26 = vrot.slane %v3076_v46, %v6507_v60 }
 0x1ed   :  { %2587 = vmatprep.subr.mxu0 %v5570_v3  ;;  %2770 = vmatprep.subr.mxu1 %v5570_v3 }
 0x1ee   :  { %2588 = vmatpush1.msra.mxu0 %v5227_v19  ;;  %2771 = vmatpush1.msra.mxu1 %v5246_v48  ;;  %v3108_v2 = vcombine.low %v3092_v26, %v3106_v14  ;;  %v5293_v19 = vld [vmem:[%s7946_s3 + $0x330] sm:$0xff]  ;;  %v5273_v48 = vld [vmem:[%s7946_s3 + $0x298] sm:$0xff]  ;;  %v2894_v26 = vcombine.low %v6745_v31, %v6724_v11 }
 0x1ef   :  { %2589 = vmatprep.subr.mxu0 %v5570_v3  ;;  %2772 = vmatprep.subr.mxu1 %v5570_v3 }
 0x1f0   :  { %2590 = vmatpush1.msra.mxu0 %v5226_v33  ;;  %2773 = vmatpush1.msra.mxu1 %v5245_v41  ;;  %v3190_v33 = vld [vmem:[#allocation2 + $0x66] ss:$8 sm:$0x3] }
 0x1f1   :  { %2591 = vmatprep.subr.mxu0 %v5570_v3  ;;  %2774 = vmatprep.subr.mxu1 %v5570_v3  ;;  %v3198_v41 = vld [vmem:[#allocation2 + $0xe6] ss:$8 sm:$0x3]  ;;  %v3227_v46 = vcombine.low %v3188_v59, %v3190_v33 }
 0x1f2   :  { %2592 = vmatpush1.msra.mxu0 %v5225_v54  ;;  %2775 = vmatpush1.msra.mxu1 %v5244_v27  ;;  %v3186_v54 = vld [vmem:[#allocation2 + $0x26] ss:$8 sm:$0x3]  ;;  %v3373_v27 = vld [vmem:[#allocation2 + $0x67] ss:$8 sm:$0x3] }
 0x1f3   :  { %2593 = vmatprep.subr.mxu0 %v5570_v3  ;;  %2776 = vmatprep.subr.mxu1 %v5570_v3  ;;  %v3226_v42 = vcombine.low %v3184_v34, %v3186_v54  ;;  %v6936_v11 = vrot.slane %v3227_v46, %v6507_v60  ;;  %v5334_v54 = vld [vmem:[%s7946_s3 + $0x468] sm:$0xff]  ;;  %v5331_v34 = vld [vmem:[%s7946_s3 + $0x450] sm:$0xff] }
 0x1f4   :  { %2594 = vmatpush1.msra.mxu0 %v5224_v37  ;;  %2777 = vmatpush1.msra.mxu1 %v5243_v51  ;;  %v3196_v37 = vld [vmem:[#allocation2 + $0xc6] ss:$8 sm:$0x3]  ;;  %v5265_v51 = vld [vmem:[%s7946_s3 + $0x258] sm:$0xff]  ;;  %v5327_v46 = vld [vmem:[%s7946_s3 + $0x430] sm:$0xff] }
 0x1f5   :  { %2623 = vmatprep.subr.mxu0 %v5570_v3  ;;  %2806 = vmatprep.subr.mxu1 %v5570_v3  ;;  %v3229_v22 = vcombine.low %v3196_v37, %v3198_v41  ;;  %v5315_v41 = vld [vmem:[%s7946_s3 + $0x3d8] sm:$0xff]  ;;  %v5313_v37 = vld [vmem:[%s7946_s3 + $0x3c8] sm:$0xff] }
 0x1f6   :  { %2624 = vmatpush2.msra.mxu0 %v5241_v44  ;;  %2807 = vmatpush2.msra.mxu1 %v5260_v55  ;;  %v3377_v44 = vld [vmem:[#allocation2 + $0xa7] ss:$8 sm:$0x3] }
 0x1f7   :  { %2625 = vmatprep.subr.mxu0 %v5570_v3  ;;  %2808 = vmatprep.subr.mxu1 %v5570_v3  ;;  %v3379_v55 = vld [vmem:[#allocation2 + $0xc7] ss:$8 sm:$0x3]  ;;  %v3411_v14 = vcombine.low %v3375_v58, %v3377_v44  ;;  %v6918_v62 = vrot.slane %v3229_v22, %v6507_v60  ;;  %v5311_v22 = vld [vmem:[%s7946_s3 + $0x3b8] sm:$0xff]  ;;  %v5310_v44 = vld [vmem:[%s7946_s3 + $0x3b0] sm:$0xff] }
 0x1f8   :  { %2626 = vmatpush2.msra.mxu0 %v5240_v56  ;;  %2809 = vmatpush2.msra.mxu1 %v5259_v13  ;;  %v3412_v39 = vcombine.low %v3379_v55, %v3381_v24  ;;  %v3228_v56 = vcombine.low %v3192_v28, %v3194_v25  ;;  %v3371_v13 = vld [vmem:[#allocation2 + $0x47] ss:$8 sm:$0x3]  ;;  %v5314_v24 = vld [vmem:[%s7946_s3 + $0x3d0] sm:$0xff]  ;;  %v5328_v28 = vld [vmem:[%s7946_s3 + $0x438] sm:$0xff] }
 0x1f9   :  { %2628 = vmatmul.mubr.f32.vlgmr.msra.gmra.mxu0 %v2558_v32  ;;  %2811 = vmatmul.mubr.f32.vlgmr.msra.gmra.mxu1 %v2741_v18  ;;  %v3410_v61 = vcombine.low %v3371_v13, %v3373_v27  ;;  %v5264_v32 = vld [vmem:[%s7946_s3 + $0x250] sm:$0xff]  ;;  %v5283_v18 = vld [vmem:[%s7946_s3 + $0x2e0] sm:$0xff]  ;;  %v5309_v59 = vld [vmem:[%s7946_s3 + $0x3a8] sm:$0xff] }
 0x1fa   :  { %2929 = vmatprep.subr.mxu0 %v5570_v3  ;;  %3112 = vmatprep.subr.mxu1 %v5570_v3  ;;  %v6939_v31 = vrot.slane %v3228_v56, %v6507_v60  ;;  %v5333_v25 = vld [vmem:[%s7946_s3 + $0x460] sm:$0xff]  ;;  %v5307_v56 = vld [vmem:[%s7946_s3 + $0x398] sm:$0xff]  ;;  %v5326_v13 = vld [vmem:[%s7946_s3 + $0x428] sm:$0xff] }
 0x1fb   :  { %2930 = vmatpush1.msra.mxu0 %v5277_v1  ;;  %5280 = vmatprep.mubr.msk.f32.mxu0 %vm1920_vm2, %v2925_v40  ;;  %v3367_v1 = vld [vmem:[#allocation2 + $0x7] ss:$8 sm:$0x3]  ;;  %v5306_v58 = vld [vmem:[%s7946_s3 + $0x390] sm:$0xff] }
 0x1fc   :  { %3113 = vmatpush1.msra.mxu1 %v5296_v53  ;;  %5299 = vmatprep.mubr.msk.f32.mxu1 %vm1920_vm2, %v3108_v2  ;;  %v3409_v40 = vcombine.low %v3367_v1, %v3369_v45  ;;  %v6923_v53 = vrot.slane %v3412_v39, %v6507_v60  ;;  %v5263_v2 = vld [vmem:[%s7946_s3 + $0x248] sm:$0xff]  ;;  %v5329_v55 = vld [vmem:[%s7946_s3 + $0x440] sm:$0xff]  ;;  %v5303_v1 = vld [vmem:[%s7946_s3 + $0x378] sm:$0xff] }
 0x1fd   :  { %2931 = vmatprep.subr.mxu0 %v5570_v3  ;;  %3114 = vmatprep.subr.mxu1 %v5570_v3  ;;  %v5330_v45 = vld [vmem:[%s7946_s3 + $0x448] sm:$0xff]  ;;  %v5308_v39 = vld [vmem:[%s7946_s3 + $0x3a0] sm:$0xff] }
 0x1fe   :  { %2932 = vmatpush1.msra.mxu0 %v5276_v21  ;;  %3115 = vmatpush1.msra.mxu1 %v5295_v29  ;;  %v5282_v21 = vld [vmem:[%s7946_s3 + $0x2d8] sm:$0xff]  ;;  %v3077_v29 = vcombine.low %v6754_v20, %v6730_v38  ;;  %v5262_v38 = vld [vmem:[%s7946_s3 + $0x240] sm:$0xff]  ;;  %v5281_v20 = vld [vmem:[%s7946_s3 + $0x2d0] sm:$0xff] }
 0x1ff   :  { %2933 = vmatprep.subr.mxu0 %v5570_v3  ;;  %3116 = vmatprep.subr.mxu1 %v5570_v3 }
 0x200   :  { %2934 = vmatpush1.msra.mxu0 %v5275_v17  ;;  %3117 = vmatpush1.msra.mxu1 %v5294_v4  ;;  %v6942_v17 = vrot.slane %v3226_v42, %v6507_v60  ;;  %v6945_v4 = vrot.slane %v3410_v61, %v6507_v60  ;;  %v5325_v42 = vld [vmem:[%s7946_s3 + $0x420] sm:$0xff]  ;;  %v5305_v61 = vld [vmem:[%s7946_s3 + $0x388] sm:$0xff] }
 0x201   :  { %2935 = vmatprep.subr.mxu0 %v5570_v3  ;;  %3118 = vmatprep.subr.mxu1 %v5570_v3 }
 0x202   :  { %2936 = vmatpush1.msra.mxu0 %v5274_v36  ;;  %3119 = vmatpush1.msra.mxu1 %v5293_v19  ;;  %v6948_v36 = vrot.slane %v3411_v14, %v6507_v60  ;;  %v2892_v19 = vcombine.low %v6748_v8, %v6727_v15  ;;  %v5279_v15 = vld [vmem:[%s7946_s3 + $0x2c8] sm:$0xff]  ;;  %v5298_v8 = vld [vmem:[%s7946_s3 + $0x358] sm:$0xff] }
 0x203   :  { %2937 = vmatprep.subr.mxu0 %v5570_v3  ;;  %3120 = vmatprep.subr.mxu1 %v5570_v3  ;;  %v5324_v14 = vld [vmem:[%s7946_s3 + $0x418] sm:$0xff] }
 0x204   :  { %2938 = vmatpush1.msra.mxu0 %v5273_v48  ;;  %3121 = vmatpush1.msra.mxu1 %v5292_v57  ;;  %v3075_v48 = vcombine.low %v6771_v43, %v6751_v10  ;;  %v3261_v57 = vcombine.high %v6939_v31, %v6918_v62  ;;  %v2916_v10 = vrot.slane %v2894_v26, %v6507_v60  ;;  %v5322_v26 = vld [vmem:[%s7946_s3 + $0x408] sm:$0xff] }
 0x205   :  { %2939 = vmatprep.subr.mxu0 %v5570_v3  ;;  %3122 = vmatprep.subr.mxu1 %v5570_v3  ;;  %v3099_v43 = vrot.slane %v3077_v29, %v6507_v60  ;;  %v5320_v29 = vld [vmem:[%s7946_s3 + $0x3f8] sm:$0xff] }
 0x206   :  { %2940 = vmatpush1.msra.mxu0 %v5272_v0  ;;  %3123 = vmatpush1.msra.mxu1 %v5291_v47  ;;  %v6965_v0 = vrot.slane %v3409_v40, %v6507_v60  ;;  %v3444_v47 = vcombine.high %v6948_v36, %v6923_v53  ;;  %v5302_v40 = vld [vmem:[%s7946_s3 + $0x370] sm:$0xff] }
 0x207   :  { %2941 = vmatprep.subr.mxu0 %v5570_v3  ;;  %3124 = vmatprep.subr.mxu1 %v5570_v3 }
 0x208   :  { %2942 = vmatpush1.msra.mxu0 %v5271_v49  ;;  %3125 = vmatpush1.msra.mxu1 %v5290_v23  ;;  %v3259_v49 = vcombine.high %v6942_v17, %v6936_v11  ;;  %v3442_v23 = vcombine.high %v6965_v0, %v6945_v4 }
 0x209   :  { %2943 = vmatprep.subr.mxu0 %v5570_v3  ;;  %3126 = vmatprep.subr.mxu1 %v5570_v3 }
 0x20a   :  { %2944 = vmatpush1.msra.mxu0 %v5270_v5  ;;  %3127 = vmatpush1.msra.mxu1 %v5289_v35  ;;  %v5278_v5 = vld [vmem:[%s7946_s3 + $0x2c0] sm:$0xff]  ;;  %v5297_v35 = vld [vmem:[%s7946_s3 + $0x350] sm:$0xff]  ;;  %v3275_v33 = vrot.slane %v3259_v49, %v6507_v60 }
 0x20b   :  { %2945 = vmatprep.subr.mxu0 %v5570_v3  ;;  %3128 = vmatprep.subr.mxu1 %v5570_v3 }
 0x20c   :  { %2946 = vmatpush1.msra.mxu0 %v5269_v50  ;;  %3129 = vmatpush1.msra.mxu1 %v5288_v6  ;;  %v2902_v50 = vrot.slane %v2892_v19, %v6507_v60  ;;  %v3085_v6 = vrot.slane %v3075_v48, %v6507_v60 }
 0x20d   :  { %2947 = vmatprep.subr.mxu0 %v5570_v3  ;;  %3130 = vmatprep.subr.mxu1 %v5570_v3 }
 0x20e   :  { %2948 = vmatpush1.msra.mxu0 %v5268_v7  ;;  %3131 = vmatpush1.msra.mxu1 %v5287_v9  ;;  %v3289_v7 = vrot.slane %v3261_v57, %v6507_v60  ;;  %v3472_v9 = vrot.slane %v3444_v47, %v6507_v60  ;;  %v5300_v57 = vld [vmem:[%s7946_s3 + $0x360] sm:$0xff]  ;;  %v5319_v47 = vld [vmem:[%s7946_s3 + $0x3f0] sm:$0xff] }
 0x20f   :  { %2949 = vmatprep.subr.mxu0 %v5570_v3  ;;  %3132 = vmatprep.subr.mxu1 %v5570_v3 }
 0x210   :  { %2950 = vmatpush1.msra.mxu0 %v5267_v63  ;;  %3133 = vmatpush1.msra.mxu1 %v5286_v30  ;;  %v2924_v63 = vcombine.low %v2902_v50, %v2916_v10  ;;  %v3107_v30 = vcombine.low %v3085_v6, %v3099_v43  ;;  %v5353_v50 = vld [vmem:[%s7946_s3 + $0x4f8] sm:$0xff]  ;;  %v5372_v6 = vld [vmem:[%s7946_s3 + $0x588] sm:$0xff] }
 0x211   :  { %2951 = vmatprep.subr.mxu0 %v5570_v3  ;;  %3134 = vmatprep.subr.mxu1 %v5570_v3 }
 0x212   :  { %2952 = vmatpush1.msra.mxu0 %v5266_v12  ;;  %3135 = vmatpush1.msra.mxu1 %v5285_v16  ;;  %v3458_v12 = vrot.slane %v3442_v23, %v6507_v60  ;;  %v3291_v16 = vcombine.low %v3275_v33, %v3289_v7  ;;  %v5352_v7 = vld [vmem:[%s7946_s3 + $0x4f0] sm:$0xff]  ;;  %v5351_v33 = vld [vmem:[%s7946_s3 + $0x4e8] sm:$0xff] }
 0x213   :  { %2953 = vmatprep.subr.mxu0 %v5570_v3  ;;  %3136 = vmatprep.subr.mxu1 %v5570_v3 }
 0x214   :  { %2954 = vmatpush1.msra.mxu0 %v5265_v51  ;;  %3137 = vmatpush1.msra.mxu1 %v5284_v52  ;;  %v3474_v27 = vcombine.low %v3458_v12, %v3472_v9  ;;  %v5332_v51 = vld [vmem:[%s7946_s3 + $0x458] sm:$0xff]  ;;  %v5312_v52 = vld [vmem:[%s7946_s3 + $0x3c0] sm:$0xff] }
 0x215   :  { %2955 = vmatprep.subr.mxu0 %v5570_v3  ;;  %3138 = vmatprep.subr.mxu1 %v5570_v3  ;;  %v5371_v9 = vld [vmem:[%s7946_s3 + $0x580] sm:$0xff] }
 0x216   :  { %2956 = vmatpush1.msra.mxu0 %v5264_v32  ;;  %3139 = vmatpush1.msra.mxu1 %v5283_v18  ;;  %v5304_v32 = vld [vmem:[%s7946_s3 + $0x380] sm:$0xff]  ;;  %v5323_v18 = vld [vmem:[%s7946_s3 + $0x410] sm:$0xff] }
 0x217   :  { %2957 = vmatprep.subr.mxu0 %v5570_v3  ;;  %3140 = vmatprep.subr.mxu1 %v5570_v3 }
 0x218   :  { %2958 = vmatpush1.msra.mxu0 %v5263_v2  ;;  %3141 = vmatpush1.msra.mxu1 %v5282_v21  ;;  %v5321_v2 = vld [vmem:[%s7946_s3 + $0x400] sm:$0xff]  ;;  %v5301_v21 = vld [vmem:[%s7946_s3 + $0x368] sm:$0xff] }
 0x219   :  { %2959 = vmatprep.subr.mxu0 %v5570_v3  ;;  %3142 = vmatprep.subr.mxu1 %v5570_v3 }
 0x21a   :  { %2960 = vmatpush1.msra.mxu0 %v5262_v38  ;;  %3143 = vmatpush1.msra.mxu1 %v5281_v20  ;;  %v3260_v38 = vcombine.low %v6939_v31, %v6918_v62  ;;  %v3443_v20 = vcombine.low %v6948_v36, %v6923_v53  ;;  %v3258_v62 = vcombine.low %v6942_v17, %v6936_v11  ;;  %v5317_v36 = vld [vmem:[%s7946_s3 + $0x3e8] sm:$0xff]  ;;  %v5336_v11 = vld [vmem:[%s7946_s3 + $0x478] sm:$0xff] }
 0x21b   :  { %2989 = vmatprep.subr.mxu0 %v5570_v3  ;;  %3172 = vmatprep.subr.mxu1 %v5570_v3  ;;  %v3441_v53 = vcombine.low %v6965_v0, %v6945_v4  ;;  %v5316_v0 = vld [vmem:[%s7946_s3 + $0x3e0] sm:$0xff] }
 0x21c   :  { %2990 = vmatpush2.msra.mxu0 %v5279_v15  ;;  %3173 = vmatpush2.msra.mxu1 %v5298_v8  ;;  %v3282_v17 = vrot.slane %v3260_v38, %v6507_v60  ;;  %v3465_v4 = vrot.slane %v3443_v20, %v6507_v60  ;;  %v5335_v15 = vld [vmem:[%s7946_s3 + $0x470] sm:$0xff]  ;;  %v3268_v8 = vrot.slane %v3258_v62, %v6507_v60 }
 0x21d   :  { %2991 = vmatprep.subr.mxu0 %v5570_v3  ;;  %3174 = vmatprep.subr.mxu1 %v5570_v3  ;;  %v3451_v10 = vrot.slane %v3441_v53, %v6507_v60  ;;  %v3550_v38 = vld [vmem:[#allocation2 + $0x10] ss:$8 sm:$0x3] }
 0x21e   :  { %2992 = vmatpush2.msra.mxu0 %v5278_v5  ;;  %3175 = vmatpush2.msra.mxu1 %v5297_v35  ;;  %v3290_v23 = vcombine.low %v3268_v8, %v3282_v17 }
 0x21f   :  { %2994 = vmatmul.mubr.f32.vlgmr.msra.gmra.mxu0 %v2924_v63  ;;  %3177 = vmatmul.mubr.f32.vlgmr.msra.gmra.mxu1 %v3107_v30  ;;  %v3473_v5 = vcombine.low %v3451_v10, %v3465_v4 }
 0x220   :  { %3295 = vmatprep.subr.mxu0 %v5570_v3  ;;  %3478 = vmatprep.subr.mxu1 %v5570_v3 }
 0x221   :  { %3296 = vmatpush1.msra.mxu0 %v5315_v41  ;;  %5318 = vmatprep.mubr.msk.f32.mxu0 %vm1920_vm2, %v3291_v16  ;;  %v5370_v41 = vld [vmem:[%s7946_s3 + $0x578] sm:$0xff]  ;;  %v5350_v16 = vld [vmem:[%s7946_s3 + $0x4e0] sm:$0xff] }
 0x222   :  { %3479 = vmatpush1.msra.mxu1 %v5334_v54  ;;  %5337 = vmatprep.mubr.msk.f32.mxu1 %vm1920_vm2, %v3474_v27  ;;  %v5369_v54 = vld [vmem:[%s7946_s3 + $0x570] sm:$0xff]  ;;  %v5349_v27 = vld [vmem:[%s7946_s3 + $0x4d8] sm:$0xff] }
 0x223   :  { %3297 = vmatprep.subr.mxu0 %v5570_v3  ;;  %3480 = vmatprep.subr.mxu1 %v5570_v3 }
 0x224   :  { %3298 = vmatpush1.msra.mxu0 %v5314_v24  ;;  %3481 = vmatpush1.msra.mxu1 %v5333_v25  ;;  %v5368_v24 = vld [vmem:[%s7946_s3 + $0x568] sm:$0xff] }
 0x225   :  { %3299 = vmatprep.subr.mxu0 %v5570_v3  ;;  %3482 = vmatprep.subr.mxu1 %v5570_v3 }
 0x226   :  { %3300 = vmatpush1.msra.mxu0 %v5313_v37  ;;  %3483 = vmatpush1.msra.mxu1 %v5332_v51 }
 0x227   :  { %3301 = vmatprep.subr.mxu0 %v5570_v3  ;;  %3484 = vmatprep.subr.mxu1 %v5570_v3 }
 0x228   :  { %3302 = vmatpush1.msra.mxu0 %v5312_v52  ;;  %3485 = vmatpush1.msra.mxu1 %v5331_v34  ;;  %v5348_v52 = vld [vmem:[%s7946_s3 + $0x4d0] sm:$0xff]  ;;  %v5367_v34 = vld [vmem:[%s7946_s3 + $0x560] sm:$0xff] }
 0x229   :  { %3303 = vmatprep.subr.mxu0 %v5570_v3  ;;  %3486 = vmatprep.subr.mxu1 %v5570_v3 }
 0x22a   :  { %3304 = vmatpush1.msra.mxu0 %v5311_v22  ;;  %3487 = vmatpush1.msra.mxu1 %v5330_v45  ;;  %v5347_v22 = vld [vmem:[%s7946_s3 + $0x4c8] sm:$0xff]  ;;  %v5366_v45 = vld [vmem:[%s7946_s3 + $0x558] sm:$0xff] }
 0x22b   :  { %3305 = vmatprep.subr.mxu0 %v5570_v3  ;;  %3488 = vmatprep.subr.mxu1 %v5570_v3 }
 0x22c   :  { %3306 = vmatpush1.msra.mxu0 %v5310_v44  ;;  %3489 = vmatpush1.msra.mxu1 %v5329_v55 }
 0x22d   :  { %3307 = vmatprep.subr.mxu0 %v5570_v3  ;;  %3490 = vmatprep.subr.mxu1 %v5570_v3 }
 0x22e   :  { %3308 = vmatpush1.msra.mxu0 %v5309_v59  ;;  %3491 = vmatpush1.msra.mxu1 %v5328_v28  ;;  %v5346_v59 = vld [vmem:[%s7946_s3 + $0x4c0] sm:$0xff]  ;;  %v5365_v28 = vld [vmem:[%s7946_s3 + $0x550] sm:$0xff] }
 0x22f   :  { %3309 = vmatprep.subr.mxu0 %v5570_v3  ;;  %3492 = vmatprep.subr.mxu1 %v5570_v3 }
 0x230   :  { %3310 = vmatpush1.msra.mxu0 %v5308_v39  ;;  %3493 = vmatpush1.msra.mxu1 %v5327_v46  ;;  %v5345_v46 = vld [vmem:[%s7946_s3 + $0x4b8] sm:$0xff] }
 0x231   :  { %3311 = vmatprep.subr.mxu0 %v5570_v3  ;;  %3494 = vmatprep.subr.mxu1 %v5570_v3 }
 0x232   :  { %3312 = vmatpush1.msra.mxu0 %v5307_v56  ;;  %3495 = vmatpush1.msra.mxu1 %v5326_v13  ;;  %v5364_v56 = vld [vmem:[%s7946_s3 + $0x548] sm:$0xff]  ;;  %v5344_v13 = vld [vmem:[%s7946_s3 + $0x4b0] sm:$0xff] }
 0x233   :  { %3313 = vmatprep.subr.mxu0 %v5570_v3  ;;  %3496 = vmatprep.subr.mxu1 %v5570_v3 }
 0x234   :  { %3314 = vmatpush1.msra.mxu0 %v5306_v58  ;;  %3497 = vmatpush1.msra.mxu1 %v5325_v42  ;;  %v5363_v58 = vld [vmem:[%s7946_s3 + $0x540] sm:$0xff]  ;;  %v5343_v42 = vld [vmem:[%s7946_s3 + $0x4a8] sm:$0xff] }
 0x235   :  { %3315 = vmatprep.subr.mxu0 %v5570_v3  ;;  %3498 = vmatprep.subr.mxu1 %v5570_v3 }
 0x236   :  { %3316 = vmatpush1.msra.mxu0 %v5305_v61  ;;  %3499 = vmatpush1.msra.mxu1 %v5324_v14  ;;  %v5362_v61 = vld [vmem:[%s7946_s3 + $0x538] sm:$0xff] }
 0x237   :  { %3317 = vmatprep.subr.mxu0 %v5570_v3  ;;  %3500 = vmatprep.subr.mxu1 %v5570_v3 }
 0x238   :  { %3318 = vmatpush1.msra.mxu0 %v5304_v32  ;;  %3501 = vmatpush1.msra.mxu1 %v5323_v18 }
 0x239   :  { %3319 = vmatprep.subr.mxu0 %v5570_v3  ;;  %3502 = vmatprep.subr.mxu1 %v5570_v3 }
 0x23a   :  { %3320 = vmatpush1.msra.mxu0 %v5303_v1  ;;  %3503 = vmatpush1.msra.mxu1 %v5322_v26  ;;  %v5342_v26 = vld [vmem:[%s7946_s3 + $0x4a0] sm:$0xff] }
 0x23b   :  { %3321 = vmatprep.subr.mxu0 %v5570_v3  ;;  %3504 = vmatprep.subr.mxu1 %v5570_v3 }
 0x23c   :  { %3322 = vmatpush1.msra.mxu0 %v5302_v40  ;;  %3505 = vmatpush1.msra.mxu1 %v5321_v2  ;;  %v1935_v19 = vpop.permute.xlu1 %1934  ;;  %v1933_v48 = vpop.permute.xlu0 %1932  ;;  %v5361_v40 = vld [vmem:[%s7946_s3 + $0x530] sm:$0xff] }
 0x23d   :  { %3323 = vmatprep.subr.mxu0 %v5570_v3  ;;  %3506 = vmatprep.subr.mxu1 %v5570_v3  ;;  %1947 = vst.msk [vmem:[#allocation2 + $0x38] sm:$0xff] %vm1920_vm2, %v1935_v19  ;;  %v1938_v31 = vsel %vm1936_vm3, %v1933_v48, %v1935_v19  ;;  %v3733_v19 = vld [vmem:[#allocation2 + $0x11] ss:$8 sm:$0x3] }
 0x23e   :  { %3324 = vmatpush1.msra.mxu0 %v5301_v21  ;;  %3507 = vmatpush1.msra.mxu1 %v5320_v29  ;;  %1946 = vst [vmem:[#allocation2 + $0x30] sm:$0xff] %v1938_v31 }
 0x23f   :  { %3325 = vmatprep.subr.mxu0 %v5570_v3  ;;  %3508 = vmatprep.subr.mxu1 %v5570_v3 }
 0x240   :  { %3326 = vmatpush1.msra.mxu0 %v5300_v57  ;;  %3509 = vmatpush1.msra.mxu1 %v5319_v47  ;;  %v5341_v57 = vld [vmem:[%s7946_s3 + $0x498] sm:$0xff]  ;;  %v5360_v47 = vld [vmem:[%s7946_s3 + $0x528] sm:$0xff] }
 0x241   :  { %3355 = vmatprep.subr.mxu0 %v5570_v3  ;;  %3538 = vmatprep.subr.mxu1 %v5570_v3 }
 0x242   :  { %3356 = vmatpush2.msra.mxu0 %v5317_v36  ;;  %3539 = vmatpush2.msra.mxu1 %v5336_v11  ;;  %v1957_v43 = vpop.permute.xlu1 %1956  ;;  %v1955_v49 = vpop.permute.xlu0 %1954 }
 0x243   :  { %3357 = vmatprep.subr.mxu0 %v5570_v3  ;;  %3540 = vmatprep.subr.mxu1 %v5570_v3  ;;  %1969 = vst.msk [vmem:[#allocation2 + $0x58] sm:$0xff] %vm1920_vm2, %v1957_v43  ;;  %v1960_v35 = vsel %vm1958_vm4, %v1955_v49, %v1957_v43  ;;  %v3916_v49 = vld [vmem:[#allocation2 + $0x12] ss:$8 sm:$0x3] }
 0x244   :  { %3358 = vmatpush2.msra.mxu0 %v5316_v0  ;;  %3541 = vmatpush2.msra.mxu1 %v5335_v15  ;;  %1968 = vst [vmem:[#allocation2 + $0x50] sm:$0xff] %v1960_v35 }
 0x245   :  { %3360 = vmatmul.mubr.f32.vlgmr.msra.gmra.mxu0 %v3290_v23  ;;  %3543 = vmatmul.mubr.f32.vlgmr.msra.gmra.mxu1 %v3473_v5  ;;  %v3552_v2 = vld [vmem:[#allocation2 + $0x30] ss:$8 sm:$0x3]  ;;  %v3735_v21 = vld [vmem:[#allocation2 + $0x31] ss:$8 sm:$0x3] }
 0x246   :  { %3661 = vmatprep.subr.mxu0 %v5570_v3  ;;  %3844 = vmatprep.subr.mxu1 %v5570_v3  ;;  %v3918_v11 = vld [vmem:[#allocation2 + $0x32] ss:$8 sm:$0x3]  ;;  %v4101_v17 = vld [vmem:[#allocation2 + $0x33] ss:$8 sm:$0x3]  ;;  %v3592_v4 = vcombine.low %v3550_v38, %v3552_v2  ;;  %v3775_v0 = vcombine.low %v3733_v19, %v3735_v21 }
 0x247   :  { %3662 = vmatpush1.msra.mxu0 %v5353_v50  ;;  %3845 = vmatpush1.msra.mxu1 %v5372_v6  ;;  %v5340_v50 = vld [vmem:[%s7946_s3 + $0x490] sm:$0xff]  ;;  %v5359_v6 = vld [vmem:[%s7946_s3 + $0x520] sm:$0xff] }
 0x248   :  { %v1979_v63 = vpop.permute.xlu1 %1978  ;;  %v1977_v30 = vpop.permute.xlu0 %1976  ;;  %3663 = vmatprep.subr.mxu0 %v5570_v3  ;;  %3846 = vmatprep.subr.mxu1 %v5570_v3 }
 0x249   :  { %1991 = vst.msk [vmem:[#allocation2 + $0x78] sm:$0xff] %vm1920_vm2, %v1979_v63  ;;  %v1982_v12 = vsel %vm1980_vm6, %v1977_v30, %v1979_v63  ;;  %3664 = vmatpush1.msra.mxu0 %v5352_v7  ;;  %3847 = vmatpush1.msra.mxu1 %v5371_v9  ;;  %v4099_v63 = vld [vmem:[#allocation2 + $0x13] ss:$8 sm:$0x3]  ;;  %v5339_v30 = vld [vmem:[%s7946_s3 + $0x488] sm:$0xff] }
 0x24a   :  { %1990 = vst [vmem:[#allocation2 + $0x70] sm:$0xff] %v1982_v12  ;;  %3665 = vmatprep.subr.mxu0 %v5570_v3  ;;  %3848 = vmatprep.subr.mxu1 %v5570_v3  ;;  %v4141_v12 = vcombine.low %v4099_v63, %v4101_v17 }
 0x24b   :  { %3666 = vmatpush1.msra.mxu0 %v5351_v33  ;;  %3849 = vmatpush1.msra.mxu1 %v5370_v41  ;;  %v3554_v20 = vld [vmem:[#allocation2 + $0x50] ss:$8 sm:$0x3]  ;;  %v3737_v48 = vld [vmem:[#allocation2 + $0x51] ss:$8 sm:$0x3]  ;;  %v3958_v41 = vcombine.low %v3916_v49, %v3918_v11 }
 0x24c   :  { %3667 = vmatprep.subr.mxu0 %v5570_v3  ;;  %3850 = vmatprep.subr.mxu1 %v5570_v3  ;;  %v3920_v15 = vld [vmem:[#allocation2 + $0x52] ss:$8 sm:$0x3]  ;;  %v4103_v8 = vld [vmem:[#allocation2 + $0x53] ss:$8 sm:$0x3] }
 0x24d   :  { %v2001_v25 = vpop.permute.xlu1 %2000  ;;  %v1999_v37 = vpop.permute.xlu0 %1998  ;;  %3668 = vmatpush1.msra.mxu0 %v5350_v16  ;;  %3851 = vmatpush1.msra.mxu1 %v5369_v54  ;;  %v5358_v33 = vld [vmem:[%s7946_s3 + $0x518] sm:$0xff]  ;;  %v5338_v16 = vld [vmem:[%s7946_s3 + $0x480] sm:$0xff]  ;;  %v5357_v54 = vld [vmem:[%s7946_s3 + $0x510] sm:$0xff] }
 0x24e   :  { %2013 = vst.msk [vmem:[#allocation2 + $0x98] sm:$0xff] %vm1920_vm2, %v2001_v25  ;;  %v2004_v51 = vsel %vm2002_vm5, %v1999_v37, %v2001_v25  ;;  %3669 = vmatprep.subr.mxu0 %v5570_v3  ;;  %3852 = vmatprep.subr.mxu1 %v5570_v3  ;;  %v7302_v25 = vrot.slane %v3592_v4, %v6507_v60 }
 0x24f   :  { %2012 = vst [vmem:[#allocation2 + $0x90] sm:$0xff] %v2004_v51  ;;  %3670 = vmatpush1.msra.mxu0 %v5349_v27  ;;  %3853 = vmatpush1.msra.mxu1 %v5368_v24  ;;  %v7305_v37 = vrot.slane %v3775_v0, %v6507_v60 }
 0x250   :  { %3671 = vmatprep.subr.mxu0 %v5570_v3  ;;  %3854 = vmatprep.subr.mxu1 %v5570_v3 }
 0x251   :  { %3672 = vmatpush1.msra.mxu0 %v5348_v52  ;;  %3855 = vmatpush1.msra.mxu1 %v5367_v34  ;;  %v3556_v32 = vld [vmem:[#allocation2 + $0x70] ss:$8 sm:$0x3]  ;;  %v3739_v18 = vld [vmem:[#allocation2 + $0x71] ss:$8 sm:$0x3] }
 0x252   :  { %v2023_v44 = vpop.permute.xlu1 %2022  ;;  %v2021_v55 = vpop.permute.xlu0 %2020  ;;  %3673 = vmatprep.subr.mxu0 %v5570_v3  ;;  %3856 = vmatprep.subr.mxu1 %v5570_v3  ;;  %v3593_v62 = vcombine.low %v3554_v20, %v3556_v32  ;;  %v3776_v53 = vcombine.low %v3737_v48, %v3739_v18  ;;  %v3922_v31 = vld [vmem:[#allocation2 + $0x72] ss:$8 sm:$0x3]  ;;  %v4105_v36 = vld [vmem:[#allocation2 + $0x73] ss:$8 sm:$0x3] }
 0x253   :  { %2035 = vst.msk [vmem:[#allocation2 + $0xb8] sm:$0xff] %vm1920_vm2, %v2023_v44  ;;  %v2026_v39 = vsel %vm2024_vm7, %v2021_v55, %v2023_v44  ;;  %3674 = vmatpush1.msra.mxu0 %v5347_v22  ;;  %3857 = vmatpush1.msra.mxu1 %v5366_v45  ;;  %v3959_v23 = vcombine.low %v3920_v15, %v3922_v31  ;;  %v5355_v45 = vld [vmem:[%s7946_s3 + $0x508] sm:$0xff]  ;;  %v5374_v44 = vld [vmem:[%s7946_s3 + $0x598] sm:$0xff] }
 0x254   :  { %2034 = vst [vmem:[#allocation2 + $0xb0] sm:$0xff] %v2026_v39  ;;  %3675 = vmatprep.subr.mxu0 %v5570_v3  ;;  %3858 = vmatprep.subr.mxu1 %v5570_v3  ;;  %v4142_v5 = vcombine.low %v4103_v8, %v4105_v36  ;;  %v7282_v7 = vrot.slane %v3593_v62, %v6507_v60 }
 0x255   :  { %3676 = vmatpush1.msra.mxu0 %v5346_v59  ;;  %3859 = vmatpush1.msra.mxu1 %v5365_v28  ;;  %v7285_v9 = vrot.slane %v3776_v53, %v6507_v60  ;;  %v7308_v34 = vrot.slane %v3959_v23, %v6507_v60 }
 0x256   :  { %3677 = vmatprep.subr.mxu0 %v5570_v3  ;;  %3860 = vmatprep.subr.mxu1 %v5570_v3  ;;  %v3558_v27 = vld [vmem:[#allocation2 + $0x90] ss:$8 sm:$0x3]  ;;  %v3741_v51 = vld [vmem:[#allocation2 + $0x91] ss:$8 sm:$0x3]  ;;  %v7311_v22 = vrot.slane %v4142_v5, %v6507_v60  ;;  %v3625_v55 = vcombine.high %v7302_v25, %v7282_v7 }
 0x257   :  { %v2043_v14 = vpop.permute.xlu0 %2042  ;;  %3678 = vmatpush1.msra.mxu0 %v5345_v46  ;;  %3861 = vmatpush1.msra.mxu1 %v5364_v56  ;;  %v3808_v59 = vcombine.high %v7305_v37, %v7285_v9  ;;  %v3924_v28 = vld [vmem:[#allocation2 + $0x92] ss:$8 sm:$0x3]  ;;  %v7326_v56 = vrot.slane %v3958_v41, %v6507_v60 }
 0x258   :  { %v2045_v1 = vpop.permute.xlu1 %2044  ;;  %3679 = vmatprep.subr.mxu0 %v5570_v3  ;;  %3862 = vmatprep.subr.mxu1 %v5570_v3  ;;  %v3641_v48 = vrot.slane %v3625_v55, %v6507_v60 }
 0x259   :  { %v2048_v29 = vsel %vm2046_vm8, %v2043_v14, %v2045_v1  ;;  %2057 = vst.msk [vmem:[#allocation2 + $0xd8] sm:$0xff] %vm1920_vm2, %v2045_v1  ;;  %3680 = vmatpush1.msra.mxu0 %v5344_v13  ;;  %3863 = vmatpush1.msra.mxu1 %v5363_v58  ;;  %v4107_v13 = vld [vmem:[#allocation2 + $0x93] ss:$8 sm:$0x3] }
 0x25a   :  { %2056 = vst [vmem:[#allocation2 + $0xd0] sm:$0xff] %v2048_v29  ;;  %3681 = vmatprep.subr.mxu0 %v5570_v3  ;;  %3864 = vmatprep.subr.mxu1 %v5570_v3  ;;  %v5373_v14 = vld [vmem:[%s7946_s3 + $0x590] sm:$0xff]  ;;  %v3991_v29 = vcombine.high %v7326_v56, %v7308_v34 }
 0x25b   :  { %3682 = vmatpush1.msra.mxu0 %v5343_v42  ;;  %3865 = vmatpush1.msra.mxu1 %v5362_v61  ;;  %v3560_v24 = vld [vmem:[#allocation2 + $0xb0] ss:$8 sm:$0x3]  ;;  %v3743_v52 = vld [vmem:[#allocation2 + $0xb1] ss:$8 sm:$0x3]  ;;  %v7329_v42 = vrot.slane %v4141_v12, %v6507_v60 }
 0x25c   :  { %3683 = vmatprep.subr.mxu0 %v5570_v3  ;;  %3866 = vmatprep.subr.mxu1 %v5570_v3  ;;  %v3926_v39 = vld [vmem:[#allocation2 + $0xb2] ss:$8 sm:$0x3]  ;;  %v3594_v46 = vcombine.low %v3558_v27, %v3560_v24  ;;  %v4109_v58 = vld [vmem:[#allocation2 + $0xb3] ss:$8 sm:$0x3]  ;;  %v3777_v1 = vcombine.low %v3741_v51, %v3743_v52  ;;  %v4007_v55 = vrot.slane %v3991_v29, %v6507_v60 }
 0x25d   :  { %v2065_v10 = vpop.permute.xlu0 %2064  ;;  %v2067_v43 = vpop.permute.xlu1 %2066  ;;  %3684 = vmatpush1.msra.mxu0 %v5342_v26  ;;  %3867 = vmatpush1.msra.mxu1 %v5361_v40  ;;  %v5354_v61 = vld [vmem:[%s7946_s3 + $0x500] sm:$0xff]  ;;  %v3624_v26 = vcombine.low %v7302_v25, %v7282_v7  ;;  %v3807_v40 = vcombine.low %v7305_v37, %v7285_v9  ;;  %v3960_v21 = vcombine.low %v3924_v28, %v3926_v39 }
 0x25e   :  { %v2069_v35 = vsel %vm1920_vm2, %v2065_v10, %v2067_v43  ;;  %2078 = vst.msk [vmem:[#allocation2 + $0xf8] sm:$0xff] %vm1920_vm2, %v2067_v43  ;;  %3685 = vmatprep.subr.mxu0 %v5570_v3  ;;  %3868 = vmatprep.subr.mxu1 %v5570_v3  ;;  %v4174_v20 = vcombine.high %v7329_v42, %v7311_v22  ;;  %v5384_v29 = vld [vmem:[%s7946_s3 + $0x5e0] sm:$0xff] }
 0x25f   :  { %2077 = vst [vmem:[#allocation2 + $0xf0] sm:$0xff] %v2069_v35  ;;  %3686 = vmatpush1.msra.mxu0 %v5341_v57  ;;  %3869 = vmatpush1.msra.mxu1 %v5360_v47  ;;  %v3824_v47 = vrot.slane %v3808_v59, %v6507_v60  ;;  %v4143_v62 = vcombine.low %v4107_v13, %v4109_v58  ;;  %v5409_v13 = vld [vmem:[%s7946_s3 + $0x6a0] sm:$0xff]  ;;  %v5389_v58 = vld [vmem:[%s7946_s3 + $0x608] sm:$0xff] }
 0x260   :  { %3687 = vmatprep.subr.mxu0 %v5570_v3  ;;  %3870 = vmatprep.subr.mxu1 %v5570_v3  ;;  %v3616_v31 = vrot.slane %v3594_v46, %v6507_v60  ;;  %v3799_v4 = vrot.slane %v3777_v1, %v6507_v60  ;;  %v7358_v43 = vrot.slane %v3960_v21, %v6507_v60  ;;  %v5390_v46 = vld [vmem:[%s7946_s3 + $0x610] sm:$0xff]  ;;  %v5406_v1 = vld [vmem:[%s7946_s3 + $0x688] sm:$0xff]  ;;  %v5404_v21 = vld [vmem:[%s7946_s3 + $0x678] sm:$0xff] }
 0x261   :  { %3688 = vmatpush1.msra.mxu0 %v5340_v50  ;;  %3871 = vmatpush1.msra.mxu1 %v5359_v6  ;;  %v3562_v32 = vld [vmem:[#allocation2 + $0xd0] ss:$8 sm:$0x3]  ;;  %v3745_v18 = vld [vmem:[#allocation2 + $0xd1] ss:$8 sm:$0x3]  ;;  %v7366_v23 = vrot.slane %v4143_v62, %v6507_v60  ;;  %v3634_v9 = vrot.slane %v3624_v26, %v6507_v60  ;;  %v3817_v63 = vrot.slane %v3807_v40, %v6507_v60 }
 0x262   :  { %3689 = vmatprep.subr.mxu0 %v5570_v3  ;;  %3872 = vmatprep.subr.mxu1 %v5570_v3  ;;  %v3928_v2 = vld [vmem:[#allocation2 + $0xd2] ss:$8 sm:$0x3]  ;;  %v4111_v38 = vld [vmem:[#allocation2 + $0xd3] ss:$8 sm:$0x3]  ;;  %v4190_v59 = vrot.slane %v4174_v20, %v6507_v60 }
 0x263   :  { %3690 = vmatpush1.msra.mxu0 %v5339_v30  ;;  %3873 = vmatpush1.msra.mxu1 %v5358_v33  ;;  %v5386_v26 = vld [vmem:[%s7946_s3 + $0x5f0] sm:$0xff]  ;;  %v5405_v40 = vld [vmem:[%s7946_s3 + $0x680] sm:$0xff]  ;;  %v5383_v20 = vld [vmem:[%s7946_s3 + $0x5d8] sm:$0xff] }
 0x264   :  { %3691 = vmatprep.subr.mxu0 %v5570_v3  ;;  %3874 = vmatprep.subr.mxu1 %v5570_v3  ;;  %v5400_v62 = vld [vmem:[%s7946_s3 + $0x658] sm:$0xff] }
 0x265   :  { %3692 = vmatpush1.msra.mxu0 %v5338_v16  ;;  %3875 = vmatpush1.msra.mxu1 %v5357_v54 }
 0x266   :  { %3721 = vmatprep.subr.mxu0 %v5570_v3  ;;  %3904 = vmatprep.subr.mxu1 %v5570_v3  ;;  %v3564_v19 = vld [vmem:[#allocation2 + $0xf0] ss:$8 sm:$0x3]  ;;  %v3747_v57 = vld [vmem:[#allocation2 + $0xf1] ss:$8 sm:$0x3] }
 0x267   :  { %3722 = vmatpush2.msra.mxu0 %v5355_v45  ;;  %3905 = vmatpush2.msra.mxu1 %v5374_v44  ;;  %v3595_v53 = vcombine.low %v3562_v32, %v3564_v19  ;;  %v3778_v36 = vcombine.low %v3745_v18, %v3747_v57  ;;  %v3930_v11 = vld [vmem:[#allocation2 + $0xf2] ss:$8 sm:$0x3]  ;;  %v4113_v17 = vld [vmem:[#allocation2 + $0xf3] ss:$8 sm:$0x3] }
 0x268   :  { %3723 = vmatprep.subr.mxu0 %v5570_v3  ;;  %3906 = vmatprep.subr.mxu1 %v5570_v3  ;;  %v3961_v0 = vcombine.low %v3928_v2, %v3930_v11  ;;  %v4144_v15 = vcombine.low %v4111_v38, %v4113_v17  ;;  %v5391_v45 = vld [vmem:[%s7946_s3 + $0x618] sm:$0xff]  ;;  %v5410_v44 = vld [vmem:[%s7946_s3 + $0x6a8] sm:$0xff]  ;;  %v5407_v32 = vld [vmem:[%s7946_s3 + $0x690] sm:$0xff] }
 0x269   :  { %3724 = vmatpush2.msra.mxu0 %v5354_v61  ;;  %3907 = vmatpush2.msra.mxu1 %v5373_v14  ;;  %v3623_v8 = vrot.slane %v3595_v53, %v6507_v60  ;;  %v3806_v10 = vrot.slane %v3778_v36, %v6507_v60  ;;  %v5408_v61 = vld [vmem:[%s7946_s3 + $0x698] sm:$0xff]  ;;  %v5388_v14 = vld [vmem:[%s7946_s3 + $0x600] sm:$0xff]  ;;  %v5385_v2 = vld [vmem:[%s7946_s3 + $0x5e8] sm:$0xff] }
 0x26a   :  { %4027 = vmatprep.subr.mxu0 %v5570_v3  ;;  %4210 = vmatprep.subr.mxu1 %v5570_v3  ;;  %v7363_v49 = vrot.slane %v3961_v0, %v6507_v60  ;;  %v7369_v5 = vrot.slane %v4144_v15, %v6507_v60  ;;  %v5387_v18 = vld [vmem:[%s7946_s3 + $0x5f8] sm:$0xff]  ;;  %v5403_v38 = vld [vmem:[%s7946_s3 + $0x670] sm:$0xff]  ;;  %v5402_v19 = vld [vmem:[%s7946_s3 + $0x668] sm:$0xff] }
 0x26b   :  { %v3627_v35 = vcombine.high %v3616_v31, %v3623_v8  ;;  %v3810_v50 = vcombine.high %v3799_v4, %v3806_v10  ;;  %v3626_v6 = vcombine.low %v3616_v31, %v3623_v8  ;;  %v3809_v7 = vcombine.low %v3799_v4, %v3806_v10  ;;  %v5401_v57 = vld [vmem:[%s7946_s3 + $0x660] sm:$0xff]  ;;  %v4284_v53 = vld [vmem:[#allocation2 + $0x34] ss:$8 sm:$0x3] }
 0x26c   :  { %v3993_v30 = vcombine.high %v7358_v43, %v7363_v49  ;;  %v4176_v33 = vcombine.high %v7366_v23, %v7369_v5  ;;  %v4282_v31 = vld [vmem:[#allocation2 + $0x14] ss:$8 sm:$0x3]  ;;  %v5380_v17 = vld [vmem:[%s7946_s3 + $0x5c0] sm:$0xff] }
 0x26d   :  { %v3655_v41 = vrot.slane %v3627_v35, %v6507_v60  ;;  %v3838_v12 = vrot.slane %v3810_v50, %v6507_v60  ;;  %v3648_v16 = vrot.slane %v3626_v6, %v6507_v60  ;;  %v3831_v54 = vrot.slane %v3809_v7, %v6507_v60  ;;  %v4288_v36 = vld [vmem:[#allocation2 + $0x74] ss:$8 sm:$0x3]  ;;  %v4471_v15 = vld [vmem:[#allocation2 + $0x75] ss:$8 sm:$0x3] }
 0x26e   :  { %v4021_v27 = vrot.slane %v3993_v30, %v6507_v60  ;;  %v4204_v24 = vrot.slane %v4176_v33, %v6507_v60  ;;  %v4296_v11 = vld [vmem:[#allocation2 + $0xf4] ss:$8 sm:$0x3]  ;;  %v4479_v8 = vld [vmem:[#allocation2 + $0xf5] ss:$8 sm:$0x3]  ;;  %v4324_v7 = vcombine.low %v4282_v31, %v4284_v53 }
 0x26f   :  { %v3657_v25 = vcombine.low %v3641_v48, %v3655_v41  ;;  %v3840_v37 = vcombine.low %v3824_v47, %v3838_v12  ;;  %v3656_v51 = vcombine.low %v3634_v9, %v3648_v16  ;;  %v3839_v52 = vcombine.low %v3817_v63, %v3831_v54  ;;  %v5382_v48 = vld [vmem:[%s7946_s3 + $0x5d0] sm:$0xff]  ;;  %v5381_v47 = vld [vmem:[%s7946_s3 + $0x5c8] sm:$0xff]  ;;  %v5379_v50 = vld [vmem:[%s7946_s3 + $0x5b8] sm:$0xff] }
 0x270   :  { %v4023_v28 = vcombine.low %v4007_v55, %v4021_v27  ;;  %v4206_v39 = vcombine.low %v4190_v59, %v4204_v24  ;;  %v5399_v4 = vld [vmem:[%s7946_s3 + $0x650] sm:$0xff]  ;;  %v5398_v6 = vld [vmem:[%s7946_s3 + $0x648] sm:$0xff]  ;;  %v5203_v59 = vld [vmem:[%s7947_s4] ss:$0 sm:$0xff] }
 0x271   :  { %5356 = vmatprep.mubr.msk.f32.mxu0 %vm1920_vm2, %v3657_v25  ;;  %5375 = vmatprep.mubr.msk.f32.mxu1 %vm1920_vm2, %v3840_v37  ;;  %v4286_v0 = vld [vmem:[#allocation2 + $0x54] ss:$8 sm:$0x3]  ;;  %v4475_v63 = vld [vmem:[#allocation2 + $0xb5] ss:$8 sm:$0x3] }
 0x272   :  { %3726 = vmatmul.mubr.f32.vlgmr.msra.gmra.mxu0 %v3656_v51  ;;  %3909 = vmatmul.mubr.f32.vlgmr.msra.gmra.mxu1 %v3839_v52  ;;  %v4292_v10 = vld [vmem:[#allocation2 + $0xb4] ss:$8 sm:$0x3]  ;;  %v4477_v30 = vld [vmem:[#allocation2 + $0xd5] ss:$8 sm:$0x3]  ;;  %v4325_v41 = vcombine.low %v4286_v0, %v4288_v36 }
 0x273   :  { %4028 = vmatpush1.msra.mxu0 %v5391_v45  ;;  %4211 = vmatpush1.msra.mxu1 %v5410_v44  ;;  %v4294_v35 = vld [vmem:[#allocation2 + $0xd4] ss:$8 sm:$0x3]  ;;  %v4467_v12 = vld [vmem:[#allocation2 + $0x35] ss:$8 sm:$0x3]  ;;  %v4510_v16 = vcombine.low %v4477_v30, %v4479_v8  ;;  %v7498_v45 = vrot.slane %v4324_v7, %v6507_v60 }
 0x274   :  { %4029 = vmatprep.subr.mxu0 %v5570_v3  ;;  %5394 = vmatprep.mubr.msk.f32.mxu0 %vm1920_vm2, %v4023_v28  ;;  %v4327_v9 = vcombine.low %v4294_v35, %v4296_v11  ;;  %v4290_v33 = vld [vmem:[#allocation2 + $0x94] ss:$8 sm:$0x3]  ;;  %v4469_v27 = vld [vmem:[#allocation2 + $0x55] ss:$8 sm:$0x3]  ;;  %v7507_v28 = vrot.slane %v4325_v41, %v6507_v60 }
 0x275   :  { %4212 = vmatprep.subr.mxu1 %v5570_v3  ;;  %5413 = vmatprep.mubr.msk.f32.mxu1 %vm1920_vm2, %v4206_v39  ;;  %v4326_v54 = vcombine.low %v4290_v33, %v4292_v10  ;;  %v4473_v24 = vld [vmem:[#allocation2 + $0x95] ss:$8 sm:$0x3]  ;;  %v4508_v25 = vcombine.low %v4469_v27, %v4471_v15  ;;  %v5397_v52 = vld [vmem:[%s7946_s3 + $0x640] sm:$0xff] }
 0x276   :  { %4030 = vmatpush1.msra.mxu0 %v5390_v46  ;;  %4213 = vmatpush1.msra.mxu1 %v5409_v13  ;;  %v4509_v37 = vcombine.low %v4473_v24, %v4475_v63  ;;  %v5378_v51 = vld [vmem:[%s7946_s3 + $0x5b0] sm:$0xff]  ;;  %v7501_v44 = vrot.slane %v4327_v9, %v6507_v60  ;;  %v7510_v46 = vrot.slane %v4510_v16, %v6507_v60  ;;  %v5377_v13 = vld [vmem:[%s7946_s3 + $0x5a8] sm:$0xff]  ;;  %v5429_v8 = vld [vmem:[%s7946_s3 + $0x738] sm:$0xff] }
 0x277   :  { %4031 = vmatprep.subr.mxu0 %v5570_v3  ;;  %4214 = vmatprep.subr.mxu1 %v5570_v3  ;;  %v4465_v55 = vld [vmem:[#allocation2 + $0x15] ss:$8 sm:$0x3]  ;;  %v5447_v9 = vld [vmem:[%s7946_s3 + $0x7c0] sm:$0xff]  ;;  %v5427_v63 = vld [vmem:[%s7946_s3 + $0x728] sm:$0xff] }
 0x278   :  { %4032 = vmatpush1.msra.mxu0 %v5389_v58  ;;  %4215 = vmatpush1.msra.mxu1 %v5408_v61  ;;  %v4507_v39 = vcombine.low %v4465_v55, %v4467_v12  ;;  %v5396_v58 = vld [vmem:[%s7946_s3 + $0x638] sm:$0xff]  ;;  %v3992_v61 = vcombine.low %v7358_v43, %v7363_v49  ;;  %v5376_v43 = vld [vmem:[%s7946_s3 + $0x5a0] sm:$0xff]  ;;  %v5411_v53 = vld [vmem:[%s7946_s3 + $0x6b0] sm:$0xff] }
 0x279   :  { %4033 = vmatprep.subr.mxu0 %v5570_v3  ;;  %4216 = vmatprep.subr.mxu1 %v5570_v3  ;;  %v5428_v7 = vld [vmem:[%s7946_s3 + $0x730] sm:$0xff]  ;;  %v5446_v30 = vld [vmem:[%s7946_s3 + $0x7b8] sm:$0xff]  ;;  %v5426_v33 = vld [vmem:[%s7946_s3 + $0x720] sm:$0xff] }
 0x27a   :  { %4034 = vmatpush1.msra.mxu0 %v5388_v14  ;;  %4217 = vmatpush1.msra.mxu1 %v5407_v32  ;;  %v4175_v14 = vcombine.low %v7366_v23, %v7369_v5  ;;  %v7525_v32 = vrot.slane %v4326_v54, %v6507_v60  ;;  %v4357_v5 = vcombine.high %v7498_v45, %v7507_v28  ;;  %v5445_v41 = vld [vmem:[%s7946_s3 + $0x7b0] sm:$0xff]  ;;  %v5425_v12 = vld [vmem:[%s7946_s3 + $0x718] sm:$0xff]  ;;  %v5444_v16 = vld [vmem:[%s7946_s3 + $0x7a8] sm:$0xff] }
 0x27b   :  { %4035 = vmatprep.subr.mxu0 %v5570_v3  ;;  %4218 = vmatprep.subr.mxu1 %v5570_v3  ;;  %v5424_v54 = vld [vmem:[%s7946_s3 + $0x710] sm:$0xff]  ;;  %v5443_v27 = vld [vmem:[%s7946_s3 + $0x7a0] sm:$0xff]  ;;  %v5423_v24 = vld [vmem:[%s7946_s3 + $0x708] sm:$0xff] }
 0x27c   :  { %4036 = vmatpush1.msra.mxu0 %v5387_v18  ;;  %4219 = vmatpush1.msra.mxu1 %v5406_v1  ;;  %v3990_v18 = vcombine.low %v7326_v56, %v7308_v34  ;;  %v5395_v34 = vld [vmem:[%s7946_s3 + $0x630] sm:$0xff]  ;;  %v4173_v56 = vcombine.low %v7329_v42, %v7311_v22  ;;  %v4359_v23 = vcombine.high %v7525_v32, %v7501_v44  ;;  %v5393_v22 = vld [vmem:[%s7946_s3 + $0x628] sm:$0xff]  ;;  %v5412_v42 = vld [vmem:[%s7946_s3 + $0x6b8] sm:$0xff] }
 0x27d   :  { %4037 = vmatprep.subr.mxu0 %v5570_v3  ;;  %4220 = vmatprep.subr.mxu1 %v5570_v3  ;;  %v4373_v15 = vrot.slane %v4357_v5, %v6507_v60  ;;  %v5440_v55 = vld [vmem:[%s7946_s3 + $0x788] sm:$0xff]  ;;  %v5417_v5 = vld [vmem:[%s7946_s3 + $0x6d8] sm:$0xff] }
 0x27e   :  { %4038 = vmatpush1.msra.mxu0 %v5386_v26  ;;  %4221 = vmatpush1.msra.mxu1 %v5405_v40  ;;  %v7530_v40 = vrot.slane %v4508_v25, %v6507_v60  ;;  %v4000_v31 = vrot.slane %v3990_v18, %v6507_v60  ;;  %v4183_v36 = vrot.slane %v4173_v56, %v6507_v60  ;;  %v5442_v25 = vld [vmem:[%s7946_s3 + $0x798] sm:$0xff]  ;;  %v5418_v18 = vld [vmem:[%s7946_s3 + $0x6e0] sm:$0xff] }
 0x27f   :  { %4039 = vmatprep.subr.mxu0 %v5570_v3  ;;  %4222 = vmatprep.subr.mxu1 %v5570_v3  ;;  %v4387_v11 = vrot.slane %v4359_v23, %v6507_v60  ;;  %v4845_v56 = vld [vmem:[#allocation2 + $0xf7] ss:$8 sm:$0x3]  ;;  %v4660_v23 = vld [vmem:[#allocation2 + $0xd6] ss:$8 sm:$0x3] }
 0x280   :  { %4040 = vmatpush1.msra.mxu0 %v5385_v2  ;;  %4223 = vmatpush1.msra.mxu1 %v5404_v21  ;;  %v7533_v2 = vrot.slane %v4509_v37, %v6507_v60  ;;  %v7550_v21 = vrot.slane %v4507_v39, %v6507_v60  ;;  %v5422_v37 = vld [vmem:[%s7946_s3 + $0x700] sm:$0xff] }
 0x281   :  { %4041 = vmatprep.subr.mxu0 %v5570_v3  ;;  %4224 = vmatprep.subr.mxu1 %v5570_v3  ;;  %v4389_v35 = vcombine.low %v4373_v15, %v4387_v11  ;;  %v5439_v39 = vld [vmem:[%s7946_s3 + $0x780] sm:$0xff] }
 0x282   :  { %4042 = vmatpush1.msra.mxu0 %v5384_v29  ;;  %4225 = vmatpush1.msra.mxu1 %v5403_v38  ;;  %v4542_v29 = vcombine.high %v7533_v2, %v7510_v46  ;;  %v5435_v15 = vld [vmem:[%s7946_s3 + $0x760] sm:$0xff] }
 0x283   :  { %4043 = vmatprep.subr.mxu0 %v5570_v3  ;;  %4226 = vmatprep.subr.mxu1 %v5570_v3 }
 0x284   :  { %4044 = vmatpush1.msra.mxu0 %v5383_v20  ;;  %4227 = vmatpush1.msra.mxu1 %v5402_v19  ;;  %v4014_v19 = vrot.slane %v3992_v61, %v6507_v60  ;;  %v4654_v61 = vld [vmem:[#allocation2 + $0x76] ss:$8 sm:$0x3] }
 0x285   :  { %4045 = vmatprep.subr.mxu0 %v5570_v3  ;;  %4228 = vmatprep.subr.mxu1 %v5570_v3 }
 0x286   :  { %4046 = vmatpush1.msra.mxu0 %v5382_v48  ;;  %4229 = vmatpush1.msra.mxu1 %v5401_v57  ;;  %v4197_v48 = vrot.slane %v4175_v14, %v6507_v60  ;;  %v4662_v14 = vld [vmem:[#allocation2 + $0xf6] ss:$8 sm:$0x3] }
 0x287   :  { %4047 = vmatprep.subr.mxu0 %v5570_v3  ;;  %4230 = vmatprep.subr.mxu1 %v5570_v3 }
 0x288   :  { %4048 = vmatpush1.msra.mxu0 %v5381_v47  ;;  %4231 = vmatpush1.msra.mxu1 %v5400_v62  ;;  %v4540_v47 = vcombine.high %v7550_v21, %v7530_v40  ;;  %v5392_v62 = vld [vmem:[%s7946_s3 + $0x620] sm:$0xff]  ;;  %v4205_v0 = vcombine.low %v4183_v36, %v4197_v48  ;;  %v4839_v36 = vld [vmem:[#allocation2 + $0x97] ss:$8 sm:$0x3] }
 0x289   :  { %4049 = vmatprep.subr.mxu0 %v5570_v3  ;;  %4232 = vmatprep.subr.mxu1 %v5570_v3 }
 0x28a   :  { %4050 = vmatpush1.msra.mxu0 %v5380_v17  ;;  %4233 = vmatpush1.msra.mxu1 %v5399_v4  ;;  %v4570_v17 = vrot.slane %v4542_v29, %v6507_v60  ;;  %v4022_v4 = vcombine.low %v4000_v31, %v4014_v19  ;;  %v4556_v10 = vrot.slane %v4540_v47, %v6507_v60  ;;  %v5436_v29 = vld [vmem:[%s7946_s3 + $0x768] sm:$0xff]  ;;  %v4656_v19 = vld [vmem:[#allocation2 + $0x96] ss:$8 sm:$0x3] }
 0x28b   :  { %4051 = vmatprep.subr.mxu0 %v5570_v3  ;;  %4234 = vmatprep.subr.mxu1 %v5570_v3  ;;  %v4833_v47 = vld [vmem:[#allocation2 + $0x37] ss:$8 sm:$0x3] }
 0x28c   :  { %4052 = vmatpush1.msra.mxu0 %v5379_v50  ;;  %4235 = vmatpush1.msra.mxu1 %v5398_v6  ;;  %v5448_v50 = vld [vmem:[%s7946_s3 + $0x7c8] sm:$0xff]  ;;  %v4572_v6 = vcombine.low %v4556_v10, %v4570_v17  ;;  %v4835_v31 = vld [vmem:[#allocation2 + $0x57] ss:$8 sm:$0x3] }
 0x28d   :  { %4053 = vmatprep.subr.mxu0 %v5570_v3  ;;  %4236 = vmatprep.subr.mxu1 %v5570_v3  ;;  %v4831_v10 = vld [vmem:[#allocation2 + $0x17] ss:$8 sm:$0x3] }
 0x28e   :  { %4054 = vmatpush1.msra.mxu0 %v5378_v51  ;;  %4237 = vmatpush1.msra.mxu1 %v5397_v52  ;;  %v2263_v1 = vpop.f32.mrf.mxu0  ;;  %v2446_v26 = vpop.f32.mrf.mxu1  ;;  %v5441_v51 = vld [vmem:[%s7946_s3 + $0x790] sm:$0xff]  ;;  %v5421_v52 = vld [vmem:[%s7946_s3 + $0x6f8] sm:$0xff] }
 0x28f   :  { %4055 = vmatprep.subr.mxu0 %v5570_v3  ;;  %4238 = vmatprep.subr.mxu1 %v5570_v3  ;;  %v2267_v49 = vadd.f32 %v5203_v59, %v2263_v1  ;;  %v5420_v59 = vld [vmem:[%s7946_s3 + $0x6f0] sm:$0xff] }
 0x290   :  { %4056 = vmatpush1.msra.mxu0 %v5377_v13  ;;  %4239 = vmatpush1.msra.mxu1 %v5396_v58  ;;  %v2265_v38 = vpop.f32.mrf.mxu0  ;;  %v2448_v20 = vpop.f32.mrf.mxu1  ;;  %v5419_v13 = vld [vmem:[%s7946_s3 + $0x6e8] sm:$0xff]  ;;  %v5438_v58 = vld [vmem:[%s7946_s3 + $0x778] sm:$0xff]  ;;  %v5437_v1 = vld [vmem:[%s7946_s3 + $0x770] sm:$0xff] }
 0x291   :  { %4057 = vmatprep.subr.mxu0 %v5570_v3  ;;  %4240 = vmatprep.subr.mxu1 %v5570_v3  ;;  %v7564_v57 = vadd.f32 %v2446_v26, %v2267_v49  ;;  %v4650_v26 = vld [vmem:[#allocation2 + $0x36] ss:$8 sm:$0x3]  ;;  %v4693_v20 = vcombine.low %v4660_v23, %v4662_v14 }
 0x292   :  { %4058 = vmatpush1.msra.mxu0 %v5376_v43  ;;  %4241 = vmatpush1.msra.mxu1 %v5395_v34  ;;  %v4652_v43 = vld [vmem:[#allocation2 + $0x56] ss:$8 sm:$0x3]  ;;  %v4837_v34 = vld [vmem:[#allocation2 + $0x77] ss:$8 sm:$0x3] }
 0x293   :  { %4087 = vmatprep.subr.mxu0 %v5570_v3  ;;  %4270 = vmatprep.subr.mxu1 %v5570_v3  ;;  %v4658_v49 = vld [vmem:[#allocation2 + $0xb6] ss:$8 sm:$0x3]  ;;  %v4691_v48 = vcombine.low %v4652_v43, %v4654_v61  ;;  %v4874_v17 = vcombine.low %v4835_v31, %v4837_v34  ;;  %v5481_v31 = vld [vmem:[%s7946_s3 + $0x8c0] sm:$0xff] }
 0x294   :  { %4088 = vmatpush2.msra.mxu0 %v5393_v22  ;;  %4271 = vmatpush2.msra.mxu1 %v5412_v42  ;;  %v4648_v38 = vld [vmem:[#allocation2 + $0x16] ss:$8 sm:$0x3]  ;;  %v4841_v22 = vld [vmem:[#allocation2 + $0xb7] ss:$8 sm:$0x3] }
 0x295   :  { %4089 = vmatprep.subr.mxu0 %v5570_v3  ;;  %4272 = vmatprep.subr.mxu1 %v5570_v3  ;;  %v4843_v42 = vld [vmem:[#allocation2 + $0xd7] ss:$8 sm:$0x3]  ;;  %v4690_v11 = vcombine.low %v4648_v38, %v4650_v26 }
 0x296   :  { %4090 = vmatpush2.msra.mxu0 %v5392_v62  ;;  %4273 = vmatpush2.msra.mxu1 %v5411_v53  ;;  %v4876_v62 = vcombine.low %v4843_v42, %v4845_v56  ;;  %v4692_v53 = vcombine.low %v4656_v19, %v4658_v49  ;;  %v5466_v38 = vld [vmem:[%s7946_s3 + $0x850] sm:$0xff]  ;;  %v5484_v42 = vld [vmem:[%s7946_s3 + $0x8d8] sm:$0xff]  ;;  %v5464_v19 = vld [vmem:[%s7946_s3 + $0x840] sm:$0xff] }
 0x297   :  { %4092 = vmatmul.mubr.f32.vlgmr.msra.gmra.mxu0 %v4022_v4  ;;  %4275 = vmatmul.mubr.f32.vlgmr.msra.gmra.mxu1 %v4205_v0  ;;  %v4875_v4 = vcombine.low %v4839_v36, %v4841_v22  ;;  %v5416_v0 = vld [vmem:[%s7946_s3 + $0x6d0] sm:$0xff]  ;;  %v5465_v22 = vld [vmem:[%s7946_s3 + $0x848] sm:$0xff] }
 0x298   :  { %4393 = vmatprep.subr.mxu0 %v5570_v3  ;;  %4576 = vmatprep.subr.mxu1 %v5570_v3  ;;  %v5461_v36 = vld [vmem:[%s7946_s3 + $0x828] sm:$0xff] }
 0x299   :  { %4394 = vmatpush1.msra.mxu0 %v5429_v8  ;;  %5432 = vmatprep.mubr.msk.f32.mxu0 %vm1920_vm2, %v4389_v35  ;;  %v7697_v8 = vrot.slane %v4693_v20, %v6507_v60  ;;  %v7700_v35 = vrot.slane %v4691_v48, %v6507_v60  ;;  %v5485_v20 = vld [vmem:[%s7946_s3 + $0x8e0] sm:$0xff]  ;;  %v5483_v48 = vld [vmem:[%s7946_s3 + $0x8d0] sm:$0xff] }
 0x29a   :  { %4577 = vmatpush1.msra.mxu1 %v5448_v50  ;;  %5451 = vmatprep.mubr.msk.f32.mxu1 %vm1920_vm2, %v4572_v6  ;;  %v4873_v50 = vcombine.low %v4831_v10, %v4833_v47  ;;  %v7703_v6 = vrot.slane %v4876_v62, %v6507_v60  ;;  %v5463_v47 = vld [vmem:[%s7946_s3 + $0x838] sm:$0xff]  ;;  %v5482_v62 = vld [vmem:[%s7946_s3 + $0x8c8] sm:$0xff]  ;;  %v5458_v10 = vld [vmem:[%s7946_s3 + $0x810] sm:$0xff] }
 0x29b   :  { %4395 = vmatprep.subr.mxu0 %v5570_v3  ;;  %4578 = vmatprep.subr.mxu1 %v5570_v3 }
 0x29c   :  { %4396 = vmatpush1.msra.mxu0 %v5428_v7  ;;  %4579 = vmatpush1.msra.mxu1 %v5447_v9  ;;  %v5415_v7 = vld [vmem:[%s7946_s3 + $0x6c8] sm:$0xff]  ;;  %v5434_v9 = vld [vmem:[%s7946_s3 + $0x758] sm:$0xff] }
 0x29d   :  { %4397 = vmatprep.subr.mxu0 %v5570_v3  ;;  %4580 = vmatprep.subr.mxu1 %v5570_v3 }
 0x29e   :  { %4398 = vmatpush1.msra.mxu0 %v5427_v63  ;;  %4581 = vmatpush1.msra.mxu1 %v5446_v30  ;;  %v4358_v63 = vcombine.low %v7525_v32, %v7501_v44  ;;  %v4541_v30 = vcombine.low %v7533_v2, %v7510_v46  ;;  %v5414_v44 = vld [vmem:[%s7946_s3 + $0x6c0] sm:$0xff]  ;;  %v5433_v46 = vld [vmem:[%s7946_s3 + $0x750] sm:$0xff]  ;;  %v4356_v32 = vcombine.low %v7498_v45, %v7507_v28  ;;  %v5431_v45 = vld [vmem:[%s7946_s3 + $0x748] sm:$0xff] }
 0x29f   :  { %4399 = vmatprep.subr.mxu0 %v5570_v3  ;;  %4582 = vmatprep.subr.mxu1 %v5570_v3  ;;  %v4539_v2 = vcombine.low %v7550_v21, %v7530_v40  ;;  %v5450_v28 = vld [vmem:[%s7946_s3 + $0x7d8] sm:$0xff] }
 0x2a0   :  { %4400 = vmatpush1.msra.mxu0 %v5426_v33  ;;  %4583 = vmatpush1.msra.mxu1 %v5445_v41  ;;  %v7718_v33 = vrot.slane %v4692_v53, %v6507_v60  ;;  %v7721_v41 = vrot.slane %v4690_v11, %v6507_v60  ;;  %v4380_v40 = vrot.slane %v4358_v63, %v6507_v60  ;;  %v5462_v53 = vld [vmem:[%s7946_s3 + $0x830] sm:$0xff]  ;;  %v5480_v11 = vld [vmem:[%s7946_s3 + $0x8b8] sm:$0xff]  ;;  %v5456_v63 = vld [vmem:[%s7946_s3 + $0x800] sm:$0xff] }
 0x2a1   :  { %4401 = vmatprep.subr.mxu0 %v5570_v3  ;;  %4584 = vmatprep.subr.mxu1 %v5570_v3  ;;  %v4563_v21 = vrot.slane %v4541_v30, %v6507_v60  ;;  %v5475_v30 = vld [vmem:[%s7946_s3 + $0x890] sm:$0xff] }
 0x2a2   :  { %4402 = vmatpush1.msra.mxu0 %v5425_v12  ;;  %4585 = vmatpush1.msra.mxu1 %v5444_v16  ;;  %v7724_v12 = vrot.slane %v4874_v17, %v6507_v60  ;;  %v7727_v16 = vrot.slane %v4875_v4, %v6507_v60  ;;  %v5460_v17 = vld [vmem:[%s7946_s3 + $0x820] sm:$0xff]  ;;  %v5479_v4 = vld [vmem:[%s7946_s3 + $0x8b0] sm:$0xff] }
 0x2a3   :  { %4403 = vmatprep.subr.mxu0 %v5570_v3  ;;  %4586 = vmatprep.subr.mxu1 %v5570_v3 }
 0x2a4   :  { %4404 = vmatpush1.msra.mxu0 %v5424_v54  ;;  %4587 = vmatpush1.msra.mxu1 %v5443_v27  ;;  %v4725_v54 = vcombine.high %v7718_v33, %v7697_v8  ;;  %v7744_v27 = vrot.slane %v4873_v50, %v6507_v60  ;;  %v5477_v50 = vld [vmem:[%s7946_s3 + $0x8a0] sm:$0xff] }
 0x2a5   :  { %4405 = vmatprep.subr.mxu0 %v5570_v3  ;;  %4588 = vmatprep.subr.mxu1 %v5570_v3 }
 0x2a6   :  { %4406 = vmatpush1.msra.mxu0 %v5423_v24  ;;  %4589 = vmatpush1.msra.mxu1 %v5442_v25  ;;  %v4908_v24 = vcombine.high %v7727_v16, %v7703_v6  ;;  %v4723_v25 = vcombine.high %v7721_v41, %v7700_v35 }
 0x2a7   :  { %4407 = vmatprep.subr.mxu0 %v5570_v3  ;;  %4590 = vmatprep.subr.mxu1 %v5570_v3 }
 0x2a8   :  { %4408 = vmatpush1.msra.mxu0 %v5422_v37  ;;  %4591 = vmatpush1.msra.mxu1 %v5441_v51  ;;  %v4906_v37 = vcombine.high %v7744_v27, %v7724_v12  ;;  %v5430_v51 = vld [vmem:[%s7946_s3 + $0x740] sm:$0xff]  ;;  %v4936_v14 = vrot.slane %v4908_v24, %v6507_v60  ;;  %v4739_v26 = vrot.slane %v4723_v25, %v6507_v60  ;;  %v5472_v24 = vld [vmem:[%s7946_s3 + $0x878] sm:$0xff] }
 0x2a9   :  { %4409 = vmatprep.subr.mxu0 %v5570_v3  ;;  %4592 = vmatprep.subr.mxu1 %v5570_v3 }
 0x2aa   :  { %4410 = vmatpush1.msra.mxu0 %v5421_v52  ;;  %4593 = vmatpush1.msra.mxu1 %v5440_v55  ;;  %v5449_v52 = vld [vmem:[%s7946_s3 + $0x7d0] sm:$0xff]  ;;  %v4922_v49 = vrot.slane %v4906_v37, %v6507_v60 }
 0x2ab   :  { %4411 = vmatprep.subr.mxu0 %v5570_v3  ;;  %4594 = vmatprep.subr.mxu1 %v5570_v3 }
 0x2ac   :  { %4412 = vmatpush1.msra.mxu0 %v5420_v59  ;;  %4595 = vmatpush1.msra.mxu1 %v5439_v39  ;;  %v4366_v39 = vrot.slane %v4356_v32, %v6507_v60  ;;  %v5454_v32 = vld [vmem:[%s7946_s3 + $0x7f0] sm:$0xff] }
 0x2ad   :  { %4413 = vmatprep.subr.mxu0 %v5570_v3  ;;  %4596 = vmatprep.subr.mxu1 %v5570_v3 }
 0x2ae   :  { %4414 = vmatpush1.msra.mxu0 %v5419_v13  ;;  %4597 = vmatpush1.msra.mxu1 %v5438_v58  ;;  %v4549_v13 = vrot.slane %v4539_v2, %v6507_v60  ;;  %v4753_v58 = vrot.slane %v4725_v54, %v6507_v60  ;;  %v5473_v2 = vld [vmem:[%s7946_s3 + $0x880] sm:$0xff]  ;;  %v5453_v54 = vld [vmem:[%s7946_s3 + $0x7e8] sm:$0xff] }
 0x2af   :  { %4415 = vmatprep.subr.mxu0 %v5570_v3  ;;  %4598 = vmatprep.subr.mxu1 %v5570_v3 }
 0x2b0   :  { %4416 = vmatpush1.msra.mxu0 %v5418_v18  ;;  %4599 = vmatpush1.msra.mxu1 %v5437_v1  ;;  %v4388_v18 = vcombine.low %v4366_v39, %v4380_v40  ;;  %v4571_v1 = vcombine.low %v4549_v13, %v4563_v21  ;;  %v4755_v23 = vcombine.low %v4739_v26, %v4753_v58  ;;  %v5452_v40 = vld [vmem:[%s7946_s3 + $0x7e0] sm:$0xff]  ;;  %v5471_v21 = vld [vmem:[%s7946_s3 + $0x870] sm:$0xff] }
 0x2b1   :  { %4417 = vmatprep.subr.mxu0 %v5570_v3  ;;  %4600 = vmatprep.subr.mxu1 %v5570_v3 }
 0x2b2   :  { %4418 = vmatpush1.msra.mxu0 %v5417_v5  ;;  %4601 = vmatpush1.msra.mxu1 %v5436_v29  ;;  %v5486_v5 = vld [vmem:[%s7946_s3 + $0x8e8] sm:$0xff]  ;;  %v4938_v29 = vcombine.low %v4922_v49, %v4936_v14 }
 0x2b3   :  { %4419 = vmatprep.subr.mxu0 %v5570_v3  ;;  %4602 = vmatprep.subr.mxu1 %v5570_v3 }
 0x2b4   :  { %4420 = vmatpush1.msra.mxu0 %v5416_v0  ;;  %4603 = vmatpush1.msra.mxu1 %v5435_v15  ;;  %v5459_v0 = vld [vmem:[%s7946_s3 + $0x818] sm:$0xff]  ;;  %v5478_v15 = vld [vmem:[%s7946_s3 + $0x8a8] sm:$0xff] }
 0x2b5   :  { %4421 = vmatprep.subr.mxu0 %v5570_v3  ;;  %4604 = vmatprep.subr.mxu1 %v5570_v3 }
 0x2b6   :  { %4422 = vmatpush1.msra.mxu0 %v5415_v7  ;;  %4605 = vmatpush1.msra.mxu1 %v5434_v9  ;;  %v5457_v7 = vld [vmem:[%s7946_s3 + $0x808] sm:$0xff]  ;;  %v5476_v9 = vld [vmem:[%s7946_s3 + $0x898] sm:$0xff] }
 0x2b7   :  { %4423 = vmatprep.subr.mxu0 %v5570_v3  ;;  %4606 = vmatprep.subr.mxu1 %v5570_v3 }
 0x2b8   :  { %4424 = vmatpush1.msra.mxu0 %v5414_v44  ;;  %4607 = vmatpush1.msra.mxu1 %v5433_v46  ;;  %v5455_v44 = vld [vmem:[%s7946_s3 + $0x7f8] sm:$0xff]  ;;  %v5474_v46 = vld [vmem:[%s7946_s3 + $0x888] sm:$0xff] }
 0x2b9   :  { %4453 = vmatprep.subr.mxu0 %v5570_v3  ;;  %4636 = vmatprep.subr.mxu1 %v5570_v3  ;;  %v2629_v55 = vpop.f32.mrf.mxu0  ;;  %v2812_v59 = vpop.f32.mrf.mxu1 }
 0x2ba   :  { %4454 = vmatpush2.msra.mxu0 %v5431_v45  ;;  %4637 = vmatpush2.msra.mxu1 %v5450_v28  ;;  %v2633_v61 = vadd.f32 %v2629_v55, %v7564_v57  ;;  %v5467_v57 = vld [vmem:[%s7946_s3 + $0x858] sm:$0xff]  ;;  %v4724_v45 = vcombine.low %v7718_v33, %v7697_v8  ;;  %v4907_v28 = vcombine.low %v7727_v16, %v7703_v6  ;;  %v5469_v33 = vld [vmem:[%s7946_s3 + $0x868] sm:$0xff] }
 0x2bb   :  { %4455 = vmatprep.subr.mxu0 %v5570_v3  ;;  %4638 = vmatprep.subr.mxu1 %v5570_v3  ;;  %v2631_v43 = vpop.f32.mrf.mxu0  ;;  %v2814_v34 = vpop.f32.mrf.mxu1  ;;  %v4722_v8 = vcombine.low %v7721_v41, %v7700_v35  ;;  %v4905_v6 = vcombine.low %v7744_v27, %v7724_v12  ;;  %v5488_v16 = vld [vmem:[%s7946_s3 + $0x8f8] sm:$0xff]  ;;  %v5468_v41 = vld [vmem:[%s7946_s3 + $0x860] sm:$0xff]  ;;  %v5487_v12 = vld [vmem:[%s7946_s3 + $0x8f0] sm:$0xff] }
 0x2bc   :  { %4456 = vmatpush2.msra.mxu0 %v5430_v51  ;;  %4639 = vmatpush2.msra.mxu1 %v5449_v52  ;;  %v7778_v56 = vadd.f32 %v2812_v59, %v2633_v61  ;;  %v4746_v25 = vrot.slane %v4724_v45, %v6507_v60  ;;  %v4929_v35 = vrot.slane %v4907_v28, %v6507_v60 }
 0x2bd   :  { %4458 = vmatmul.mubr.f32.vlgmr.msra.gmra.mxu0 %v4388_v18  ;;  %4641 = vmatmul.mubr.f32.vlgmr.msra.gmra.mxu1 %v4571_v1  ;;  %v4732_v51 = vrot.slane %v4722_v8, %v6507_v60  ;;  %v4915_v52 = vrot.slane %v4905_v6, %v6507_v60 }
 0x2be   :  { %4759 = vmatprep.subr.mxu0 %v5570_v3  ;;  %4942 = vmatprep.subr.mxu1 %v5570_v3 }
 0x2bf   :  { %4760 = vmatpush1.msra.mxu0 %v5467_v57  ;;  %5470 = vmatprep.mubr.msk.f32.mxu0 %vm1920_vm2, %v4755_v23  ;;  %v4754_v59 = vcombine.low %v4732_v51, %v4746_v25  ;;  %v4937_v39 = vcombine.low %v4915_v52, %v4929_v35 }
 0x2c0   :  { %4943 = vmatpush1.msra.mxu1 %v5486_v5  ;;  %5489 = vmatprep.mubr.msk.f32.mxu1 %vm1920_vm2, %v4938_v29 }
 0x2c1   :  { %4761 = vmatprep.subr.mxu0 %v5570_v3  ;;  %4944 = vmatprep.subr.mxu1 %v5570_v3 }
 0x2c2   :  { %4762 = vmatpush1.msra.mxu0 %v5466_v38  ;;  %4945 = vmatpush1.msra.mxu1 %v5485_v20 }
 0x2c3   :  { %4763 = vmatprep.subr.mxu0 %v5570_v3  ;;  %4946 = vmatprep.subr.mxu1 %v5570_v3 }
 0x2c4   :  { %4764 = vmatpush1.msra.mxu0 %v5465_v22  ;;  %4947 = vmatpush1.msra.mxu1 %v5484_v42 }
 0x2c5   :  { %4765 = vmatprep.subr.mxu0 %v5570_v3  ;;  %4948 = vmatprep.subr.mxu1 %v5570_v3 }
 0x2c6   :  { %4766 = vmatpush1.msra.mxu0 %v5464_v19  ;;  %4949 = vmatpush1.msra.mxu1 %v5483_v48 }
 0x2c7   :  { %4767 = vmatprep.subr.mxu0 %v5570_v3  ;;  %4950 = vmatprep.subr.mxu1 %v5570_v3 }
 0x2c8   :  { %4768 = vmatpush1.msra.mxu0 %v5463_v47  ;;  %4951 = vmatpush1.msra.mxu1 %v5482_v62 }
 0x2c9   :  { %4769 = vmatprep.subr.mxu0 %v5570_v3  ;;  %4952 = vmatprep.subr.mxu1 %v5570_v3 }
 0x2ca   :  { %4770 = vmatpush1.msra.mxu0 %v5462_v53  ;;  %4953 = vmatpush1.msra.mxu1 %v5481_v31 }
 0x2cb   :  { %4771 = vmatprep.subr.mxu0 %v5570_v3  ;;  %4954 = vmatprep.subr.mxu1 %v5570_v3 }
 0x2cc   :  { %4772 = vmatpush1.msra.mxu0 %v5461_v36  ;;  %4955 = vmatpush1.msra.mxu1 %v5480_v11 }
 0x2cd   :  { %4773 = vmatprep.subr.mxu0 %v5570_v3  ;;  %4956 = vmatprep.subr.mxu1 %v5570_v3 }
 0x2ce   :  { %4774 = vmatpush1.msra.mxu0 %v5460_v17  ;;  %4957 = vmatpush1.msra.mxu1 %v5479_v4 }
 0x2cf   :  { %4775 = vmatprep.subr.mxu0 %v5570_v3  ;;  %4958 = vmatprep.subr.mxu1 %v5570_v3 }
 0x2d0   :  { %4776 = vmatpush1.msra.mxu0 %v5459_v0  ;;  %4959 = vmatpush1.msra.mxu1 %v5478_v15 }
 0x2d1   :  { %4777 = vmatprep.subr.mxu0 %v5570_v3  ;;  %4960 = vmatprep.subr.mxu1 %v5570_v3 }
 0x2d2   :  { %4778 = vmatpush1.msra.mxu0 %v5458_v10  ;;  %4961 = vmatpush1.msra.mxu1 %v5477_v50 }
 0x2d3   :  { %4779 = vmatprep.subr.mxu0 %v5570_v3  ;;  %4962 = vmatprep.subr.mxu1 %v5570_v3 }
 0x2d4   :  { %4780 = vmatpush1.msra.mxu0 %v5457_v7  ;;  %4963 = vmatpush1.msra.mxu1 %v5476_v9 }
 0x2d5   :  { %4781 = vmatprep.subr.mxu0 %v5570_v3  ;;  %4964 = vmatprep.subr.mxu1 %v5570_v3 }
 0x2d6   :  { %4782 = vmatpush1.msra.mxu0 %v5456_v63  ;;  %4965 = vmatpush1.msra.mxu1 %v5475_v30 }
 0x2d7   :  { %4783 = vmatprep.subr.mxu0 %v5570_v3  ;;  %4966 = vmatprep.subr.mxu1 %v5570_v3 }
 0x2d8   :  { %4784 = vmatpush1.msra.mxu0 %v5455_v44  ;;  %4967 = vmatpush1.msra.mxu1 %v5474_v46 }
 0x2d9   :  { %4785 = vmatprep.subr.mxu0 %v5570_v3  ;;  %4968 = vmatprep.subr.mxu1 %v5570_v3 }
 0x2da   :  { %4786 = vmatpush1.msra.mxu0 %v5454_v32  ;;  %4969 = vmatpush1.msra.mxu1 %v5473_v2 }
 0x2db   :  { %4787 = vmatprep.subr.mxu0 %v5570_v3  ;;  %4970 = vmatprep.subr.mxu1 %v5570_v3 }
 0x2dc   :  { %4788 = vmatpush1.msra.mxu0 %v5453_v54  ;;  %4971 = vmatpush1.msra.mxu1 %v5472_v24 }
 0x2dd   :  { %4789 = vmatprep.subr.mxu0 %v5570_v3  ;;  %4972 = vmatprep.subr.mxu1 %v5570_v3 }
 0x2de   :  { %4790 = vmatpush1.msra.mxu0 %v5452_v40  ;;  %4973 = vmatpush1.msra.mxu1 %v5471_v21 }
 0x2df   :  { %4819 = vmatprep.subr.mxu0 %v5570_v3  ;;  %5002 = vmatprep.subr.mxu1 %v5570_v3  ;;  %v2995_v27 = vpop.f32.mrf.mxu0  ;;  %v3178_v37 = vpop.f32.mrf.mxu1 }
 0x2e0   :  { %4820 = vmatpush2.msra.mxu0 %v5469_v33  ;;  %5003 = vmatpush2.msra.mxu1 %v5488_v16  ;;  %v2999_v55 = vadd.f32 %v2995_v27, %v7778_v56 }
 0x2e1   :  { %4821 = vmatprep.subr.mxu0 %v5570_v3  ;;  %5004 = vmatprep.subr.mxu1 %v5570_v3  ;;  %v2997_v13 = vpop.f32.mrf.mxu0  ;;  %v3180_v58 = vpop.f32.mrf.mxu1 }
 0x2e2   :  { %4822 = vmatpush2.msra.mxu0 %v5468_v41  ;;  %5005 = vmatpush2.msra.mxu1 %v5487_v12  ;;  %v3182_v61 = vadd.f32 %v3178_v37, %v2999_v55 }
 0x2e3   :  { %4824 = vmatmul.mubr.f32.vlgmr.msra.gmra.mxu0 %v4754_v59  ;;  %5007 = vmatmul.mubr.f32.vlgmr.msra.gmra.mxu1 %v4937_v39 }
 0x305   :  { %v3361_v14 = vpop.f32.mrf.mxu0  ;;  %v3544_v18 = vpop.f32.mrf.mxu1 }
 0x306   :  { %v3365_v60 = vadd.f32 %v3361_v14, %v3182_v61 }
 0x307   :  { %v3363_v1 = vpop.f32.mrf.mxu0  ;;  %v3546_v26 = vpop.f32.mrf.mxu1 }
 0x308   :  { %v3548_v43 = vadd.f32 %v3544_v18, %v3365_v60 }
 0x332   :  { %v3727_v34 = vpop.f32.mrf.mxu0  ;;  %v3910_v56 = vpop.f32.mrf.mxu1 }
 0x333   :  { %v3731_v57 = vadd.f32 %v3727_v34, %v3548_v43 }
 0x334   :  { %v3729_v49 = vpop.f32.mrf.mxu0  ;;  %v3912_v3 = vpop.f32.mrf.mxu1 }
 0x335   :  { %v3914_v23 = vadd.f32 %v3910_v56, %v3731_v57 }
 0x357   :  { %v4093_v5 = vpop.f32.mrf.mxu0  ;;  %v4276_v29 = vpop.f32.mrf.mxu1 }
 0x358   :  { %v4097_v38 = vadd.f32 %v4093_v5, %v3914_v23 }
 0x359   :  { %v4095_v20 = vpop.f32.mrf.mxu0  ;;  %v4278_v22 = vpop.f32.mrf.mxu1 }
 0x35a   :  { %v4280_v42 = vadd.f32 %v4276_v29, %v4097_v38 }
 0x37d   :  { %v4459_v19 = vpop.f32.mrf.mxu0  ;;  %v4642_v48 = vpop.f32.mrf.mxu1 }
 0x37e   :  { %v4463_v53 = vadd.f32 %v4459_v19, %v4280_v42 }
 0x37f   :  { %v4461_v47 = vpop.f32.mrf.mxu0  ;;  %v4644_v62 = vpop.f32.mrf.mxu1 }
 0x380   :  { %v4646_v31 = vadd.f32 %v4642_v48, %v4463_v53 }
 0x3a3   :  { %v4825_v36 = vpop.f32.mrf.mxu0  ;;  %v5008_v11 = vpop.f32.mrf.mxu1 }
 0x3a4   :  { %v4829_v17 = vadd.f32 %v4825_v36, %v4646_v31 }
 0x3a5   :  { %v4827_v4 = vpop.f32.mrf.mxu0  ;;  %v5010_v0 = vpop.f32.mrf.mxu1 }
 0x3a6   :  { %v5012_v15 = vadd.f32 %v5008_v11, %v4829_v17 }
 0x3a8   :  { %5014 = vst.msk [vmem:[%s7948_s5] sm:$0xff] %vm5013_vm9, %v5012_v15 }

</bundles_post_ra>
